<compile_context>
chip_gen: v6e
topology: v6e:2x2x1
jax: 0.10.0
libtpu: 0.0.40
codegen_flags: <defaults>
</compile_context>

<pallas_src>
import functools

import jax
import jax.numpy as jnp
from jax.experimental import pallas as pl
from jax.experimental.pallas import tpu as pltpu


# ----------------------------- in-kernel helpers -----------------------------

def _layer_norm(x, g, b, eps=1e-5):
    # x: (N, E) f32, g/b: (1, E) f32. PyTorch LayerNorm uses biased variance.
    mu = jnp.mean(x, axis=-1, keepdims=True)
    var = jnp.mean(jnp.square(x - mu), axis=-1, keepdims=True)
    return (x - mu) * jax.lax.rsqrt(var + eps) * g + b


def _mha(x_q, x_kv, w, bvec, causal, *, bt, seq, heads):
    """Causal multi-head attention on lane-dense (bt*seq, E) slabs.

    x_q/x_kv: (bt*seq, E) f32. w: (4, E, E) bf16 = [Wq, Wk, Wv, Wo]. bvec: (4, E) f32.
    causal: (seq, seq) bool (lower-triangular incl. diag == ~ut_mask).
    Returns (bt*seq, E) f32.
    """
    E = x_q.shape[-1]
    dh = E // heads
    scale = 1.0 / float(dh) ** 0.5

    xq_b = x_q.astype(jnp.bfloat16)
    xkv_b = x_kv.astype(jnp.bfloat16)
    # Full-width projections: one big MXU matmul each on the (bt*seq, E) slab.
    Q = jnp.dot(xq_b, w[0], preferred_element_type=jnp.float32) + bvec[0:1, :]
    K = jnp.dot(xkv_b, w[1], preferred_element_type=jnp.float32) + bvec[1:2, :]
    V = jnp.dot(xkv_b, w[2], preferred_element_type=jnp.float32) + bvec[2:3, :]
    Q3 = Q.reshape(bt, seq, E)
    K3 = K.reshape(bt, seq, E)
    V3 = V.reshape(bt, seq, E)

    # TODO(synk): for production seq lengths (L=100-500+), tile K/V along the sequence
    # with an online-softmax (flash) loop and skip fully-masked key blocks instead of
    # materializing the full (L, L) score matrix.
    acc = None
    for h in range(heads):  # heads is small & static; accumulate Wo per head (no concat).
        sl = slice(h * dh, (h + 1) * dh)
        qh = Q3[:, :, sl].astype(jnp.bfloat16)
        kh = K3[:, :, sl].astype(jnp.bfloat16)
        vh = V3[:, :, sl].astype(jnp.bfloat16)
        # Batched-over-batch QK^T on the MXU; scores / softmax stay f32.
        s = jnp.einsum('bqd,bkd->bqk', qh, kh,
                       preferred_element_type=jnp.float32) * scale
        s = jnp.where(causal[None, :, :], s, jnp.float32(-1e30))
        s = s - jnp.max(s, axis=-1, keepdims=True)
        p = jnp.exp(s)
        p = p * pl.reciprocal(jnp.sum(p, axis=-1, keepdims=True), approx=True)
        ctx = jnp.einsum('bqk,bkd->bqd', p.astype(jnp.bfloat16), vh,
                         preferred_element_type=jnp.float32)          # (bt, seq, dh)
        part = jnp.dot(ctx.reshape(bt * seq, dh).astype(jnp.bfloat16), w[3][sl, :],
                       preferred_element_type=jnp.float32)            # (bt*seq, E)
        acc = part if acc is None else acc + part
    return acc + bvec[3:4, :]


def _ffn(x, fw, fb):
    # transformer_FFN: Linear(E,E) -> ReLU -> (Dropout: identity in eval) -> Linear(E,E)
    h = jnp.dot(x.astype(jnp.bfloat16), fw[0], preferred_element_type=jnp.float32) + fb[0:1, :]
    h = jnp.maximum(h, 0.0)
    return jnp.dot(h.astype(jnp.bfloat16), fw[1], preferred_element_type=jnp.float32) + fb[1:2, :]


# --------------------------------- fused kernel --------------------------------

def clsaint_fused_kernel(enc_in_ref, dec_in_ref,
                         e_lng_ref, e_lnb_ref, e_aw_ref, e_ab_ref, e_fw_ref, e_fb_ref,
                         d_lng_ref, d_lnb_ref, d_a1w_ref, d_a1b_ref,
                         d_a2w_ref, d_a2b_ref, d_fw_ref, d_fb_ref,
                         out_wt_ref, out_b_ref, pred_ref, *, heads, num_blocks):
    bt, seq, E = enc_in_ref.shape

    row = jax.lax.broadcasted_iota(jnp.int32, (seq, seq), 0)
    col = jax.lax.broadcasted_iota(jnp.int32, (seq, seq), 1)
    causal = col <= row                          # mask = ~ut_mask(seq_len=n)

    attn = functools.partial(_mha, causal=causal, bt=bt, seq=seq, heads=heads)

    # ------------------------------ encoder stack ------------------------------
    x = enc_in_ref[...].astype(jnp.float32).reshape(bt * seq, E)
    for layer in range(num_blocks):              # static unroll; weights indexed per layer
        lng = e_lng_ref[layer]
        lnb = e_lnb_ref[layer]
        h1 = _layer_norm(x, lng[0:1, :], lnb[0:1, :])
        x = h1 + attn(h1, h1, e_aw_ref[layer], e_ab_ref[layer])
        h2 = _layer_norm(x, lng[1:2, :], lnb[1:2, :])
        x = h2 + _ffn(h2, e_fw_ref[layer], e_fb_ref[layer])
    en = x                                       # encoder output stays resident in VMEM

    # ------------------------------ decoder stack ------------------------------
    out = dec_in_ref[...].astype(jnp.float32).reshape(bt * seq, E)
    for layer in range(num_blocks):
        lng = d_lng_ref[layer]
        lnb = d_lnb_ref[layer]
        # M1 = SkipConct(Multihead(LayerNorm(out)))              (causal self-attn)
        h1 = _layer_norm(out, lng[0:1, :], lnb[0:1, :])
        out = h1 + attn(h1, h1, d_a1w_ref[layer], d_a1b_ref[layer])
        # M2 = SkipConct(Multihead(M1 ; LN(en_out) ; LN(en_out)))  (causal cross-attn)
        en_n = _layer_norm(en, lng[1:2, :], lnb[1:2, :])
        out = out + attn(out, en_n, d_a2w_ref[layer], d_a2b_ref[layer])
        # L = SkipConct(FFN(LayerNorm(M2)))
        h3 = _layer_norm(out, lng[2:3, :], lnb[2:3, :])
        out = h3 + _ffn(h3, d_fw_ref[layer], d_fb_ref[layer])

    # ------------------------- output head (fused) -----------------------------
    logits = jnp.dot(out, out_wt_ref[...], preferred_element_type=jnp.float32) + out_b_ref[0, 0]
    pred_ref[...] = jax.nn.sigmoid(logits)       # (bt*seq, 1)


# ------------------------------ pallas wrapper ---------------------------------

def _const_spec(shape):
    nd = len(shape)
    return pl.BlockSpec(shape, lambda i, _nd=nd: (0,) * _nd)


def clsaint_fused(enc_in, dec_in, enc_p, dec_p, out_w, out_b, *,
                  heads, num_blocks, batch_tile=None):
    B, L, E = enc_in.shape
    bt = B if batch_tile is None else batch_tile
    assert B % bt == 0, "batch_tile must divide the batch"
    assert E % heads == 0, "embedding_size must be divisible by num_attn_heads"
    assert bt == B or (bt * L) % 8 == 0, "partial batch tiles need bt*L % 8 == 0"
    NL = num_blocks

    kern = functools.partial(clsaint_fused_kernel, heads=heads, num_blocks=num_blocks)
    pred_flat = pl.pallas_call(
        kern,
        out_shape=jax.ShapeDtypeStruct((B * L, 1), jnp.float32),
        grid=(B // bt,),
        in_specs=[
            pl.BlockSpec((bt, L, E), lambda i: (i, 0, 0)),   # encoder input embeddings
            pl.BlockSpec((bt, L, E), lambda i: (i, 0, 0)),   # decoder input embeddings
            # Stacked encoder weights (constant index_map -> grid-invariant, one DMA).
            _const_spec((NL, 2, E)), _const_spec((NL, 2, E)),
            _const_spec((NL, 4, E, E)), _const_spec((NL, 4, E)),
            _const_spec((NL, 2, E, E)), _const_spec((NL, 2, E)),
            # Stacked decoder weights.
            _const_spec((NL, 3, E)), _const_spec((NL, 3, E)),
            _const_spec((NL, 4, E, E)), _const_spec((NL, 4, E)),
            _const_spec((NL, 4, E, E)), _const_spec((NL, 4, E)),
            _const_spec((NL, 2, E, E)), _const_spec((NL, 2, E)),
            # Output head (pre-transposed weight (E, 1), bias (1, 1)).
            _const_spec((E, 1)), _const_spec((1, 1)),
        ],
        out_specs=pl.BlockSpec((bt * L, 1), lambda i: (i, 0)),
        compiler_params=pltpu.CompilerParams(
            # Batch tiles are independent -> shard across v7x's two TensorCores.
            dimension_semantics=("parallel",),
            # Headroom above the 16/32 MiB default scoped limit, still < v7x's 64 MiB.
            vmem_limit_bytes=48 * 1024 * 1024,
        ),
    )(enc_in, dec_in,
      enc_p['ln_g'], enc_p['ln_b'], enc_p['attn_w'], enc_p['attn_b'],
      enc_p['ffn_w'], enc_p['ffn_b'],
      dec_p['ln_g'], dec_p['ln_b'], dec_p['a1_w'], dec_p['a1_b'],
      dec_p['a2_w'], dec_p['a2_b'], dec_p['ffn_w'], dec_p['ffn_b'],
      out_w.T, out_b)
    return pred_flat.reshape(B, L)


# ------------------------------ model (eval mode) -----------------------------

def init_clsaint_params(key, num_questions, num_skills, seq_len, E, num_blocks):
    keys = iter(jax.random.split(key, 16))

    def w(shape, scale=0.05, dtype=jnp.float32):
        return (jax.random.normal(next(keys), shape, jnp.float32) * scale).astype(dtype)

    NL = num_blocks
    bf16 = jnp.bfloat16
    return {
        'embd_pos': w((seq_len, E)),                 # nn.Embedding(seq_len, E)
        'embd_ex': w((num_questions + 2, E)),        # nn.Embedding(total_ex + 2, E)
        'emb_cat': w((num_skills + 2, E)),           # nn.Embedding(total_cat + 2, E)
        'embd_res': w((3, E)),                       # nn.Embedding(2 + 1, E)
        'out_w': w((1, E)),                          # nn.Linear(E, 1) weight
        'out_b': jnp.zeros((1, 1), jnp.float32),     # nn.Linear(E, 1) bias
        'enc': {
            'ln_g': jnp.ones((NL, 2, E), jnp.float32),
            'ln_b': jnp.zeros((NL, 2, E), jnp.float32),
            'attn_w': w((NL, 4, E, E), dtype=bf16),   # [Wq, Wk, Wv, Wo] per layer
            'attn_b': jnp.zeros((NL, 4, E), jnp.float32),
            'ffn_w': w((NL, 2, E, E), dtype=bf16),
            'ffn_b': jnp.zeros((NL, 2, E), jnp.float32),
        },
        'dec': {
            'ln_g': jnp.ones((NL, 3, E), jnp.float32),
            'ln_b': jnp.zeros((NL, 3, E), jnp.float32),
            'a1_w': w((NL, 4, E, E), dtype=bf16),
            'a1_b': jnp.zeros((NL, 4, E), jnp.float32),
            'a2_w': w((NL, 4, E, E), dtype=bf16),
            'a2_b': jnp.zeros((NL, 4, E), jnp.float32),
            'ffn_w': w((NL, 2, E, E), dtype=bf16),
            'ffn_b': jnp.zeros((NL, 2, E), jnp.float32),
        },
    }


def clsaint_forward(params, in_ex, in_cat, responses, sdiff, *,
                    heads, num_blocks, token_num, batch_tile=None):
    """Eval-mode CLSAINT.forward: returns pred of shape (B, L-1)."""
    del sdiff, token_num
    # NOTE: under de_type='none_<token_num>' the bucketized difficulty (diff_ox) is
    # never consumed (rotary='none', no sde embedding), so the torch.bucketize /
    # searchsorted work of the reference code is dead and intentionally skipped.

    B, L = in_ex.shape

    in_pos = params['embd_pos'][:L]                              # pos_encode + embd_pos

    # Encoder first-block input: exercise emb + skill emb + positional emb (bf16 feed).
    enc_in = (params['embd_ex'][in_ex] + params['emb_cat'][in_cat]
              + in_pos[None, :, :]).astype(jnp.bfloat16)

    # Decoder input tokens: [start_token=2, cleaned responses] + positional emb.
    in_res = responses[:, :-1]
    start_token = jnp.full((B, 1), 2, dtype=responses.dtype)
    in_res_clean = in_res * (in_res > -1).astype(in_res.dtype)
    in_res_full = jnp.concatenate([start_token, in_res_clean], axis=-1)   # (B, L)
    dec_in = (params['embd_res'][in_res_full] + in_pos[None, :, :]).astype(jnp.bfloat16)

    pred = clsaint_fused(enc_in, dec_in, params['enc'], params['dec'],
                         params['out_w'], params['out_b'],
                         heads=heads, num_blocks=num_blocks, batch_tile=batch_tile)
    return pred[:, 1:]                                           # drop the start-token slot


# ----------------------------------- main -------------------------------------

if __name__ == "__main__":
    B, L, E, H = 2, 8, 32, 2
    num_questions, num_skills = 12, 10
    num_blocks, token_num = 2, 2          # de_type = 'none_2'

    key = jax.random.PRNGKey(0)
    k_ex, k_cat, k_res, k_diff, k_par = jax.random.split(key, 5)

    in_ex = jax.random.randint(k_ex, (B, L), 0, num_questions, dtype=jnp.int32)
    in_cat = jax.random.randint(k_cat, (B, L), 0, num_skills, dtype=jnp.int32)
    responses = jax.random.randint(k_res, (B, L), 0, 2, dtype=jnp.int32)
    responses = responses.at[:, -1].set(-1)          # exercise the (in_res > -1) masking path
    sdiff = jax.random.uniform(k_diff, (B, L), dtype=jnp.float32)

    params = init_clsaint_params(k_par, num_questions, num_skills, L, E, num_blocks)

    pred = clsaint_forward(params, in_ex, in_cat, responses, sdiff,
                           heads=H, num_blocks=num_blocks, token_num=token_num)
    pred = jax.block_until_ready(pred)

    assert pred.shape == (B, L - 1)
    assert bool(jnp.all(jnp.isfinite(pred)))
    assert bool(jnp.all((pred >= 0.0) & (pred <= 1.0)))
    print("KERNEL_OK")
</pallas_src>

<mosaic_0001>
module attributes {stable_mosaic.version = 11 : i64} {
  func.func @clsaint_fused_kernel(%arg0: i32, %arg1: memref<2x8x32xbf16, #tpu.memory_space<vmem>>, %arg2: memref<2x8x32xbf16, #tpu.memory_space<vmem>>, %arg3: memref<2x2x32xf32, #tpu.memory_space<vmem>>, %arg4: memref<2x2x32xf32, #tpu.memory_space<vmem>>, %arg5: memref<2x4x32x32xbf16, #tpu.memory_space<vmem>>, %arg6: memref<2x4x32xf32, #tpu.memory_space<vmem>>, %arg7: memref<2x2x32x32xbf16, #tpu.memory_space<vmem>>, %arg8: memref<2x2x32xf32, #tpu.memory_space<vmem>>, %arg9: memref<2x3x32xf32, #tpu.memory_space<vmem>>, %arg10: memref<2x3x32xf32, #tpu.memory_space<vmem>>, %arg11: memref<2x4x32x32xbf16, #tpu.memory_space<vmem>>, %arg12: memref<2x4x32xf32, #tpu.memory_space<vmem>>, %arg13: memref<2x4x32x32xbf16, #tpu.memory_space<vmem>>, %arg14: memref<2x4x32xf32, #tpu.memory_space<vmem>>, %arg15: memref<2x2x32x32xbf16, #tpu.memory_space<vmem>>, %arg16: memref<2x2x32xf32, #tpu.memory_space<vmem>>, %arg17: memref<32x1xf32, #tpu.memory_space<vmem>>, %arg18: memref<1x1xf32, #tpu.memory_space<vmem>>, %arg19: memref<16x1xf32, #tpu.memory_space<vmem>>) attributes {dimension_semantics = [#tpu.dimension_semantics<parallel>], iteration_bounds = array<i64: 1>, scalar_prefetch = 0 : i64, scratch_operands = 0 : i64, tpu.core_type = #tpu.core_type<tc>, window_params = [{transform_indices = @transform_0, window_bounds = array<i64: 2, 8, 32>}, {transform_indices = @transform_1, window_bounds = array<i64: 2, 8, 32>}, {pipeline_mode = #tpu.pipeline_mode<synchronous>, transform_indices = @transform_2, window_bounds = array<i64: 2, 2, 32>}, {pipeline_mode = #tpu.pipeline_mode<synchronous>, transform_indices = @transform_3, window_bounds = array<i64: 2, 2, 32>}, {pipeline_mode = #tpu.pipeline_mode<synchronous>, transform_indices = @transform_4, window_bounds = array<i64: 2, 4, 32, 32>}, {pipeline_mode = #tpu.pipeline_mode<synchronous>, transform_indices = @transform_5, window_bounds = array<i64: 2, 4, 32>}, {pipeline_mode = #tpu.pipeline_mode<synchronous>, transform_indices = @transform_6, window_bounds = array<i64: 2, 2, 32, 32>}, {pipeline_mode = #tpu.pipeline_mode<synchronous>, transform_indices = @transform_7, window_bounds = array<i64: 2, 2, 32>}, {pipeline_mode = #tpu.pipeline_mode<synchronous>, transform_indices = @transform_8, window_bounds = array<i64: 2, 3, 32>}, {pipeline_mode = #tpu.pipeline_mode<synchronous>, transform_indices = @transform_9, window_bounds = array<i64: 2, 3, 32>}, {pipeline_mode = #tpu.pipeline_mode<synchronous>, transform_indices = @transform_10, window_bounds = array<i64: 2, 4, 32, 32>}, {pipeline_mode = #tpu.pipeline_mode<synchronous>, transform_indices = @transform_11, window_bounds = array<i64: 2, 4, 32>}, {pipeline_mode = #tpu.pipeline_mode<synchronous>, transform_indices = @transform_12, window_bounds = array<i64: 2, 4, 32, 32>}, {pipeline_mode = #tpu.pipeline_mode<synchronous>, transform_indices = @transform_13, window_bounds = array<i64: 2, 4, 32>}, {pipeline_mode = #tpu.pipeline_mode<synchronous>, transform_indices = @transform_14, window_bounds = array<i64: 2, 2, 32, 32>}, {pipeline_mode = #tpu.pipeline_mode<synchronous>, transform_indices = @transform_15, window_bounds = array<i64: 2, 2, 32>}, {pipeline_mode = #tpu.pipeline_mode<synchronous>, transform_indices = @transform_16, window_bounds = array<i64: 32, 1>}, {pipeline_mode = #tpu.pipeline_mode<synchronous>, transform_indices = @transform_17, window_bounds = array<i64: 1, 1>}, {transform_indices = @transform_18, window_bounds = array<i64: 16, 1>}]} {
    %0 = tpu.iota {dimensions = array<i32: 0>} : vector<8x8xi32>
    %1 = tpu.iota {dimensions = array<i32: 1>} : vector<8x8xi32>
    %2 = arith.cmpi sle, %1, %0 : vector<8x8xi32>
    %c0 = arith.constant 0 : index
    %c0_0 = arith.constant 0 : index
    %c0_1 = arith.constant 0 : index
    %3 = vector.load %arg1[%c0, %c0_0, %c0_1] : memref<2x8x32xbf16, #tpu.memory_space<vmem>>, vector<2x8x32xbf16>
    %4 = arith.extf %3 : vector<2x8x32xbf16> to vector<2x8x32xf32>
    %5 = vector.shape_cast %4 : vector<2x8x32xf32> to vector<16x32xf32>
    %c0_2 = arith.constant 0 : index
    %c0_3 = arith.constant 0 : index
    %c0_4 = arith.constant 0 : index
    %6 = vector.load %arg3[%c0_2, %c0_3, %c0_4] : memref<2x2x32xf32, #tpu.memory_space<vmem>>, vector<1x2x32xf32>
    %7 = vector.shape_cast %6 : vector<1x2x32xf32> to vector<2x32xf32>
    %c0_5 = arith.constant 0 : index
    %c0_6 = arith.constant 0 : index
    %c0_7 = arith.constant 0 : index
    %8 = vector.load %arg4[%c0_5, %c0_6, %c0_7] : memref<2x2x32xf32, #tpu.memory_space<vmem>>, vector<1x2x32xf32>
    %9 = vector.shape_cast %8 : vector<1x2x32xf32> to vector<2x32xf32>
    %10 = vector.extract_strided_slice %7 {offsets = [0, 0], sizes = [1, 32], strides = [1, 1]} : vector<2x32xf32> to vector<1x32xf32>
    %11 = vector.extract_strided_slice %9 {offsets = [0, 0], sizes = [1, 32], strides = [1, 1]} : vector<2x32xf32> to vector<1x32xf32>
    %cst = arith.constant dense<0.000000e+00> : vector<16xf32>
    %12 = vector.multi_reduction <add>, %5, %cst [1] : vector<16x32xf32> to vector<16xf32>
    %13 = vector.shape_cast %12 : vector<16xf32> to vector<16x1xf32>
    %cst_8 = arith.constant 3.200000e+01 : f32
    %14 = vector.broadcast %cst_8 : f32 to vector<16x1xf32>
    %15 = arith.divf %13, %14 : vector<16x1xf32>
    %16 = vector.broadcast %15 : vector<16x1xf32> to vector<16x32xf32>
    %17 = arith.subf %5, %16 : vector<16x32xf32>
    %18 = arith.mulf %17, %17 : vector<16x32xf32>
    %cst_9 = arith.constant dense<0.000000e+00> : vector<16xf32>
    %19 = vector.multi_reduction <add>, %18, %cst_9 [1] : vector<16x32xf32> to vector<16xf32>
    %20 = vector.shape_cast %19 : vector<16xf32> to vector<16x1xf32>
    %cst_10 = arith.constant 3.200000e+01 : f32
    %21 = vector.broadcast %cst_10 : f32 to vector<16x1xf32>
    %22 = arith.divf %20, %21 : vector<16x1xf32>
    %23 = vector.broadcast %15 : vector<16x1xf32> to vector<16x32xf32>
    %24 = arith.subf %5, %23 : vector<16x32xf32>
    %cst_11 = arith.constant 9.99999974E-6 : f32
    %25 = vector.broadcast %cst_11 : f32 to vector<16x1xf32>
    %26 = arith.addf %22, %25 : vector<16x1xf32>
    %27 = math.rsqrt %26 : vector<16x1xf32>
    %28 = vector.broadcast %27 : vector<16x1xf32> to vector<16x32xf32>
    %29 = arith.mulf %24, %28 : vector<16x32xf32>
    %30 = vector.broadcast %10 : vector<1x32xf32> to vector<16x32xf32>
    %31 = arith.mulf %29, %30 : vector<16x32xf32>
    %32 = vector.broadcast %11 : vector<1x32xf32> to vector<16x32xf32>
    %33 = arith.addf %31, %32 : vector<16x32xf32>
    %c0_12 = arith.constant 0 : index
    %c0_13 = arith.constant 0 : index
    %c0_14 = arith.constant 0 : index
    %c0_15 = arith.constant 0 : index
    %34 = vector.load %arg5[%c0_12, %c0_13, %c0_14, %c0_15] : memref<2x4x32x32xbf16, #tpu.memory_space<vmem>>, vector<1x4x32x32xbf16>
    %35 = vector.shape_cast %34 : vector<1x4x32x32xbf16> to vector<4x32x32xbf16>
    %c0_16 = arith.constant 0 : index
    %c0_17 = arith.constant 0 : index
    %c0_18 = arith.constant 0 : index
    %36 = vector.load %arg6[%c0_16, %c0_17, %c0_18] : memref<2x4x32xf32, #tpu.memory_space<vmem>>, vector<1x4x32xf32>
    %37 = vector.shape_cast %36 : vector<1x4x32xf32> to vector<4x32xf32>
    %38 = arith.truncf %33 : vector<16x32xf32> to vector<16x32xbf16>
    %39 = arith.truncf %33 : vector<16x32xf32> to vector<16x32xbf16>
    %40 = vector.extract_strided_slice %35 {offsets = [0, 0, 0], sizes = [1, 32, 32], strides = [1, 1, 1]} : vector<4x32x32xbf16> to vector<1x32x32xbf16>
    %41 = vector.shape_cast %40 : vector<1x32x32xbf16> to vector<32x32xbf16>
    %cst_19 = arith.constant dense<0.000000e+00> : vector<16x32xf32>
    %42 = tpu.matmul %38, %41, %cst_19 {dimension_numbers = #tpu.dot_dimension_numbers<[1], [0], [0], [1], [0, 0, 1, 1], [], []>} : vector<16x32xbf16>, vector<32x32xbf16>, vector<16x32xf32> -> vector<16x32xf32>
    %43 = vector.extract_strided_slice %37 {offsets = [0, 0], sizes = [1, 32], strides = [1, 1]} : vector<4x32xf32> to vector<1x32xf32>
    %44 = vector.broadcast %43 : vector<1x32xf32> to vector<16x32xf32>
    %45 = arith.addf %42, %44 : vector<16x32xf32>
    %46 = vector.extract_strided_slice %35 {offsets = [1, 0, 0], sizes = [1, 32, 32], strides = [1, 1, 1]} : vector<4x32x32xbf16> to vector<1x32x32xbf16>
    %47 = vector.shape_cast %46 : vector<1x32x32xbf16> to vector<32x32xbf16>
    %cst_20 = arith.constant dense<0.000000e+00> : vector<16x32xf32>
    %48 = tpu.matmul %39, %47, %cst_20 {dimension_numbers = #tpu.dot_dimension_numbers<[1], [0], [0], [1], [0, 0, 1, 1], [], []>} : vector<16x32xbf16>, vector<32x32xbf16>, vector<16x32xf32> -> vector<16x32xf32>
    %49 = vector.extract_strided_slice %37 {offsets = [1, 0], sizes = [1, 32], strides = [1, 1]} : vector<4x32xf32> to vector<1x32xf32>
    %50 = vector.broadcast %49 : vector<1x32xf32> to vector<16x32xf32>
    %51 = arith.addf %48, %50 : vector<16x32xf32>
    %52 = vector.extract_strided_slice %35 {offsets = [2, 0, 0], sizes = [1, 32, 32], strides = [1, 1, 1]} : vector<4x32x32xbf16> to vector<1x32x32xbf16>
    %53 = vector.shape_cast %52 : vector<1x32x32xbf16> to vector<32x32xbf16>
    %cst_21 = arith.constant dense<0.000000e+00> : vector<16x32xf32>
    %54 = tpu.matmul %39, %53, %cst_21 {dimension_numbers = #tpu.dot_dimension_numbers<[1], [0], [0], [1], [0, 0, 1, 1], [], []>} : vector<16x32xbf16>, vector<32x32xbf16>, vector<16x32xf32> -> vector<16x32xf32>
    %55 = vector.extract_strided_slice %37 {offsets = [2, 0], sizes = [1, 32], strides = [1, 1]} : vector<4x32xf32> to vector<1x32xf32>
    %56 = vector.broadcast %55 : vector<1x32xf32> to vector<16x32xf32>
    %57 = arith.addf %54, %56 : vector<16x32xf32>
    %58 = vector.shape_cast %45 : vector<16x32xf32> to vector<2x8x32xf32>
    %59 = vector.shape_cast %51 : vector<16x32xf32> to vector<2x8x32xf32>
    %60 = vector.shape_cast %57 : vector<16x32xf32> to vector<2x8x32xf32>
    %61 = vector.extract_strided_slice %58 {offsets = [0, 0, 0], sizes = [2, 8, 16], strides = [1, 1, 1]} : vector<2x8x32xf32> to vector<2x8x16xf32>
    %62 = arith.truncf %61 : vector<2x8x16xf32> to vector<2x8x16xbf16>
    %63 = vector.extract_strided_slice %59 {offsets = [0, 0, 0], sizes = [2, 8, 16], strides = [1, 1, 1]} : vector<2x8x32xf32> to vector<2x8x16xf32>
    %64 = arith.truncf %63 : vector<2x8x16xf32> to vector<2x8x16xbf16>
    %65 = vector.extract_strided_slice %60 {offsets = [0, 0, 0], sizes = [2, 8, 16], strides = [1, 1, 1]} : vector<2x8x32xf32> to vector<2x8x16xf32>
    %66 = arith.truncf %65 : vector<2x8x16xf32> to vector<2x8x16xbf16>
    "tpu.trace_start"() <{level = 10 : i32, message = "bqd,bkd->bqk"}> : () -> ()
    %cst_22 = arith.constant dense<0.000000e+00> : vector<2x8x8xf32>
    %67 = tpu.matmul %62, %64, %cst_22 {dimension_numbers = #tpu.dot_dimension_numbers<[2], [2], [1], [1], [0, 0, 0, 1, 1, 1], [0], [0]>} : vector<2x8x16xbf16>, vector<2x8x16xbf16>, vector<2x8x8xf32> -> vector<2x8x8xf32>
    "tpu.trace_stop"() : () -> ()
    %cst_23 = arith.constant 2.500000e-01 : f32
    %68 = vector.broadcast %cst_23 : f32 to vector<2x8x8xf32>
    %69 = arith.mulf %67, %68 : vector<2x8x8xf32>
    %70 = vector.shape_cast %2 : vector<8x8xi1> to vector<1x8x8xi1>
    %cst_24 = arith.constant -1.000000e+30 : f32
    %71 = vector.shape_cast %70 : vector<1x8x8xi1> to vector<1x8x8xi1>
    %72 = vector.broadcast %71 : vector<1x8x8xi1> to vector<2x8x8xi1>
    %73 = vector.broadcast %cst_24 : f32 to vector<2x8x8xf32>
    %74 = arith.select %72, %69, %73 : vector<2x8x8xi1>, vector<2x8x8xf32>
    %cst_25 = arith.constant dense<0xFF800000> : vector<2x8xf32>
    %75 = vector.multi_reduction <maximumf>, %74, %cst_25 [2] : vector<2x8x8xf32> to vector<2x8xf32>
    %76 = vector.shape_cast %75 : vector<2x8xf32> to vector<2x8x1xf32>
    %77 = vector.broadcast %76 : vector<2x8x1xf32> to vector<2x8x8xf32>
    %78 = arith.subf %74, %77 : vector<2x8x8xf32>
    %79 = math.exp %78 : vector<2x8x8xf32>
    %cst_26 = arith.constant dense<0.000000e+00> : vector<2x8xf32>
    %80 = vector.multi_reduction <add>, %79, %cst_26 [2] : vector<2x8x8xf32> to vector<2x8xf32>
    %81 = vector.shape_cast %80 : vector<2x8xf32> to vector<2x8x1xf32>
    %82 = tpu.reciprocal %81 {approx = true} : vector<2x8x1xf32> -> vector<2x8x1xf32>
    %83 = vector.broadcast %82 : vector<2x8x1xf32> to vector<2x8x8xf32>
    %84 = arith.mulf %79, %83 : vector<2x8x8xf32>
    %85 = arith.truncf %84 : vector<2x8x8xf32> to vector<2x8x8xbf16>
    "tpu.trace_start"() <{level = 10 : i32, message = "bqk,bkd->bqd"}> : () -> ()
    %cst_27 = arith.constant dense<0.000000e+00> : vector<2x8x16xf32>
    %86 = tpu.matmul %85, %66, %cst_27 {dimension_numbers = #tpu.dot_dimension_numbers<[2], [1], [1], [2], [0, 0, 0, 1, 1, 2], [0], [0]>} : vector<2x8x8xbf16>, vector<2x8x16xbf16>, vector<2x8x16xf32> -> vector<2x8x16xf32>
    "tpu.trace_stop"() : () -> ()
    %87 = vector.shape_cast %86 : vector<2x8x16xf32> to vector<16x16xf32>
    %88 = arith.truncf %87 : vector<16x16xf32> to vector<16x16xbf16>
    %89 = vector.extract_strided_slice %35 {offsets = [3, 0, 0], sizes = [1, 32, 32], strides = [1, 1, 1]} : vector<4x32x32xbf16> to vector<1x32x32xbf16>
    %90 = vector.shape_cast %89 : vector<1x32x32xbf16> to vector<32x32xbf16>
    %91 = vector.extract_strided_slice %90 {offsets = [0, 0], sizes = [16, 32], strides = [1, 1]} : vector<32x32xbf16> to vector<16x32xbf16>
    %cst_28 = arith.constant dense<0.000000e+00> : vector<16x32xf32>
    %92 = tpu.matmul %88, %91, %cst_28 {dimension_numbers = #tpu.dot_dimension_numbers<[1], [0], [0], [1], [0, 0, 1, 1], [], []>} : vector<16x16xbf16>, vector<16x32xbf16>, vector<16x32xf32> -> vector<16x32xf32>
    %93 = vector.extract_strided_slice %58 {offsets = [0, 0, 16], sizes = [2, 8, 16], strides = [1, 1, 1]} : vector<2x8x32xf32> to vector<2x8x16xf32>
    %94 = arith.truncf %93 : vector<2x8x16xf32> to vector<2x8x16xbf16>
    %95 = vector.extract_strided_slice %59 {offsets = [0, 0, 16], sizes = [2, 8, 16], strides = [1, 1, 1]} : vector<2x8x32xf32> to vector<2x8x16xf32>
    %96 = arith.truncf %95 : vector<2x8x16xf32> to vector<2x8x16xbf16>
    %97 = vector.extract_strided_slice %60 {offsets = [0, 0, 16], sizes = [2, 8, 16], strides = [1, 1, 1]} : vector<2x8x32xf32> to vector<2x8x16xf32>
    %98 = arith.truncf %97 : vector<2x8x16xf32> to vector<2x8x16xbf16>
    "tpu.trace_start"() <{level = 10 : i32, message = "bqd,bkd->bqk"}> : () -> ()
    %cst_29 = arith.constant dense<0.000000e+00> : vector<2x8x8xf32>
    %99 = tpu.matmul %94, %96, %cst_29 {dimension_numbers = #tpu.dot_dimension_numbers<[2], [2], [1], [1], [0, 0, 0, 1, 1, 1], [0], [0]>} : vector<2x8x16xbf16>, vector<2x8x16xbf16>, vector<2x8x8xf32> -> vector<2x8x8xf32>
    "tpu.trace_stop"() : () -> ()
    %cst_30 = arith.constant 2.500000e-01 : f32
    %100 = vector.broadcast %cst_30 : f32 to vector<2x8x8xf32>
    %101 = arith.mulf %99, %100 : vector<2x8x8xf32>
    %102 = vector.shape_cast %2 : vector<8x8xi1> to vector<1x8x8xi1>
    %cst_31 = arith.constant -1.000000e+30 : f32
    %103 = vector.shape_cast %102 : vector<1x8x8xi1> to vector<1x8x8xi1>
    %104 = vector.broadcast %103 : vector<1x8x8xi1> to vector<2x8x8xi1>
    %105 = vector.broadcast %cst_31 : f32 to vector<2x8x8xf32>
    %106 = arith.select %104, %101, %105 : vector<2x8x8xi1>, vector<2x8x8xf32>
    %cst_32 = arith.constant dense<0xFF800000> : vector<2x8xf32>
    %107 = vector.multi_reduction <maximumf>, %106, %cst_32 [2] : vector<2x8x8xf32> to vector<2x8xf32>
    %108 = vector.shape_cast %107 : vector<2x8xf32> to vector<2x8x1xf32>
    %109 = vector.broadcast %108 : vector<2x8x1xf32> to vector<2x8x8xf32>
    %110 = arith.subf %106, %109 : vector<2x8x8xf32>
    %111 = math.exp %110 : vector<2x8x8xf32>
    %cst_33 = arith.constant dense<0.000000e+00> : vector<2x8xf32>
    %112 = vector.multi_reduction <add>, %111, %cst_33 [2] : vector<2x8x8xf32> to vector<2x8xf32>
    %113 = vector.shape_cast %112 : vector<2x8xf32> to vector<2x8x1xf32>
    %114 = tpu.reciprocal %113 {approx = true} : vector<2x8x1xf32> -> vector<2x8x1xf32>
    %115 = vector.broadcast %114 : vector<2x8x1xf32> to vector<2x8x8xf32>
    %116 = arith.mulf %111, %115 : vector<2x8x8xf32>
    %117 = arith.truncf %116 : vector<2x8x8xf32> to vector<2x8x8xbf16>
    "tpu.trace_start"() <{level = 10 : i32, message = "bqk,bkd->bqd"}> : () -> ()
    %cst_34 = arith.constant dense<0.000000e+00> : vector<2x8x16xf32>
    %118 = tpu.matmul %117, %98, %cst_34 {dimension_numbers = #tpu.dot_dimension_numbers<[2], [1], [1], [2], [0, 0, 0, 1, 1, 2], [0], [0]>} : vector<2x8x8xbf16>, vector<2x8x16xbf16>, vector<2x8x16xf32> -> vector<2x8x16xf32>
    "tpu.trace_stop"() : () -> ()
    %119 = vector.shape_cast %118 : vector<2x8x16xf32> to vector<16x16xf32>
    %120 = arith.truncf %119 : vector<16x16xf32> to vector<16x16xbf16>
    %121 = vector.extract_strided_slice %35 {offsets = [3, 0, 0], sizes = [1, 32, 32], strides = [1, 1, 1]} : vector<4x32x32xbf16> to vector<1x32x32xbf16>
    %122 = vector.shape_cast %121 : vector<1x32x32xbf16> to vector<32x32xbf16>
    %123 = vector.extract_strided_slice %122 {offsets = [16, 0], sizes = [16, 32], strides = [1, 1]} : vector<32x32xbf16> to vector<16x32xbf16>
    %cst_35 = arith.constant dense<0.000000e+00> : vector<16x32xf32>
    %124 = tpu.matmul %120, %123, %cst_35 {dimension_numbers = #tpu.dot_dimension_numbers<[1], [0], [0], [1], [0, 0, 1, 1], [], []>} : vector<16x16xbf16>, vector<16x32xbf16>, vector<16x32xf32> -> vector<16x32xf32>
    %125 = arith.addf %92, %124 : vector<16x32xf32>
    %126 = vector.extract_strided_slice %37 {offsets = [3, 0], sizes = [1, 32], strides = [1, 1]} : vector<4x32xf32> to vector<1x32xf32>
    %127 = vector.broadcast %126 : vector<1x32xf32> to vector<16x32xf32>
    %128 = arith.addf %125, %127 : vector<16x32xf32>
    %129 = arith.addf %33, %128 : vector<16x32xf32>
    %130 = vector.extract_strided_slice %7 {offsets = [1, 0], sizes = [1, 32], strides = [1, 1]} : vector<2x32xf32> to vector<1x32xf32>
    %131 = vector.extract_strided_slice %9 {offsets = [1, 0], sizes = [1, 32], strides = [1, 1]} : vector<2x32xf32> to vector<1x32xf32>
    %cst_36 = arith.constant dense<0.000000e+00> : vector<16xf32>
    %132 = vector.multi_reduction <add>, %129, %cst_36 [1] : vector<16x32xf32> to vector<16xf32>
    %133 = vector.shape_cast %132 : vector<16xf32> to vector<16x1xf32>
    %cst_37 = arith.constant 3.200000e+01 : f32
    %134 = vector.broadcast %cst_37 : f32 to vector<16x1xf32>
    %135 = arith.divf %133, %134 : vector<16x1xf32>
    %136 = vector.broadcast %135 : vector<16x1xf32> to vector<16x32xf32>
    %137 = arith.subf %129, %136 : vector<16x32xf32>
    %138 = arith.mulf %137, %137 : vector<16x32xf32>
    %cst_38 = arith.constant dense<0.000000e+00> : vector<16xf32>
    %139 = vector.multi_reduction <add>, %138, %cst_38 [1] : vector<16x32xf32> to vector<16xf32>
    %140 = vector.shape_cast %139 : vector<16xf32> to vector<16x1xf32>
    %cst_39 = arith.constant 3.200000e+01 : f32
    %141 = vector.broadcast %cst_39 : f32 to vector<16x1xf32>
    %142 = arith.divf %140, %141 : vector<16x1xf32>
    %143 = vector.broadcast %135 : vector<16x1xf32> to vector<16x32xf32>
    %144 = arith.subf %129, %143 : vector<16x32xf32>
    %cst_40 = arith.constant 9.99999974E-6 : f32
    %145 = vector.broadcast %cst_40 : f32 to vector<16x1xf32>
    %146 = arith.addf %142, %145 : vector<16x1xf32>
    %147 = math.rsqrt %146 : vector<16x1xf32>
    %148 = vector.broadcast %147 : vector<16x1xf32> to vector<16x32xf32>
    %149 = arith.mulf %144, %148 : vector<16x32xf32>
    %150 = vector.broadcast %130 : vector<1x32xf32> to vector<16x32xf32>
    %151 = arith.mulf %149, %150 : vector<16x32xf32>
    %152 = vector.broadcast %131 : vector<1x32xf32> to vector<16x32xf32>
    %153 = arith.addf %151, %152 : vector<16x32xf32>
    %c0_41 = arith.constant 0 : index
    %c0_42 = arith.constant 0 : index
    %c0_43 = arith.constant 0 : index
    %c0_44 = arith.constant 0 : index
    %154 = vector.load %arg7[%c0_41, %c0_42, %c0_43, %c0_44] : memref<2x2x32x32xbf16, #tpu.memory_space<vmem>>, vector<1x2x32x32xbf16>
    %155 = vector.shape_cast %154 : vector<1x2x32x32xbf16> to vector<2x32x32xbf16>
    %c0_45 = arith.constant 0 : index
    %c0_46 = arith.constant 0 : index
    %c0_47 = arith.constant 0 : index
    %156 = vector.load %arg8[%c0_45, %c0_46, %c0_47] : memref<2x2x32xf32, #tpu.memory_space<vmem>>, vector<1x2x32xf32>
    %157 = vector.shape_cast %156 : vector<1x2x32xf32> to vector<2x32xf32>
    %158 = arith.truncf %153 : vector<16x32xf32> to vector<16x32xbf16>
    %159 = vector.extract_strided_slice %155 {offsets = [0, 0, 0], sizes = [1, 32, 32], strides = [1, 1, 1]} : vector<2x32x32xbf16> to vector<1x32x32xbf16>
    %160 = vector.shape_cast %159 : vector<1x32x32xbf16> to vector<32x32xbf16>
    %cst_48 = arith.constant dense<0.000000e+00> : vector<16x32xf32>
    %161 = tpu.matmul %158, %160, %cst_48 {dimension_numbers = #tpu.dot_dimension_numbers<[1], [0], [0], [1], [0, 0, 1, 1], [], []>} : vector<16x32xbf16>, vector<32x32xbf16>, vector<16x32xf32> -> vector<16x32xf32>
    %162 = vector.extract_strided_slice %157 {offsets = [0, 0], sizes = [1, 32], strides = [1, 1]} : vector<2x32xf32> to vector<1x32xf32>
    %163 = vector.broadcast %162 : vector<1x32xf32> to vector<16x32xf32>
    %164 = arith.addf %161, %163 : vector<16x32xf32>
    %cst_49 = arith.constant 0.000000e+00 : f32
    %165 = vector.broadcast %cst_49 : f32 to vector<16x32xf32>
    %166 = arith.maximumf %164, %165 : vector<16x32xf32>
    %167 = arith.truncf %166 : vector<16x32xf32> to vector<16x32xbf16>
    %168 = vector.extract_strided_slice %155 {offsets = [1, 0, 0], sizes = [1, 32, 32], strides = [1, 1, 1]} : vector<2x32x32xbf16> to vector<1x32x32xbf16>
    %169 = vector.shape_cast %168 : vector<1x32x32xbf16> to vector<32x32xbf16>
    %cst_50 = arith.constant dense<0.000000e+00> : vector<16x32xf32>
    %170 = tpu.matmul %167, %169, %cst_50 {dimension_numbers = #tpu.dot_dimension_numbers<[1], [0], [0], [1], [0, 0, 1, 1], [], []>} : vector<16x32xbf16>, vector<32x32xbf16>, vector<16x32xf32> -> vector<16x32xf32>
    %171 = vector.extract_strided_slice %157 {offsets = [1, 0], sizes = [1, 32], strides = [1, 1]} : vector<2x32xf32> to vector<1x32xf32>
    %172 = vector.broadcast %171 : vector<1x32xf32> to vector<16x32xf32>
    %173 = arith.addf %170, %172 : vector<16x32xf32>
    %174 = arith.addf %153, %173 : vector<16x32xf32>
    %c1 = arith.constant 1 : index
    %c0_51 = arith.constant 0 : index
    %c0_52 = arith.constant 0 : index
    %175 = vector.load %arg3[%c1, %c0_51, %c0_52] : memref<2x2x32xf32, #tpu.memory_space<vmem>>, vector<1x2x32xf32>
    %176 = vector.shape_cast %175 : vector<1x2x32xf32> to vector<2x32xf32>
    %c1_53 = arith.constant 1 : index
    %c0_54 = arith.constant 0 : index
    %c0_55 = arith.constant 0 : index
    %177 = vector.load %arg4[%c1_53, %c0_54, %c0_55] : memref<2x2x32xf32, #tpu.memory_space<vmem>>, vector<1x2x32xf32>
    %178 = vector.shape_cast %177 : vector<1x2x32xf32> to vector<2x32xf32>
    %179 = vector.extract_strided_slice %176 {offsets = [0, 0], sizes = [1, 32], strides = [1, 1]} : vector<2x32xf32> to vector<1x32xf32>
    %180 = vector.extract_strided_slice %178 {offsets = [0, 0], sizes = [1, 32], strides = [1, 1]} : vector<2x32xf32> to vector<1x32xf32>
    %cst_56 = arith.constant dense<0.000000e+00> : vector<16xf32>
    %181 = vector.multi_reduction <add>, %174, %cst_56 [1] : vector<16x32xf32> to vector<16xf32>
    %182 = vector.shape_cast %181 : vector<16xf32> to vector<16x1xf32>
    %cst_57 = arith.constant 3.200000e+01 : f32
    %183 = vector.broadcast %cst_57 : f32 to vector<16x1xf32>
    %184 = arith.divf %182, %183 : vector<16x1xf32>
    %185 = vector.broadcast %184 : vector<16x1xf32> to vector<16x32xf32>
    %186 = arith.subf %174, %185 : vector<16x32xf32>
    %187 = arith.mulf %186, %186 : vector<16x32xf32>
    %cst_58 = arith.constant dense<0.000000e+00> : vector<16xf32>
    %188 = vector.multi_reduction <add>, %187, %cst_58 [1] : vector<16x32xf32> to vector<16xf32>
    %189 = vector.shape_cast %188 : vector<16xf32> to vector<16x1xf32>
    %cst_59 = arith.constant 3.200000e+01 : f32
    %190 = vector.broadcast %cst_59 : f32 to vector<16x1xf32>
    %191 = arith.divf %189, %190 : vector<16x1xf32>
    %192 = vector.broadcast %184 : vector<16x1xf32> to vector<16x32xf32>
    %193 = arith.subf %174, %192 : vector<16x32xf32>
    %cst_60 = arith.constant 9.99999974E-6 : f32
    %194 = vector.broadcast %cst_60 : f32 to vector<16x1xf32>
    %195 = arith.addf %191, %194 : vector<16x1xf32>
    %196 = math.rsqrt %195 : vector<16x1xf32>
    %197 = vector.broadcast %196 : vector<16x1xf32> to vector<16x32xf32>
    %198 = arith.mulf %193, %197 : vector<16x32xf32>
    %199 = vector.broadcast %179 : vector<1x32xf32> to vector<16x32xf32>
    %200 = arith.mulf %198, %199 : vector<16x32xf32>
    %201 = vector.broadcast %180 : vector<1x32xf32> to vector<16x32xf32>
    %202 = arith.addf %200, %201 : vector<16x32xf32>
    %c1_61 = arith.constant 1 : index
    %c0_62 = arith.constant 0 : index
    %c0_63 = arith.constant 0 : index
    %c0_64 = arith.constant 0 : index
    %203 = vector.load %arg5[%c1_61, %c0_62, %c0_63, %c0_64] : memref<2x4x32x32xbf16, #tpu.memory_space<vmem>>, vector<1x4x32x32xbf16>
    %204 = vector.shape_cast %203 : vector<1x4x32x32xbf16> to vector<4x32x32xbf16>
    %c1_65 = arith.constant 1 : index
    %c0_66 = arith.constant 0 : index
    %c0_67 = arith.constant 0 : index
    %205 = vector.load %arg6[%c1_65, %c0_66, %c0_67] : memref<2x4x32xf32, #tpu.memory_space<vmem>>, vector<1x4x32xf32>
    %206 = vector.shape_cast %205 : vector<1x4x32xf32> to vector<4x32xf32>
    %207 = arith.truncf %202 : vector<16x32xf32> to vector<16x32xbf16>
    %208 = arith.truncf %202 : vector<16x32xf32> to vector<16x32xbf16>
    %209 = vector.extract_strided_slice %204 {offsets = [0, 0, 0], sizes = [1, 32, 32], strides = [1, 1, 1]} : vector<4x32x32xbf16> to vector<1x32x32xbf16>
    %210 = vector.shape_cast %209 : vector<1x32x32xbf16> to vector<32x32xbf16>
    %cst_68 = arith.constant dense<0.000000e+00> : vector<16x32xf32>
    %211 = tpu.matmul %207, %210, %cst_68 {dimension_numbers = #tpu.dot_dimension_numbers<[1], [0], [0], [1], [0, 0, 1, 1], [], []>} : vector<16x32xbf16>, vector<32x32xbf16>, vector<16x32xf32> -> vector<16x32xf32>
    %212 = vector.extract_strided_slice %206 {offsets = [0, 0], sizes = [1, 32], strides = [1, 1]} : vector<4x32xf32> to vector<1x32xf32>
    %213 = vector.broadcast %212 : vector<1x32xf32> to vector<16x32xf32>
    %214 = arith.addf %211, %213 : vector<16x32xf32>
    %215 = vector.extract_strided_slice %204 {offsets = [1, 0, 0], sizes = [1, 32, 32], strides = [1, 1, 1]} : vector<4x32x32xbf16> to vector<1x32x32xbf16>
    %216 = vector.shape_cast %215 : vector<1x32x32xbf16> to vector<32x32xbf16>
    %cst_69 = arith.constant dense<0.000000e+00> : vector<16x32xf32>
    %217 = tpu.matmul %208, %216, %cst_69 {dimension_numbers = #tpu.dot_dimension_numbers<[1], [0], [0], [1], [0, 0, 1, 1], [], []>} : vector<16x32xbf16>, vector<32x32xbf16>, vector<16x32xf32> -> vector<16x32xf32>
    %218 = vector.extract_strided_slice %206 {offsets = [1, 0], sizes = [1, 32], strides = [1, 1]} : vector<4x32xf32> to vector<1x32xf32>
    %219 = vector.broadcast %218 : vector<1x32xf32> to vector<16x32xf32>
    %220 = arith.addf %217, %219 : vector<16x32xf32>
    %221 = vector.extract_strided_slice %204 {offsets = [2, 0, 0], sizes = [1, 32, 32], strides = [1, 1, 1]} : vector<4x32x32xbf16> to vector<1x32x32xbf16>
    %222 = vector.shape_cast %221 : vector<1x32x32xbf16> to vector<32x32xbf16>
    %cst_70 = arith.constant dense<0.000000e+00> : vector<16x32xf32>
    %223 = tpu.matmul %208, %222, %cst_70 {dimension_numbers = #tpu.dot_dimension_numbers<[1], [0], [0], [1], [0, 0, 1, 1], [], []>} : vector<16x32xbf16>, vector<32x32xbf16>, vector<16x32xf32> -> vector<16x32xf32>
    %224 = vector.extract_strided_slice %206 {offsets = [2, 0], sizes = [1, 32], strides = [1, 1]} : vector<4x32xf32> to vector<1x32xf32>
    %225 = vector.broadcast %224 : vector<1x32xf32> to vector<16x32xf32>
    %226 = arith.addf %223, %225 : vector<16x32xf32>
    %227 = vector.shape_cast %214 : vector<16x32xf32> to vector<2x8x32xf32>
    %228 = vector.shape_cast %220 : vector<16x32xf32> to vector<2x8x32xf32>
    %229 = vector.shape_cast %226 : vector<16x32xf32> to vector<2x8x32xf32>
    %230 = vector.extract_strided_slice %227 {offsets = [0, 0, 0], sizes = [2, 8, 16], strides = [1, 1, 1]} : vector<2x8x32xf32> to vector<2x8x16xf32>
    %231 = arith.truncf %230 : vector<2x8x16xf32> to vector<2x8x16xbf16>
    %232 = vector.extract_strided_slice %228 {offsets = [0, 0, 0], sizes = [2, 8, 16], strides = [1, 1, 1]} : vector<2x8x32xf32> to vector<2x8x16xf32>
    %233 = arith.truncf %232 : vector<2x8x16xf32> to vector<2x8x16xbf16>
    %234 = vector.extract_strided_slice %229 {offsets = [0, 0, 0], sizes = [2, 8, 16], strides = [1, 1, 1]} : vector<2x8x32xf32> to vector<2x8x16xf32>
    %235 = arith.truncf %234 : vector<2x8x16xf32> to vector<2x8x16xbf16>
    "tpu.trace_start"() <{level = 10 : i32, message = "bqd,bkd->bqk"}> : () -> ()
    %cst_71 = arith.constant dense<0.000000e+00> : vector<2x8x8xf32>
    %236 = tpu.matmul %231, %233, %cst_71 {dimension_numbers = #tpu.dot_dimension_numbers<[2], [2], [1], [1], [0, 0, 0, 1, 1, 1], [0], [0]>} : vector<2x8x16xbf16>, vector<2x8x16xbf16>, vector<2x8x8xf32> -> vector<2x8x8xf32>
    "tpu.trace_stop"() : () -> ()
    %cst_72 = arith.constant 2.500000e-01 : f32
    %237 = vector.broadcast %cst_72 : f32 to vector<2x8x8xf32>
    %238 = arith.mulf %236, %237 : vector<2x8x8xf32>
    %239 = vector.shape_cast %2 : vector<8x8xi1> to vector<1x8x8xi1>
    %cst_73 = arith.constant -1.000000e+30 : f32
    %240 = vector.shape_cast %239 : vector<1x8x8xi1> to vector<1x8x8xi1>
    %241 = vector.broadcast %240 : vector<1x8x8xi1> to vector<2x8x8xi1>
    %242 = vector.broadcast %cst_73 : f32 to vector<2x8x8xf32>
    %243 = arith.select %241, %238, %242 : vector<2x8x8xi1>, vector<2x8x8xf32>
    %cst_74 = arith.constant dense<0xFF800000> : vector<2x8xf32>
    %244 = vector.multi_reduction <maximumf>, %243, %cst_74 [2] : vector<2x8x8xf32> to vector<2x8xf32>
    %245 = vector.shape_cast %244 : vector<2x8xf32> to vector<2x8x1xf32>
    %246 = vector.broadcast %245 : vector<2x8x1xf32> to vector<2x8x8xf32>
    %247 = arith.subf %243, %246 : vector<2x8x8xf32>
    %248 = math.exp %247 : vector<2x8x8xf32>
    %cst_75 = arith.constant dense<0.000000e+00> : vector<2x8xf32>
    %249 = vector.multi_reduction <add>, %248, %cst_75 [2] : vector<2x8x8xf32> to vector<2x8xf32>
    %250 = vector.shape_cast %249 : vector<2x8xf32> to vector<2x8x1xf32>
    %251 = tpu.reciprocal %250 {approx = true} : vector<2x8x1xf32> -> vector<2x8x1xf32>
    %252 = vector.broadcast %251 : vector<2x8x1xf32> to vector<2x8x8xf32>
    %253 = arith.mulf %248, %252 : vector<2x8x8xf32>
    %254 = arith.truncf %253 : vector<2x8x8xf32> to vector<2x8x8xbf16>
    "tpu.trace_start"() <{level = 10 : i32, message = "bqk,bkd->bqd"}> : () -> ()
    %cst_76 = arith.constant dense<0.000000e+00> : vector<2x8x16xf32>
    %255 = tpu.matmul %254, %235, %cst_76 {dimension_numbers = #tpu.dot_dimension_numbers<[2], [1], [1], [2], [0, 0, 0, 1, 1, 2], [0], [0]>} : vector<2x8x8xbf16>, vector<2x8x16xbf16>, vector<2x8x16xf32> -> vector<2x8x16xf32>
    "tpu.trace_stop"() : () -> ()
    %256 = vector.shape_cast %255 : vector<2x8x16xf32> to vector<16x16xf32>
    %257 = arith.truncf %256 : vector<16x16xf32> to vector<16x16xbf16>
    %258 = vector.extract_strided_slice %204 {offsets = [3, 0, 0], sizes = [1, 32, 32], strides = [1, 1, 1]} : vector<4x32x32xbf16> to vector<1x32x32xbf16>
    %259 = vector.shape_cast %258 : vector<1x32x32xbf16> to vector<32x32xbf16>
    %260 = vector.extract_strided_slice %259 {offsets = [0, 0], sizes = [16, 32], strides = [1, 1]} : vector<32x32xbf16> to vector<16x32xbf16>
    %cst_77 = arith.constant dense<0.000000e+00> : vector<16x32xf32>
    %261 = tpu.matmul %257, %260, %cst_77 {dimension_numbers = #tpu.dot_dimension_numbers<[1], [0], [0], [1], [0, 0, 1, 1], [], []>} : vector<16x16xbf16>, vector<16x32xbf16>, vector<16x32xf32> -> vector<16x32xf32>
    %262 = vector.extract_strided_slice %227 {offsets = [0, 0, 16], sizes = [2, 8, 16], strides = [1, 1, 1]} : vector<2x8x32xf32> to vector<2x8x16xf32>
    %263 = arith.truncf %262 : vector<2x8x16xf32> to vector<2x8x16xbf16>
    %264 = vector.extract_strided_slice %228 {offsets = [0, 0, 16], sizes = [2, 8, 16], strides = [1, 1, 1]} : vector<2x8x32xf32> to vector<2x8x16xf32>
    %265 = arith.truncf %264 : vector<2x8x16xf32> to vector<2x8x16xbf16>
    %266 = vector.extract_strided_slice %229 {offsets = [0, 0, 16], sizes = [2, 8, 16], strides = [1, 1, 1]} : vector<2x8x32xf32> to vector<2x8x16xf32>
    %267 = arith.truncf %266 : vector<2x8x16xf32> to vector<2x8x16xbf16>
    "tpu.trace_start"() <{level = 10 : i32, message = "bqd,bkd->bqk"}> : () -> ()
    %cst_78 = arith.constant dense<0.000000e+00> : vector<2x8x8xf32>
    %268 = tpu.matmul %263, %265, %cst_78 {dimension_numbers = #tpu.dot_dimension_numbers<[2], [2], [1], [1], [0, 0, 0, 1, 1, 1], [0], [0]>} : vector<2x8x16xbf16>, vector<2x8x16xbf16>, vector<2x8x8xf32> -> vector<2x8x8xf32>
    "tpu.trace_stop"() : () -> ()
    %cst_79 = arith.constant 2.500000e-01 : f32
    %269 = vector.broadcast %cst_79 : f32 to vector<2x8x8xf32>
    %270 = arith.mulf %268, %269 : vector<2x8x8xf32>
    %271 = vector.shape_cast %2 : vector<8x8xi1> to vector<1x8x8xi1>
    %cst_80 = arith.constant -1.000000e+30 : f32
    %272 = vector.shape_cast %271 : vector<1x8x8xi1> to vector<1x8x8xi1>
    %273 = vector.broadcast %272 : vector<1x8x8xi1> to vector<2x8x8xi1>
    %274 = vector.broadcast %cst_80 : f32 to vector<2x8x8xf32>
    %275 = arith.select %273, %270, %274 : vector<2x8x8xi1>, vector<2x8x8xf32>
    %cst_81 = arith.constant dense<0xFF800000> : vector<2x8xf32>
    %276 = vector.multi_reduction <maximumf>, %275, %cst_81 [2] : vector<2x8x8xf32> to vector<2x8xf32>
    %277 = vector.shape_cast %276 : vector<2x8xf32> to vector<2x8x1xf32>
    %278 = vector.broadcast %277 : vector<2x8x1xf32> to vector<2x8x8xf32>
    %279 = arith.subf %275, %278 : vector<2x8x8xf32>
    %280 = math.exp %279 : vector<2x8x8xf32>
    %cst_82 = arith.constant dense<0.000000e+00> : vector<2x8xf32>
    %281 = vector.multi_reduction <add>, %280, %cst_82 [2] : vector<2x8x8xf32> to vector<2x8xf32>
    %282 = vector.shape_cast %281 : vector<2x8xf32> to vector<2x8x1xf32>
    %283 = tpu.reciprocal %282 {approx = true} : vector<2x8x1xf32> -> vector<2x8x1xf32>
    %284 = vector.broadcast %283 : vector<2x8x1xf32> to vector<2x8x8xf32>
    %285 = arith.mulf %280, %284 : vector<2x8x8xf32>
    %286 = arith.truncf %285 : vector<2x8x8xf32> to vector<2x8x8xbf16>
    "tpu.trace_start"() <{level = 10 : i32, message = "bqk,bkd->bqd"}> : () -> ()
    %cst_83 = arith.constant dense<0.000000e+00> : vector<2x8x16xf32>
    %287 = tpu.matmul %286, %267, %cst_83 {dimension_numbers = #tpu.dot_dimension_numbers<[2], [1], [1], [2], [0, 0, 0, 1, 1, 2], [0], [0]>} : vector<2x8x8xbf16>, vector<2x8x16xbf16>, vector<2x8x16xf32> -> vector<2x8x16xf32>
    "tpu.trace_stop"() : () -> ()
    %288 = vector.shape_cast %287 : vector<2x8x16xf32> to vector<16x16xf32>
    %289 = arith.truncf %288 : vector<16x16xf32> to vector<16x16xbf16>
    %290 = vector.extract_strided_slice %204 {offsets = [3, 0, 0], sizes = [1, 32, 32], strides = [1, 1, 1]} : vector<4x32x32xbf16> to vector<1x32x32xbf16>
    %291 = vector.shape_cast %290 : vector<1x32x32xbf16> to vector<32x32xbf16>
    %292 = vector.extract_strided_slice %291 {offsets = [16, 0], sizes = [16, 32], strides = [1, 1]} : vector<32x32xbf16> to vector<16x32xbf16>
    %cst_84 = arith.constant dense<0.000000e+00> : vector<16x32xf32>
    %293 = tpu.matmul %289, %292, %cst_84 {dimension_numbers = #tpu.dot_dimension_numbers<[1], [0], [0], [1], [0, 0, 1, 1], [], []>} : vector<16x16xbf16>, vector<16x32xbf16>, vector<16x32xf32> -> vector<16x32xf32>
    %294 = arith.addf %261, %293 : vector<16x32xf32>
    %295 = vector.extract_strided_slice %206 {offsets = [3, 0], sizes = [1, 32], strides = [1, 1]} : vector<4x32xf32> to vector<1x32xf32>
    %296 = vector.broadcast %295 : vector<1x32xf32> to vector<16x32xf32>
    %297 = arith.addf %294, %296 : vector<16x32xf32>
    %298 = arith.addf %202, %297 : vector<16x32xf32>
    %299 = vector.extract_strided_slice %176 {offsets = [1, 0], sizes = [1, 32], strides = [1, 1]} : vector<2x32xf32> to vector<1x32xf32>
    %300 = vector.extract_strided_slice %178 {offsets = [1, 0], sizes = [1, 32], strides = [1, 1]} : vector<2x32xf32> to vector<1x32xf32>
    %cst_85 = arith.constant dense<0.000000e+00> : vector<16xf32>
    %301 = vector.multi_reduction <add>, %298, %cst_85 [1] : vector<16x32xf32> to vector<16xf32>
    %302 = vector.shape_cast %301 : vector<16xf32> to vector<16x1xf32>
    %cst_86 = arith.constant 3.200000e+01 : f32
    %303 = vector.broadcast %cst_86 : f32 to vector<16x1xf32>
    %304 = arith.divf %302, %303 : vector<16x1xf32>
    %305 = vector.broadcast %304 : vector<16x1xf32> to vector<16x32xf32>
    %306 = arith.subf %298, %305 : vector<16x32xf32>
    %307 = arith.mulf %306, %306 : vector<16x32xf32>
    %cst_87 = arith.constant dense<0.000000e+00> : vector<16xf32>
    %308 = vector.multi_reduction <add>, %307, %cst_87 [1] : vector<16x32xf32> to vector<16xf32>
    %309 = vector.shape_cast %308 : vector<16xf32> to vector<16x1xf32>
    %cst_88 = arith.constant 3.200000e+01 : f32
    %310 = vector.broadcast %cst_88 : f32 to vector<16x1xf32>
    %311 = arith.divf %309, %310 : vector<16x1xf32>
    %312 = vector.broadcast %304 : vector<16x1xf32> to vector<16x32xf32>
    %313 = arith.subf %298, %312 : vector<16x32xf32>
    %cst_89 = arith.constant 9.99999974E-6 : f32
    %314 = vector.broadcast %cst_89 : f32 to vector<16x1xf32>
    %315 = arith.addf %311, %314 : vector<16x1xf32>
    %316 = math.rsqrt %315 : vector<16x1xf32>
    %317 = vector.broadcast %316 : vector<16x1xf32> to vector<16x32xf32>
    %318 = arith.mulf %313, %317 : vector<16x32xf32>
    %319 = vector.broadcast %299 : vector<1x32xf32> to vector<16x32xf32>
    %320 = arith.mulf %318, %319 : vector<16x32xf32>
    %321 = vector.broadcast %300 : vector<1x32xf32> to vector<16x32xf32>
    %322 = arith.addf %320, %321 : vector<16x32xf32>
    %c1_90 = arith.constant 1 : index
    %c0_91 = arith.constant 0 : index
    %c0_92 = arith.constant 0 : index
    %c0_93 = arith.constant 0 : index
    %323 = vector.load %arg7[%c1_90, %c0_91, %c0_92, %c0_93] : memref<2x2x32x32xbf16, #tpu.memory_space<vmem>>, vector<1x2x32x32xbf16>
    %324 = vector.shape_cast %323 : vector<1x2x32x32xbf16> to vector<2x32x32xbf16>
    %c1_94 = arith.constant 1 : index
    %c0_95 = arith.constant 0 : index
    %c0_96 = arith.constant 0 : index
    %325 = vector.load %arg8[%c1_94, %c0_95, %c0_96] : memref<2x2x32xf32, #tpu.memory_space<vmem>>, vector<1x2x32xf32>
    %326 = vector.shape_cast %325 : vector<1x2x32xf32> to vector<2x32xf32>
    %327 = arith.truncf %322 : vector<16x32xf32> to vector<16x32xbf16>
    %328 = vector.extract_strided_slice %324 {offsets = [0, 0, 0], sizes = [1, 32, 32], strides = [1, 1, 1]} : vector<2x32x32xbf16> to vector<1x32x32xbf16>
    %329 = vector.shape_cast %328 : vector<1x32x32xbf16> to vector<32x32xbf16>
    %cst_97 = arith.constant dense<0.000000e+00> : vector<16x32xf32>
    %330 = tpu.matmul %327, %329, %cst_97 {dimension_numbers = #tpu.dot_dimension_numbers<[1], [0], [0], [1], [0, 0, 1, 1], [], []>} : vector<16x32xbf16>, vector<32x32xbf16>, vector<16x32xf32> -> vector<16x32xf32>
    %331 = vector.extract_strided_slice %326 {offsets = [0, 0], sizes = [1, 32], strides = [1, 1]} : vector<2x32xf32> to vector<1x32xf32>
    %332 = vector.broadcast %331 : vector<1x32xf32> to vector<16x32xf32>
    %333 = arith.addf %330, %332 : vector<16x32xf32>
    %cst_98 = arith.constant 0.000000e+00 : f32
    %334 = vector.broadcast %cst_98 : f32 to vector<16x32xf32>
    %335 = arith.maximumf %333, %334 : vector<16x32xf32>
    %336 = arith.truncf %335 : vector<16x32xf32> to vector<16x32xbf16>
    %337 = vector.extract_strided_slice %324 {offsets = [1, 0, 0], sizes = [1, 32, 32], strides = [1, 1, 1]} : vector<2x32x32xbf16> to vector<1x32x32xbf16>
    %338 = vector.shape_cast %337 : vector<1x32x32xbf16> to vector<32x32xbf16>
    %cst_99 = arith.constant dense<0.000000e+00> : vector<16x32xf32>
    %339 = tpu.matmul %336, %338, %cst_99 {dimension_numbers = #tpu.dot_dimension_numbers<[1], [0], [0], [1], [0, 0, 1, 1], [], []>} : vector<16x32xbf16>, vector<32x32xbf16>, vector<16x32xf32> -> vector<16x32xf32>
    %340 = vector.extract_strided_slice %326 {offsets = [1, 0], sizes = [1, 32], strides = [1, 1]} : vector<2x32xf32> to vector<1x32xf32>
    %341 = vector.broadcast %340 : vector<1x32xf32> to vector<16x32xf32>
    %342 = arith.addf %339, %341 : vector<16x32xf32>
    %343 = arith.addf %322, %342 : vector<16x32xf32>
    %c0_100 = arith.constant 0 : index
    %c0_101 = arith.constant 0 : index
    %c0_102 = arith.constant 0 : index
    %344 = vector.load %arg2[%c0_100, %c0_101, %c0_102] : memref<2x8x32xbf16, #tpu.memory_space<vmem>>, vector<2x8x32xbf16>
    %345 = arith.extf %344 : vector<2x8x32xbf16> to vector<2x8x32xf32>
    %346 = vector.shape_cast %345 : vector<2x8x32xf32> to vector<16x32xf32>
    %c0_103 = arith.constant 0 : index
    %c0_104 = arith.constant 0 : index
    %c0_105 = arith.constant 0 : index
    %347 = vector.load %arg9[%c0_103, %c0_104, %c0_105] : memref<2x3x32xf32, #tpu.memory_space<vmem>>, vector<1x3x32xf32>
    %348 = vector.shape_cast %347 : vector<1x3x32xf32> to vector<3x32xf32>
    %c0_106 = arith.constant 0 : index
    %c0_107 = arith.constant 0 : index
    %c0_108 = arith.constant 0 : index
    %349 = vector.load %arg10[%c0_106, %c0_107, %c0_108] : memref<2x3x32xf32, #tpu.memory_space<vmem>>, vector<1x3x32xf32>
    %350 = vector.shape_cast %349 : vector<1x3x32xf32> to vector<3x32xf32>
    %351 = vector.extract_strided_slice %348 {offsets = [0, 0], sizes = [1, 32], strides = [1, 1]} : vector<3x32xf32> to vector<1x32xf32>
    %352 = vector.extract_strided_slice %350 {offsets = [0, 0], sizes = [1, 32], strides = [1, 1]} : vector<3x32xf32> to vector<1x32xf32>
    %cst_109 = arith.constant dense<0.000000e+00> : vector<16xf32>
    %353 = vector.multi_reduction <add>, %346, %cst_109 [1] : vector<16x32xf32> to vector<16xf32>
    %354 = vector.shape_cast %353 : vector<16xf32> to vector<16x1xf32>
    %cst_110 = arith.constant 3.200000e+01 : f32
    %355 = vector.broadcast %cst_110 : f32 to vector<16x1xf32>
    %356 = arith.divf %354, %355 : vector<16x1xf32>
    %357 = vector.broadcast %356 : vector<16x1xf32> to vector<16x32xf32>
    %358 = arith.subf %346, %357 : vector<16x32xf32>
    %359 = arith.mulf %358, %358 : vector<16x32xf32>
    %cst_111 = arith.constant dense<0.000000e+00> : vector<16xf32>
    %360 = vector.multi_reduction <add>, %359, %cst_111 [1] : vector<16x32xf32> to vector<16xf32>
    %361 = vector.shape_cast %360 : vector<16xf32> to vector<16x1xf32>
    %cst_112 = arith.constant 3.200000e+01 : f32
    %362 = vector.broadcast %cst_112 : f32 to vector<16x1xf32>
    %363 = arith.divf %361, %362 : vector<16x1xf32>
    %364 = vector.broadcast %356 : vector<16x1xf32> to vector<16x32xf32>
    %365 = arith.subf %346, %364 : vector<16x32xf32>
    %cst_113 = arith.constant 9.99999974E-6 : f32
    %366 = vector.broadcast %cst_113 : f32 to vector<16x1xf32>
    %367 = arith.addf %363, %366 : vector<16x1xf32>
    %368 = math.rsqrt %367 : vector<16x1xf32>
    %369 = vector.broadcast %368 : vector<16x1xf32> to vector<16x32xf32>
    %370 = arith.mulf %365, %369 : vector<16x32xf32>
    %371 = vector.broadcast %351 : vector<1x32xf32> to vector<16x32xf32>
    %372 = arith.mulf %370, %371 : vector<16x32xf32>
    %373 = vector.broadcast %352 : vector<1x32xf32> to vector<16x32xf32>
    %374 = arith.addf %372, %373 : vector<16x32xf32>
    %c0_114 = arith.constant 0 : index
    %c0_115 = arith.constant 0 : index
    %c0_116 = arith.constant 0 : index
    %c0_117 = arith.constant 0 : index
    %375 = vector.load %arg11[%c0_114, %c0_115, %c0_116, %c0_117] : memref<2x4x32x32xbf16, #tpu.memory_space<vmem>>, vector<1x4x32x32xbf16>
    %376 = vector.shape_cast %375 : vector<1x4x32x32xbf16> to vector<4x32x32xbf16>
    %c0_118 = arith.constant 0 : index
    %c0_119 = arith.constant 0 : index
    %c0_120 = arith.constant 0 : index
    %377 = vector.load %arg12[%c0_118, %c0_119, %c0_120] : memref<2x4x32xf32, #tpu.memory_space<vmem>>, vector<1x4x32xf32>
    %378 = vector.shape_cast %377 : vector<1x4x32xf32> to vector<4x32xf32>
    %379 = arith.truncf %374 : vector<16x32xf32> to vector<16x32xbf16>
    %380 = arith.truncf %374 : vector<16x32xf32> to vector<16x32xbf16>
    %381 = vector.extract_strided_slice %376 {offsets = [0, 0, 0], sizes = [1, 32, 32], strides = [1, 1, 1]} : vector<4x32x32xbf16> to vector<1x32x32xbf16>
    %382 = vector.shape_cast %381 : vector<1x32x32xbf16> to vector<32x32xbf16>
    %cst_121 = arith.constant dense<0.000000e+00> : vector<16x32xf32>
    %383 = tpu.matmul %379, %382, %cst_121 {dimension_numbers = #tpu.dot_dimension_numbers<[1], [0], [0], [1], [0, 0, 1, 1], [], []>} : vector<16x32xbf16>, vector<32x32xbf16>, vector<16x32xf32> -> vector<16x32xf32>
    %384 = vector.extract_strided_slice %378 {offsets = [0, 0], sizes = [1, 32], strides = [1, 1]} : vector<4x32xf32> to vector<1x32xf32>
    %385 = vector.broadcast %384 : vector<1x32xf32> to vector<16x32xf32>
    %386 = arith.addf %383, %385 : vector<16x32xf32>
    %387 = vector.extract_strided_slice %376 {offsets = [1, 0, 0], sizes = [1, 32, 32], strides = [1, 1, 1]} : vector<4x32x32xbf16> to vector<1x32x32xbf16>
    %388 = vector.shape_cast %387 : vector<1x32x32xbf16> to vector<32x32xbf16>
    %cst_122 = arith.constant dense<0.000000e+00> : vector<16x32xf32>
    %389 = tpu.matmul %380, %388, %cst_122 {dimension_numbers = #tpu.dot_dimension_numbers<[1], [0], [0], [1], [0, 0, 1, 1], [], []>} : vector<16x32xbf16>, vector<32x32xbf16>, vector<16x32xf32> -> vector<16x32xf32>
    %390 = vector.extract_strided_slice %378 {offsets = [1, 0], sizes = [1, 32], strides = [1, 1]} : vector<4x32xf32> to vector<1x32xf32>
    %391 = vector.broadcast %390 : vector<1x32xf32> to vector<16x32xf32>
    %392 = arith.addf %389, %391 : vector<16x32xf32>
    %393 = vector.extract_strided_slice %376 {offsets = [2, 0, 0], sizes = [1, 32, 32], strides = [1, 1, 1]} : vector<4x32x32xbf16> to vector<1x32x32xbf16>
    %394 = vector.shape_cast %393 : vector<1x32x32xbf16> to vector<32x32xbf16>
    %cst_123 = arith.constant dense<0.000000e+00> : vector<16x32xf32>
    %395 = tpu.matmul %380, %394, %cst_123 {dimension_numbers = #tpu.dot_dimension_numbers<[1], [0], [0], [1], [0, 0, 1, 1], [], []>} : vector<16x32xbf16>, vector<32x32xbf16>, vector<16x32xf32> -> vector<16x32xf32>
    %396 = vector.extract_strided_slice %378 {offsets = [2, 0], sizes = [1, 32], strides = [1, 1]} : vector<4x32xf32> to vector<1x32xf32>
    %397 = vector.broadcast %396 : vector<1x32xf32> to vector<16x32xf32>
    %398 = arith.addf %395, %397 : vector<16x32xf32>
    %399 = vector.shape_cast %386 : vector<16x32xf32> to vector<2x8x32xf32>
    %400 = vector.shape_cast %392 : vector<16x32xf32> to vector<2x8x32xf32>
    %401 = vector.shape_cast %398 : vector<16x32xf32> to vector<2x8x32xf32>
    %402 = vector.extract_strided_slice %399 {offsets = [0, 0, 0], sizes = [2, 8, 16], strides = [1, 1, 1]} : vector<2x8x32xf32> to vector<2x8x16xf32>
    %403 = arith.truncf %402 : vector<2x8x16xf32> to vector<2x8x16xbf16>
    %404 = vector.extract_strided_slice %400 {offsets = [0, 0, 0], sizes = [2, 8, 16], strides = [1, 1, 1]} : vector<2x8x32xf32> to vector<2x8x16xf32>
    %405 = arith.truncf %404 : vector<2x8x16xf32> to vector<2x8x16xbf16>
    %406 = vector.extract_strided_slice %401 {offsets = [0, 0, 0], sizes = [2, 8, 16], strides = [1, 1, 1]} : vector<2x8x32xf32> to vector<2x8x16xf32>
    %407 = arith.truncf %406 : vector<2x8x16xf32> to vector<2x8x16xbf16>
    "tpu.trace_start"() <{level = 10 : i32, message = "bqd,bkd->bqk"}> : () -> ()
    %cst_124 = arith.constant dense<0.000000e+00> : vector<2x8x8xf32>
    %408 = tpu.matmul %403, %405, %cst_124 {dimension_numbers = #tpu.dot_dimension_numbers<[2], [2], [1], [1], [0, 0, 0, 1, 1, 1], [0], [0]>} : vector<2x8x16xbf16>, vector<2x8x16xbf16>, vector<2x8x8xf32> -> vector<2x8x8xf32>
    "tpu.trace_stop"() : () -> ()
    %cst_125 = arith.constant 2.500000e-01 : f32
    %409 = vector.broadcast %cst_125 : f32 to vector<2x8x8xf32>
    %410 = arith.mulf %408, %409 : vector<2x8x8xf32>
    %411 = vector.shape_cast %2 : vector<8x8xi1> to vector<1x8x8xi1>
    %cst_126 = arith.constant -1.000000e+30 : f32
    %412 = vector.shape_cast %411 : vector<1x8x8xi1> to vector<1x8x8xi1>
    %413 = vector.broadcast %412 : vector<1x8x8xi1> to vector<2x8x8xi1>
    %414 = vector.broadcast %cst_126 : f32 to vector<2x8x8xf32>
    %415 = arith.select %413, %410, %414 : vector<2x8x8xi1>, vector<2x8x8xf32>
    %cst_127 = arith.constant dense<0xFF800000> : vector<2x8xf32>
    %416 = vector.multi_reduction <maximumf>, %415, %cst_127 [2] : vector<2x8x8xf32> to vector<2x8xf32>
    %417 = vector.shape_cast %416 : vector<2x8xf32> to vector<2x8x1xf32>
    %418 = vector.broadcast %417 : vector<2x8x1xf32> to vector<2x8x8xf32>
    %419 = arith.subf %415, %418 : vector<2x8x8xf32>
    %420 = math.exp %419 : vector<2x8x8xf32>
    %cst_128 = arith.constant dense<0.000000e+00> : vector<2x8xf32>
    %421 = vector.multi_reduction <add>, %420, %cst_128 [2] : vector<2x8x8xf32> to vector<2x8xf32>
    %422 = vector.shape_cast %421 : vector<2x8xf32> to vector<2x8x1xf32>
    %423 = tpu.reciprocal %422 {approx = true} : vector<2x8x1xf32> -> vector<2x8x1xf32>
    %424 = vector.broadcast %423 : vector<2x8x1xf32> to vector<2x8x8xf32>
    %425 = arith.mulf %420, %424 : vector<2x8x8xf32>
    %426 = arith.truncf %425 : vector<2x8x8xf32> to vector<2x8x8xbf16>
    "tpu.trace_start"() <{level = 10 : i32, message = "bqk,bkd->bqd"}> : () -> ()
    %cst_129 = arith.constant dense<0.000000e+00> : vector<2x8x16xf32>
    %427 = tpu.matmul %426, %407, %cst_129 {dimension_numbers = #tpu.dot_dimension_numbers<[2], [1], [1], [2], [0, 0, 0, 1, 1, 2], [0], [0]>} : vector<2x8x8xbf16>, vector<2x8x16xbf16>, vector<2x8x16xf32> -> vector<2x8x16xf32>
    "tpu.trace_stop"() : () -> ()
    %428 = vector.shape_cast %427 : vector<2x8x16xf32> to vector<16x16xf32>
    %429 = arith.truncf %428 : vector<16x16xf32> to vector<16x16xbf16>
    %430 = vector.extract_strided_slice %376 {offsets = [3, 0, 0], sizes = [1, 32, 32], strides = [1, 1, 1]} : vector<4x32x32xbf16> to vector<1x32x32xbf16>
    %431 = vector.shape_cast %430 : vector<1x32x32xbf16> to vector<32x32xbf16>
    %432 = vector.extract_strided_slice %431 {offsets = [0, 0], sizes = [16, 32], strides = [1, 1]} : vector<32x32xbf16> to vector<16x32xbf16>
    %cst_130 = arith.constant dense<0.000000e+00> : vector<16x32xf32>
    %433 = tpu.matmul %429, %432, %cst_130 {dimension_numbers = #tpu.dot_dimension_numbers<[1], [0], [0], [1], [0, 0, 1, 1], [], []>} : vector<16x16xbf16>, vector<16x32xbf16>, vector<16x32xf32> -> vector<16x32xf32>
    %434 = vector.extract_strided_slice %399 {offsets = [0, 0, 16], sizes = [2, 8, 16], strides = [1, 1, 1]} : vector<2x8x32xf32> to vector<2x8x16xf32>
    %435 = arith.truncf %434 : vector<2x8x16xf32> to vector<2x8x16xbf16>
    %436 = vector.extract_strided_slice %400 {offsets = [0, 0, 16], sizes = [2, 8, 16], strides = [1, 1, 1]} : vector<2x8x32xf32> to vector<2x8x16xf32>
    %437 = arith.truncf %436 : vector<2x8x16xf32> to vector<2x8x16xbf16>
    %438 = vector.extract_strided_slice %401 {offsets = [0, 0, 16], sizes = [2, 8, 16], strides = [1, 1, 1]} : vector<2x8x32xf32> to vector<2x8x16xf32>
    %439 = arith.truncf %438 : vector<2x8x16xf32> to vector<2x8x16xbf16>
    "tpu.trace_start"() <{level = 10 : i32, message = "bqd,bkd->bqk"}> : () -> ()
    %cst_131 = arith.constant dense<0.000000e+00> : vector<2x8x8xf32>
    %440 = tpu.matmul %435, %437, %cst_131 {dimension_numbers = #tpu.dot_dimension_numbers<[2], [2], [1], [1], [0, 0, 0, 1, 1, 1], [0], [0]>} : vector<2x8x16xbf16>, vector<2x8x16xbf16>, vector<2x8x8xf32> -> vector<2x8x8xf32>
    "tpu.trace_stop"() : () -> ()
    %cst_132 = arith.constant 2.500000e-01 : f32
    %441 = vector.broadcast %cst_132 : f32 to vector<2x8x8xf32>
    %442 = arith.mulf %440, %441 : vector<2x8x8xf32>
    %443 = vector.shape_cast %2 : vector<8x8xi1> to vector<1x8x8xi1>
    %cst_133 = arith.constant -1.000000e+30 : f32
    %444 = vector.shape_cast %443 : vector<1x8x8xi1> to vector<1x8x8xi1>
    %445 = vector.broadcast %444 : vector<1x8x8xi1> to vector<2x8x8xi1>
    %446 = vector.broadcast %cst_133 : f32 to vector<2x8x8xf32>
    %447 = arith.select %445, %442, %446 : vector<2x8x8xi1>, vector<2x8x8xf32>
    %cst_134 = arith.constant dense<0xFF800000> : vector<2x8xf32>
    %448 = vector.multi_reduction <maximumf>, %447, %cst_134 [2] : vector<2x8x8xf32> to vector<2x8xf32>
    %449 = vector.shape_cast %448 : vector<2x8xf32> to vector<2x8x1xf32>
    %450 = vector.broadcast %449 : vector<2x8x1xf32> to vector<2x8x8xf32>
    %451 = arith.subf %447, %450 : vector<2x8x8xf32>
    %452 = math.exp %451 : vector<2x8x8xf32>
    %cst_135 = arith.constant dense<0.000000e+00> : vector<2x8xf32>
    %453 = vector.multi_reduction <add>, %452, %cst_135 [2] : vector<2x8x8xf32> to vector<2x8xf32>
    %454 = vector.shape_cast %453 : vector<2x8xf32> to vector<2x8x1xf32>
    %455 = tpu.reciprocal %454 {approx = true} : vector<2x8x1xf32> -> vector<2x8x1xf32>
    %456 = vector.broadcast %455 : vector<2x8x1xf32> to vector<2x8x8xf32>
    %457 = arith.mulf %452, %456 : vector<2x8x8xf32>
    %458 = arith.truncf %457 : vector<2x8x8xf32> to vector<2x8x8xbf16>
    "tpu.trace_start"() <{level = 10 : i32, message = "bqk,bkd->bqd"}> : () -> ()
    %cst_136 = arith.constant dense<0.000000e+00> : vector<2x8x16xf32>
    %459 = tpu.matmul %458, %439, %cst_136 {dimension_numbers = #tpu.dot_dimension_numbers<[2], [1], [1], [2], [0, 0, 0, 1, 1, 2], [0], [0]>} : vector<2x8x8xbf16>, vector<2x8x16xbf16>, vector<2x8x16xf32> -> vector<2x8x16xf32>
    "tpu.trace_stop"() : () -> ()
    %460 = vector.shape_cast %459 : vector<2x8x16xf32> to vector<16x16xf32>
    %461 = arith.truncf %460 : vector<16x16xf32> to vector<16x16xbf16>
    %462 = vector.extract_strided_slice %376 {offsets = [3, 0, 0], sizes = [1, 32, 32], strides = [1, 1, 1]} : vector<4x32x32xbf16> to vector<1x32x32xbf16>
    %463 = vector.shape_cast %462 : vector<1x32x32xbf16> to vector<32x32xbf16>
    %464 = vector.extract_strided_slice %463 {offsets = [16, 0], sizes = [16, 32], strides = [1, 1]} : vector<32x32xbf16> to vector<16x32xbf16>
    %cst_137 = arith.constant dense<0.000000e+00> : vector<16x32xf32>
    %465 = tpu.matmul %461, %464, %cst_137 {dimension_numbers = #tpu.dot_dimension_numbers<[1], [0], [0], [1], [0, 0, 1, 1], [], []>} : vector<16x16xbf16>, vector<16x32xbf16>, vector<16x32xf32> -> vector<16x32xf32>
    %466 = arith.addf %433, %465 : vector<16x32xf32>
    %467 = vector.extract_strided_slice %378 {offsets = [3, 0], sizes = [1, 32], strides = [1, 1]} : vector<4x32xf32> to vector<1x32xf32>
    %468 = vector.broadcast %467 : vector<1x32xf32> to vector<16x32xf32>
    %469 = arith.addf %466, %468 : vector<16x32xf32>
    %470 = arith.addf %374, %469 : vector<16x32xf32>
    %471 = vector.extract_strided_slice %348 {offsets = [1, 0], sizes = [1, 32], strides = [1, 1]} : vector<3x32xf32> to vector<1x32xf32>
    %472 = vector.extract_strided_slice %350 {offsets = [1, 0], sizes = [1, 32], strides = [1, 1]} : vector<3x32xf32> to vector<1x32xf32>
    %cst_138 = arith.constant dense<0.000000e+00> : vector<16xf32>
    %473 = vector.multi_reduction <add>, %343, %cst_138 [1] : vector<16x32xf32> to vector<16xf32>
    %474 = vector.shape_cast %473 : vector<16xf32> to vector<16x1xf32>
    %cst_139 = arith.constant 3.200000e+01 : f32
    %475 = vector.broadcast %cst_139 : f32 to vector<16x1xf32>
    %476 = arith.divf %474, %475 : vector<16x1xf32>
    %477 = vector.broadcast %476 : vector<16x1xf32> to vector<16x32xf32>
    %478 = arith.subf %343, %477 : vector<16x32xf32>
    %479 = arith.mulf %478, %478 : vector<16x32xf32>
    %cst_140 = arith.constant dense<0.000000e+00> : vector<16xf32>
    %480 = vector.multi_reduction <add>, %479, %cst_140 [1] : vector<16x32xf32> to vector<16xf32>
    %481 = vector.shape_cast %480 : vector<16xf32> to vector<16x1xf32>
    %cst_141 = arith.constant 3.200000e+01 : f32
    %482 = vector.broadcast %cst_141 : f32 to vector<16x1xf32>
    %483 = arith.divf %481, %482 : vector<16x1xf32>
    %484 = vector.broadcast %476 : vector<16x1xf32> to vector<16x32xf32>
    %485 = arith.subf %343, %484 : vector<16x32xf32>
    %cst_142 = arith.constant 9.99999974E-6 : f32
    %486 = vector.broadcast %cst_142 : f32 to vector<16x1xf32>
    %487 = arith.addf %483, %486 : vector<16x1xf32>
    %488 = math.rsqrt %487 : vector<16x1xf32>
    %489 = vector.broadcast %488 : vector<16x1xf32> to vector<16x32xf32>
    %490 = arith.mulf %485, %489 : vector<16x32xf32>
    %491 = vector.broadcast %471 : vector<1x32xf32> to vector<16x32xf32>
    %492 = arith.mulf %490, %491 : vector<16x32xf32>
    %493 = vector.broadcast %472 : vector<1x32xf32> to vector<16x32xf32>
    %494 = arith.addf %492, %493 : vector<16x32xf32>
    %c0_143 = arith.constant 0 : index
    %c0_144 = arith.constant 0 : index
    %c0_145 = arith.constant 0 : index
    %c0_146 = arith.constant 0 : index
    %495 = vector.load %arg13[%c0_143, %c0_144, %c0_145, %c0_146] : memref<2x4x32x32xbf16, #tpu.memory_space<vmem>>, vector<1x4x32x32xbf16>
    %496 = vector.shape_cast %495 : vector<1x4x32x32xbf16> to vector<4x32x32xbf16>
    %c0_147 = arith.constant 0 : index
    %c0_148 = arith.constant 0 : index
    %c0_149 = arith.constant 0 : index
    %497 = vector.load %arg14[%c0_147, %c0_148, %c0_149] : memref<2x4x32xf32, #tpu.memory_space<vmem>>, vector<1x4x32xf32>
    %498 = vector.shape_cast %497 : vector<1x4x32xf32> to vector<4x32xf32>
    %499 = arith.truncf %470 : vector<16x32xf32> to vector<16x32xbf16>
    %500 = arith.truncf %494 : vector<16x32xf32> to vector<16x32xbf16>
    %501 = vector.extract_strided_slice %496 {offsets = [0, 0, 0], sizes = [1, 32, 32], strides = [1, 1, 1]} : vector<4x32x32xbf16> to vector<1x32x32xbf16>
    %502 = vector.shape_cast %501 : vector<1x32x32xbf16> to vector<32x32xbf16>
    %cst_150 = arith.constant dense<0.000000e+00> : vector<16x32xf32>
    %503 = tpu.matmul %499, %502, %cst_150 {dimension_numbers = #tpu.dot_dimension_numbers<[1], [0], [0], [1], [0, 0, 1, 1], [], []>} : vector<16x32xbf16>, vector<32x32xbf16>, vector<16x32xf32> -> vector<16x32xf32>
    %504 = vector.extract_strided_slice %498 {offsets = [0, 0], sizes = [1, 32], strides = [1, 1]} : vector<4x32xf32> to vector<1x32xf32>
    %505 = vector.broadcast %504 : vector<1x32xf32> to vector<16x32xf32>
    %506 = arith.addf %503, %505 : vector<16x32xf32>
    %507 = vector.extract_strided_slice %496 {offsets = [1, 0, 0], sizes = [1, 32, 32], strides = [1, 1, 1]} : vector<4x32x32xbf16> to vector<1x32x32xbf16>
    %508 = vector.shape_cast %507 : vector<1x32x32xbf16> to vector<32x32xbf16>
    %cst_151 = arith.constant dense<0.000000e+00> : vector<16x32xf32>
    %509 = tpu.matmul %500, %508, %cst_151 {dimension_numbers = #tpu.dot_dimension_numbers<[1], [0], [0], [1], [0, 0, 1, 1], [], []>} : vector<16x32xbf16>, vector<32x32xbf16>, vector<16x32xf32> -> vector<16x32xf32>
    %510 = vector.extract_strided_slice %498 {offsets = [1, 0], sizes = [1, 32], strides = [1, 1]} : vector<4x32xf32> to vector<1x32xf32>
    %511 = vector.broadcast %510 : vector<1x32xf32> to vector<16x32xf32>
    %512 = arith.addf %509, %511 : vector<16x32xf32>
    %513 = vector.extract_strided_slice %496 {offsets = [2, 0, 0], sizes = [1, 32, 32], strides = [1, 1, 1]} : vector<4x32x32xbf16> to vector<1x32x32xbf16>
    %514 = vector.shape_cast %513 : vector<1x32x32xbf16> to vector<32x32xbf16>
    %cst_152 = arith.constant dense<0.000000e+00> : vector<16x32xf32>
    %515 = tpu.matmul %500, %514, %cst_152 {dimension_numbers = #tpu.dot_dimension_numbers<[1], [0], [0], [1], [0, 0, 1, 1], [], []>} : vector<16x32xbf16>, vector<32x32xbf16>, vector<16x32xf32> -> vector<16x32xf32>
    %516 = vector.extract_strided_slice %498 {offsets = [2, 0], sizes = [1, 32], strides = [1, 1]} : vector<4x32xf32> to vector<1x32xf32>
    %517 = vector.broadcast %516 : vector<1x32xf32> to vector<16x32xf32>
    %518 = arith.addf %515, %517 : vector<16x32xf32>
    %519 = vector.shape_cast %506 : vector<16x32xf32> to vector<2x8x32xf32>
    %520 = vector.shape_cast %512 : vector<16x32xf32> to vector<2x8x32xf32>
    %521 = vector.shape_cast %518 : vector<16x32xf32> to vector<2x8x32xf32>
    %522 = vector.extract_strided_slice %519 {offsets = [0, 0, 0], sizes = [2, 8, 16], strides = [1, 1, 1]} : vector<2x8x32xf32> to vector<2x8x16xf32>
    %523 = arith.truncf %522 : vector<2x8x16xf32> to vector<2x8x16xbf16>
    %524 = vector.extract_strided_slice %520 {offsets = [0, 0, 0], sizes = [2, 8, 16], strides = [1, 1, 1]} : vector<2x8x32xf32> to vector<2x8x16xf32>
    %525 = arith.truncf %524 : vector<2x8x16xf32> to vector<2x8x16xbf16>
    %526 = vector.extract_strided_slice %521 {offsets = [0, 0, 0], sizes = [2, 8, 16], strides = [1, 1, 1]} : vector<2x8x32xf32> to vector<2x8x16xf32>
    %527 = arith.truncf %526 : vector<2x8x16xf32> to vector<2x8x16xbf16>
    "tpu.trace_start"() <{level = 10 : i32, message = "bqd,bkd->bqk"}> : () -> ()
    %cst_153 = arith.constant dense<0.000000e+00> : vector<2x8x8xf32>
    %528 = tpu.matmul %523, %525, %cst_153 {dimension_numbers = #tpu.dot_dimension_numbers<[2], [2], [1], [1], [0, 0, 0, 1, 1, 1], [0], [0]>} : vector<2x8x16xbf16>, vector<2x8x16xbf16>, vector<2x8x8xf32> -> vector<2x8x8xf32>
    "tpu.trace_stop"() : () -> ()
    %cst_154 = arith.constant 2.500000e-01 : f32
    %529 = vector.broadcast %cst_154 : f32 to vector<2x8x8xf32>
    %530 = arith.mulf %528, %529 : vector<2x8x8xf32>
    %531 = vector.shape_cast %2 : vector<8x8xi1> to vector<1x8x8xi1>
    %cst_155 = arith.constant -1.000000e+30 : f32
    %532 = vector.shape_cast %531 : vector<1x8x8xi1> to vector<1x8x8xi1>
    %533 = vector.broadcast %532 : vector<1x8x8xi1> to vector<2x8x8xi1>
    %534 = vector.broadcast %cst_155 : f32 to vector<2x8x8xf32>
    %535 = arith.select %533, %530, %534 : vector<2x8x8xi1>, vector<2x8x8xf32>
    %cst_156 = arith.constant dense<0xFF800000> : vector<2x8xf32>
    %536 = vector.multi_reduction <maximumf>, %535, %cst_156 [2] : vector<2x8x8xf32> to vector<2x8xf32>
    %537 = vector.shape_cast %536 : vector<2x8xf32> to vector<2x8x1xf32>
    %538 = vector.broadcast %537 : vector<2x8x1xf32> to vector<2x8x8xf32>
    %539 = arith.subf %535, %538 : vector<2x8x8xf32>
    %540 = math.exp %539 : vector<2x8x8xf32>
    %cst_157 = arith.constant dense<0.000000e+00> : vector<2x8xf32>
    %541 = vector.multi_reduction <add>, %540, %cst_157 [2] : vector<2x8x8xf32> to vector<2x8xf32>
    %542 = vector.shape_cast %541 : vector<2x8xf32> to vector<2x8x1xf32>
    %543 = tpu.reciprocal %542 {approx = true} : vector<2x8x1xf32> -> vector<2x8x1xf32>
    %544 = vector.broadcast %543 : vector<2x8x1xf32> to vector<2x8x8xf32>
    %545 = arith.mulf %540, %544 : vector<2x8x8xf32>
    %546 = arith.truncf %545 : vector<2x8x8xf32> to vector<2x8x8xbf16>
    "tpu.trace_start"() <{level = 10 : i32, message = "bqk,bkd->bqd"}> : () -> ()
    %cst_158 = arith.constant dense<0.000000e+00> : vector<2x8x16xf32>
    %547 = tpu.matmul %546, %527, %cst_158 {dimension_numbers = #tpu.dot_dimension_numbers<[2], [1], [1], [2], [0, 0, 0, 1, 1, 2], [0], [0]>} : vector<2x8x8xbf16>, vector<2x8x16xbf16>, vector<2x8x16xf32> -> vector<2x8x16xf32>
    "tpu.trace_stop"() : () -> ()
    %548 = vector.shape_cast %547 : vector<2x8x16xf32> to vector<16x16xf32>
    %549 = arith.truncf %548 : vector<16x16xf32> to vector<16x16xbf16>
    %550 = vector.extract_strided_slice %496 {offsets = [3, 0, 0], sizes = [1, 32, 32], strides = [1, 1, 1]} : vector<4x32x32xbf16> to vector<1x32x32xbf16>
    %551 = vector.shape_cast %550 : vector<1x32x32xbf16> to vector<32x32xbf16>
    %552 = vector.extract_strided_slice %551 {offsets = [0, 0], sizes = [16, 32], strides = [1, 1]} : vector<32x32xbf16> to vector<16x32xbf16>
    %cst_159 = arith.constant dense<0.000000e+00> : vector<16x32xf32>
    %553 = tpu.matmul %549, %552, %cst_159 {dimension_numbers = #tpu.dot_dimension_numbers<[1], [0], [0], [1], [0, 0, 1, 1], [], []>} : vector<16x16xbf16>, vector<16x32xbf16>, vector<16x32xf32> -> vector<16x32xf32>
    %554 = vector.extract_strided_slice %519 {offsets = [0, 0, 16], sizes = [2, 8, 16], strides = [1, 1, 1]} : vector<2x8x32xf32> to vector<2x8x16xf32>
    %555 = arith.truncf %554 : vector<2x8x16xf32> to vector<2x8x16xbf16>
    %556 = vector.extract_strided_slice %520 {offsets = [0, 0, 16], sizes = [2, 8, 16], strides = [1, 1, 1]} : vector<2x8x32xf32> to vector<2x8x16xf32>
    %557 = arith.truncf %556 : vector<2x8x16xf32> to vector<2x8x16xbf16>
    %558 = vector.extract_strided_slice %521 {offsets = [0, 0, 16], sizes = [2, 8, 16], strides = [1, 1, 1]} : vector<2x8x32xf32> to vector<2x8x16xf32>
    %559 = arith.truncf %558 : vector<2x8x16xf32> to vector<2x8x16xbf16>
    "tpu.trace_start"() <{level = 10 : i32, message = "bqd,bkd->bqk"}> : () -> ()
    %cst_160 = arith.constant dense<0.000000e+00> : vector<2x8x8xf32>
    %560 = tpu.matmul %555, %557, %cst_160 {dimension_numbers = #tpu.dot_dimension_numbers<[2], [2], [1], [1], [0, 0, 0, 1, 1, 1], [0], [0]>} : vector<2x8x16xbf16>, vector<2x8x16xbf16>, vector<2x8x8xf32> -> vector<2x8x8xf32>
    "tpu.trace_stop"() : () -> ()
    %cst_161 = arith.constant 2.500000e-01 : f32
    %561 = vector.broadcast %cst_161 : f32 to vector<2x8x8xf32>
    %562 = arith.mulf %560, %561 : vector<2x8x8xf32>
    %563 = vector.shape_cast %2 : vector<8x8xi1> to vector<1x8x8xi1>
    %cst_162 = arith.constant -1.000000e+30 : f32
    %564 = vector.shape_cast %563 : vector<1x8x8xi1> to vector<1x8x8xi1>
    %565 = vector.broadcast %564 : vector<1x8x8xi1> to vector<2x8x8xi1>
    %566 = vector.broadcast %cst_162 : f32 to vector<2x8x8xf32>
    %567 = arith.select %565, %562, %566 : vector<2x8x8xi1>, vector<2x8x8xf32>
    %cst_163 = arith.constant dense<0xFF800000> : vector<2x8xf32>
    %568 = vector.multi_reduction <maximumf>, %567, %cst_163 [2] : vector<2x8x8xf32> to vector<2x8xf32>
    %569 = vector.shape_cast %568 : vector<2x8xf32> to vector<2x8x1xf32>
    %570 = vector.broadcast %569 : vector<2x8x1xf32> to vector<2x8x8xf32>
    %571 = arith.subf %567, %570 : vector<2x8x8xf32>
    %572 = math.exp %571 : vector<2x8x8xf32>
    %cst_164 = arith.constant dense<0.000000e+00> : vector<2x8xf32>
    %573 = vector.multi_reduction <add>, %572, %cst_164 [2] : vector<2x8x8xf32> to vector<2x8xf32>
    %574 = vector.shape_cast %573 : vector<2x8xf32> to vector<2x8x1xf32>
    %575 = tpu.reciprocal %574 {approx = true} : vector<2x8x1xf32> -> vector<2x8x1xf32>
    %576 = vector.broadcast %575 : vector<2x8x1xf32> to vector<2x8x8xf32>
    %577 = arith.mulf %572, %576 : vector<2x8x8xf32>
    %578 = arith.truncf %577 : vector<2x8x8xf32> to vector<2x8x8xbf16>
    "tpu.trace_start"() <{level = 10 : i32, message = "bqk,bkd->bqd"}> : () -> ()
    %cst_165 = arith.constant dense<0.000000e+00> : vector<2x8x16xf32>
    %579 = tpu.matmul %578, %559, %cst_165 {dimension_numbers = #tpu.dot_dimension_numbers<[2], [1], [1], [2], [0, 0, 0, 1, 1, 2], [0], [0]>} : vector<2x8x8xbf16>, vector<2x8x16xbf16>, vector<2x8x16xf32> -> vector<2x8x16xf32>
    "tpu.trace_stop"() : () -> ()
    %580 = vector.shape_cast %579 : vector<2x8x16xf32> to vector<16x16xf32>
    %581 = arith.truncf %580 : vector<16x16xf32> to vector<16x16xbf16>
    %582 = vector.extract_strided_slice %496 {offsets = [3, 0, 0], sizes = [1, 32, 32], strides = [1, 1, 1]} : vector<4x32x32xbf16> to vector<1x32x32xbf16>
    %583 = vector.shape_cast %582 : vector<1x32x32xbf16> to vector<32x32xbf16>
    %584 = vector.extract_strided_slice %583 {offsets = [16, 0], sizes = [16, 32], strides = [1, 1]} : vector<32x32xbf16> to vector<16x32xbf16>
    %cst_166 = arith.constant dense<0.000000e+00> : vector<16x32xf32>
    %585 = tpu.matmul %581, %584, %cst_166 {dimension_numbers = #tpu.dot_dimension_numbers<[1], [0], [0], [1], [0, 0, 1, 1], [], []>} : vector<16x16xbf16>, vector<16x32xbf16>, vector<16x32xf32> -> vector<16x32xf32>
    %586 = arith.addf %553, %585 : vector<16x32xf32>
    %587 = vector.extract_strided_slice %498 {offsets = [3, 0], sizes = [1, 32], strides = [1, 1]} : vector<4x32xf32> to vector<1x32xf32>
    %588 = vector.broadcast %587 : vector<1x32xf32> to vector<16x32xf32>
    %589 = arith.addf %586, %588 : vector<16x32xf32>
    %590 = arith.addf %470, %589 : vector<16x32xf32>
    %591 = vector.extract_strided_slice %348 {offsets = [2, 0], sizes = [1, 32], strides = [1, 1]} : vector<3x32xf32> to vector<1x32xf32>
    %592 = vector.extract_strided_slice %350 {offsets = [2, 0], sizes = [1, 32], strides = [1, 1]} : vector<3x32xf32> to vector<1x32xf32>
    %cst_167 = arith.constant dense<0.000000e+00> : vector<16xf32>
    %593 = vector.multi_reduction <add>, %590, %cst_167 [1] : vector<16x32xf32> to vector<16xf32>
    %594 = vector.shape_cast %593 : vector<16xf32> to vector<16x1xf32>
    %cst_168 = arith.constant 3.200000e+01 : f32
    %595 = vector.broadcast %cst_168 : f32 to vector<16x1xf32>
    %596 = arith.divf %594, %595 : vector<16x1xf32>
    %597 = vector.broadcast %596 : vector<16x1xf32> to vector<16x32xf32>
    %598 = arith.subf %590, %597 : vector<16x32xf32>
    %599 = arith.mulf %598, %598 : vector<16x32xf32>
    %cst_169 = arith.constant dense<0.000000e+00> : vector<16xf32>
    %600 = vector.multi_reduction <add>, %599, %cst_169 [1] : vector<16x32xf32> to vector<16xf32>
    %601 = vector.shape_cast %600 : vector<16xf32> to vector<16x1xf32>
    %cst_170 = arith.constant 3.200000e+01 : f32
    %602 = vector.broadcast %cst_170 : f32 to vector<16x1xf32>
    %603 = arith.divf %601, %602 : vector<16x1xf32>
    %604 = vector.broadcast %596 : vector<16x1xf32> to vector<16x32xf32>
    %605 = arith.subf %590, %604 : vector<16x32xf32>
    %cst_171 = arith.constant 9.99999974E-6 : f32
    %606 = vector.broadcast %cst_171 : f32 to vector<16x1xf32>
    %607 = arith.addf %603, %606 : vector<16x1xf32>
    %608 = math.rsqrt %607 : vector<16x1xf32>
    %609 = vector.broadcast %608 : vector<16x1xf32> to vector<16x32xf32>
    %610 = arith.mulf %605, %609 : vector<16x32xf32>
    %611 = vector.broadcast %591 : vector<1x32xf32> to vector<16x32xf32>
    %612 = arith.mulf %610, %611 : vector<16x32xf32>
    %613 = vector.broadcast %592 : vector<1x32xf32> to vector<16x32xf32>
    %614 = arith.addf %612, %613 : vector<16x32xf32>
    %c0_172 = arith.constant 0 : index
    %c0_173 = arith.constant 0 : index
    %c0_174 = arith.constant 0 : index
    %c0_175 = arith.constant 0 : index
    %615 = vector.load %arg15[%c0_172, %c0_173, %c0_174, %c0_175] : memref<2x2x32x32xbf16, #tpu.memory_space<vmem>>, vector<1x2x32x32xbf16>
    %616 = vector.shape_cast %615 : vector<1x2x32x32xbf16> to vector<2x32x32xbf16>
    %c0_176 = arith.constant 0 : index
    %c0_177 = arith.constant 0 : index
    %c0_178 = arith.constant 0 : index
    %617 = vector.load %arg16[%c0_176, %c0_177, %c0_178] : memref<2x2x32xf32, #tpu.memory_space<vmem>>, vector<1x2x32xf32>
    %618 = vector.shape_cast %617 : vector<1x2x32xf32> to vector<2x32xf32>
    %619 = arith.truncf %614 : vector<16x32xf32> to vector<16x32xbf16>
    %620 = vector.extract_strided_slice %616 {offsets = [0, 0, 0], sizes = [1, 32, 32], strides = [1, 1, 1]} : vector<2x32x32xbf16> to vector<1x32x32xbf16>
    %621 = vector.shape_cast %620 : vector<1x32x32xbf16> to vector<32x32xbf16>
    %cst_179 = arith.constant dense<0.000000e+00> : vector<16x32xf32>
    %622 = tpu.matmul %619, %621, %cst_179 {dimension_numbers = #tpu.dot_dimension_numbers<[1], [0], [0], [1], [0, 0, 1, 1], [], []>} : vector<16x32xbf16>, vector<32x32xbf16>, vector<16x32xf32> -> vector<16x32xf32>
    %623 = vector.extract_strided_slice %618 {offsets = [0, 0], sizes = [1, 32], strides = [1, 1]} : vector<2x32xf32> to vector<1x32xf32>
    %624 = vector.broadcast %623 : vector<1x32xf32> to vector<16x32xf32>
    %625 = arith.addf %622, %624 : vector<16x32xf32>
    %cst_180 = arith.constant 0.000000e+00 : f32
    %626 = vector.broadcast %cst_180 : f32 to vector<16x32xf32>
    %627 = arith.maximumf %625, %626 : vector<16x32xf32>
    %628 = arith.truncf %627 : vector<16x32xf32> to vector<16x32xbf16>
    %629 = vector.extract_strided_slice %616 {offsets = [1, 0, 0], sizes = [1, 32, 32], strides = [1, 1, 1]} : vector<2x32x32xbf16> to vector<1x32x32xbf16>
    %630 = vector.shape_cast %629 : vector<1x32x32xbf16> to vector<32x32xbf16>
    %cst_181 = arith.constant dense<0.000000e+00> : vector<16x32xf32>
    %631 = tpu.matmul %628, %630, %cst_181 {dimension_numbers = #tpu.dot_dimension_numbers<[1], [0], [0], [1], [0, 0, 1, 1], [], []>} : vector<16x32xbf16>, vector<32x32xbf16>, vector<16x32xf32> -> vector<16x32xf32>
    %632 = vector.extract_strided_slice %618 {offsets = [1, 0], sizes = [1, 32], strides = [1, 1]} : vector<2x32xf32> to vector<1x32xf32>
    %633 = vector.broadcast %632 : vector<1x32xf32> to vector<16x32xf32>
    %634 = arith.addf %631, %633 : vector<16x32xf32>
    %635 = arith.addf %614, %634 : vector<16x32xf32>
    %c1_182 = arith.constant 1 : index
    %c0_183 = arith.constant 0 : index
    %c0_184 = arith.constant 0 : index
    %636 = vector.load %arg9[%c1_182, %c0_183, %c0_184] : memref<2x3x32xf32, #tpu.memory_space<vmem>>, vector<1x3x32xf32>
    %637 = vector.shape_cast %636 : vector<1x3x32xf32> to vector<3x32xf32>
    %c1_185 = arith.constant 1 : index
    %c0_186 = arith.constant 0 : index
    %c0_187 = arith.constant 0 : index
    %638 = vector.load %arg10[%c1_185, %c0_186, %c0_187] : memref<2x3x32xf32, #tpu.memory_space<vmem>>, vector<1x3x32xf32>
    %639 = vector.shape_cast %638 : vector<1x3x32xf32> to vector<3x32xf32>
    %640 = vector.extract_strided_slice %637 {offsets = [0, 0], sizes = [1, 32], strides = [1, 1]} : vector<3x32xf32> to vector<1x32xf32>
    %641 = vector.extract_strided_slice %639 {offsets = [0, 0], sizes = [1, 32], strides = [1, 1]} : vector<3x32xf32> to vector<1x32xf32>
    %cst_188 = arith.constant dense<0.000000e+00> : vector<16xf32>
    %642 = vector.multi_reduction <add>, %635, %cst_188 [1] : vector<16x32xf32> to vector<16xf32>
    %643 = vector.shape_cast %642 : vector<16xf32> to vector<16x1xf32>
    %cst_189 = arith.constant 3.200000e+01 : f32
    %644 = vector.broadcast %cst_189 : f32 to vector<16x1xf32>
    %645 = arith.divf %643, %644 : vector<16x1xf32>
    %646 = vector.broadcast %645 : vector<16x1xf32> to vector<16x32xf32>
    %647 = arith.subf %635, %646 : vector<16x32xf32>
    %648 = arith.mulf %647, %647 : vector<16x32xf32>
    %cst_190 = arith.constant dense<0.000000e+00> : vector<16xf32>
    %649 = vector.multi_reduction <add>, %648, %cst_190 [1] : vector<16x32xf32> to vector<16xf32>
    %650 = vector.shape_cast %649 : vector<16xf32> to vector<16x1xf32>
    %cst_191 = arith.constant 3.200000e+01 : f32
    %651 = vector.broadcast %cst_191 : f32 to vector<16x1xf32>
    %652 = arith.divf %650, %651 : vector<16x1xf32>
    %653 = vector.broadcast %645 : vector<16x1xf32> to vector<16x32xf32>
    %654 = arith.subf %635, %653 : vector<16x32xf32>
    %cst_192 = arith.constant 9.99999974E-6 : f32
    %655 = vector.broadcast %cst_192 : f32 to vector<16x1xf32>
    %656 = arith.addf %652, %655 : vector<16x1xf32>
    %657 = math.rsqrt %656 : vector<16x1xf32>
    %658 = vector.broadcast %657 : vector<16x1xf32> to vector<16x32xf32>
    %659 = arith.mulf %654, %658 : vector<16x32xf32>
    %660 = vector.broadcast %640 : vector<1x32xf32> to vector<16x32xf32>
    %661 = arith.mulf %659, %660 : vector<16x32xf32>
    %662 = vector.broadcast %641 : vector<1x32xf32> to vector<16x32xf32>
    %663 = arith.addf %661, %662 : vector<16x32xf32>
    %c1_193 = arith.constant 1 : index
    %c0_194 = arith.constant 0 : index
    %c0_195 = arith.constant 0 : index
    %c0_196 = arith.constant 0 : index
    %664 = vector.load %arg11[%c1_193, %c0_194, %c0_195, %c0_196] : memref<2x4x32x32xbf16, #tpu.memory_space<vmem>>, vector<1x4x32x32xbf16>
    %665 = vector.shape_cast %664 : vector<1x4x32x32xbf16> to vector<4x32x32xbf16>
    %c1_197 = arith.constant 1 : index
    %c0_198 = arith.constant 0 : index
    %c0_199 = arith.constant 0 : index
    %666 = vector.load %arg12[%c1_197, %c0_198, %c0_199] : memref<2x4x32xf32, #tpu.memory_space<vmem>>, vector<1x4x32xf32>
    %667 = vector.shape_cast %666 : vector<1x4x32xf32> to vector<4x32xf32>
    %668 = arith.truncf %663 : vector<16x32xf32> to vector<16x32xbf16>
    %669 = arith.truncf %663 : vector<16x32xf32> to vector<16x32xbf16>
    %670 = vector.extract_strided_slice %665 {offsets = [0, 0, 0], sizes = [1, 32, 32], strides = [1, 1, 1]} : vector<4x32x32xbf16> to vector<1x32x32xbf16>
    %671 = vector.shape_cast %670 : vector<1x32x32xbf16> to vector<32x32xbf16>
    %cst_200 = arith.constant dense<0.000000e+00> : vector<16x32xf32>
    %672 = tpu.matmul %668, %671, %cst_200 {dimension_numbers = #tpu.dot_dimension_numbers<[1], [0], [0], [1], [0, 0, 1, 1], [], []>} : vector<16x32xbf16>, vector<32x32xbf16>, vector<16x32xf32> -> vector<16x32xf32>
    %673 = vector.extract_strided_slice %667 {offsets = [0, 0], sizes = [1, 32], strides = [1, 1]} : vector<4x32xf32> to vector<1x32xf32>
    %674 = vector.broadcast %673 : vector<1x32xf32> to vector<16x32xf32>
    %675 = arith.addf %672, %674 : vector<16x32xf32>
    %676 = vector.extract_strided_slice %665 {offsets = [1, 0, 0], sizes = [1, 32, 32], strides = [1, 1, 1]} : vector<4x32x32xbf16> to vector<1x32x32xbf16>
    %677 = vector.shape_cast %676 : vector<1x32x32xbf16> to vector<32x32xbf16>
    %cst_201 = arith.constant dense<0.000000e+00> : vector<16x32xf32>
    %678 = tpu.matmul %669, %677, %cst_201 {dimension_numbers = #tpu.dot_dimension_numbers<[1], [0], [0], [1], [0, 0, 1, 1], [], []>} : vector<16x32xbf16>, vector<32x32xbf16>, vector<16x32xf32> -> vector<16x32xf32>
    %679 = vector.extract_strided_slice %667 {offsets = [1, 0], sizes = [1, 32], strides = [1, 1]} : vector<4x32xf32> to vector<1x32xf32>
    %680 = vector.broadcast %679 : vector<1x32xf32> to vector<16x32xf32>
    %681 = arith.addf %678, %680 : vector<16x32xf32>
    %682 = vector.extract_strided_slice %665 {offsets = [2, 0, 0], sizes = [1, 32, 32], strides = [1, 1, 1]} : vector<4x32x32xbf16> to vector<1x32x32xbf16>
    %683 = vector.shape_cast %682 : vector<1x32x32xbf16> to vector<32x32xbf16>
    %cst_202 = arith.constant dense<0.000000e+00> : vector<16x32xf32>
    %684 = tpu.matmul %669, %683, %cst_202 {dimension_numbers = #tpu.dot_dimension_numbers<[1], [0], [0], [1], [0, 0, 1, 1], [], []>} : vector<16x32xbf16>, vector<32x32xbf16>, vector<16x32xf32> -> vector<16x32xf32>
    %685 = vector.extract_strided_slice %667 {offsets = [2, 0], sizes = [1, 32], strides = [1, 1]} : vector<4x32xf32> to vector<1x32xf32>
    %686 = vector.broadcast %685 : vector<1x32xf32> to vector<16x32xf32>
    %687 = arith.addf %684, %686 : vector<16x32xf32>
    %688 = vector.shape_cast %675 : vector<16x32xf32> to vector<2x8x32xf32>
    %689 = vector.shape_cast %681 : vector<16x32xf32> to vector<2x8x32xf32>
    %690 = vector.shape_cast %687 : vector<16x32xf32> to vector<2x8x32xf32>
    %691 = vector.extract_strided_slice %688 {offsets = [0, 0, 0], sizes = [2, 8, 16], strides = [1, 1, 1]} : vector<2x8x32xf32> to vector<2x8x16xf32>
    %692 = arith.truncf %691 : vector<2x8x16xf32> to vector<2x8x16xbf16>
    %693 = vector.extract_strided_slice %689 {offsets = [0, 0, 0], sizes = [2, 8, 16], strides = [1, 1, 1]} : vector<2x8x32xf32> to vector<2x8x16xf32>
    %694 = arith.truncf %693 : vector<2x8x16xf32> to vector<2x8x16xbf16>
    %695 = vector.extract_strided_slice %690 {offsets = [0, 0, 0], sizes = [2, 8, 16], strides = [1, 1, 1]} : vector<2x8x32xf32> to vector<2x8x16xf32>
    %696 = arith.truncf %695 : vector<2x8x16xf32> to vector<2x8x16xbf16>
    "tpu.trace_start"() <{level = 10 : i32, message = "bqd,bkd->bqk"}> : () -> ()
    %cst_203 = arith.constant dense<0.000000e+00> : vector<2x8x8xf32>
    %697 = tpu.matmul %692, %694, %cst_203 {dimension_numbers = #tpu.dot_dimension_numbers<[2], [2], [1], [1], [0, 0, 0, 1, 1, 1], [0], [0]>} : vector<2x8x16xbf16>, vector<2x8x16xbf16>, vector<2x8x8xf32> -> vector<2x8x8xf32>
    "tpu.trace_stop"() : () -> ()
    %cst_204 = arith.constant 2.500000e-01 : f32
    %698 = vector.broadcast %cst_204 : f32 to vector<2x8x8xf32>
    %699 = arith.mulf %697, %698 : vector<2x8x8xf32>
    %700 = vector.shape_cast %2 : vector<8x8xi1> to vector<1x8x8xi1>
    %cst_205 = arith.constant -1.000000e+30 : f32
    %701 = vector.shape_cast %700 : vector<1x8x8xi1> to vector<1x8x8xi1>
    %702 = vector.broadcast %701 : vector<1x8x8xi1> to vector<2x8x8xi1>
    %703 = vector.broadcast %cst_205 : f32 to vector<2x8x8xf32>
    %704 = arith.select %702, %699, %703 : vector<2x8x8xi1>, vector<2x8x8xf32>
    %cst_206 = arith.constant dense<0xFF800000> : vector<2x8xf32>
    %705 = vector.multi_reduction <maximumf>, %704, %cst_206 [2] : vector<2x8x8xf32> to vector<2x8xf32>
    %706 = vector.shape_cast %705 : vector<2x8xf32> to vector<2x8x1xf32>
    %707 = vector.broadcast %706 : vector<2x8x1xf32> to vector<2x8x8xf32>
    %708 = arith.subf %704, %707 : vector<2x8x8xf32>
    %709 = math.exp %708 : vector<2x8x8xf32>
    %cst_207 = arith.constant dense<0.000000e+00> : vector<2x8xf32>
    %710 = vector.multi_reduction <add>, %709, %cst_207 [2] : vector<2x8x8xf32> to vector<2x8xf32>
    %711 = vector.shape_cast %710 : vector<2x8xf32> to vector<2x8x1xf32>
    %712 = tpu.reciprocal %711 {approx = true} : vector<2x8x1xf32> -> vector<2x8x1xf32>
    %713 = vector.broadcast %712 : vector<2x8x1xf32> to vector<2x8x8xf32>
    %714 = arith.mulf %709, %713 : vector<2x8x8xf32>
    %715 = arith.truncf %714 : vector<2x8x8xf32> to vector<2x8x8xbf16>
    "tpu.trace_start"() <{level = 10 : i32, message = "bqk,bkd->bqd"}> : () -> ()
    %cst_208 = arith.constant dense<0.000000e+00> : vector<2x8x16xf32>
    %716 = tpu.matmul %715, %696, %cst_208 {dimension_numbers = #tpu.dot_dimension_numbers<[2], [1], [1], [2], [0, 0, 0, 1, 1, 2], [0], [0]>} : vector<2x8x8xbf16>, vector<2x8x16xbf16>, vector<2x8x16xf32> -> vector<2x8x16xf32>
    "tpu.trace_stop"() : () -> ()
    %717 = vector.shape_cast %716 : vector<2x8x16xf32> to vector<16x16xf32>
    %718 = arith.truncf %717 : vector<16x16xf32> to vector<16x16xbf16>
    %719 = vector.extract_strided_slice %665 {offsets = [3, 0, 0], sizes = [1, 32, 32], strides = [1, 1, 1]} : vector<4x32x32xbf16> to vector<1x32x32xbf16>
    %720 = vector.shape_cast %719 : vector<1x32x32xbf16> to vector<32x32xbf16>
    %721 = vector.extract_strided_slice %720 {offsets = [0, 0], sizes = [16, 32], strides = [1, 1]} : vector<32x32xbf16> to vector<16x32xbf16>
    %cst_209 = arith.constant dense<0.000000e+00> : vector<16x32xf32>
    %722 = tpu.matmul %718, %721, %cst_209 {dimension_numbers = #tpu.dot_dimension_numbers<[1], [0], [0], [1], [0, 0, 1, 1], [], []>} : vector<16x16xbf16>, vector<16x32xbf16>, vector<16x32xf32> -> vector<16x32xf32>
    %723 = vector.extract_strided_slice %688 {offsets = [0, 0, 16], sizes = [2, 8, 16], strides = [1, 1, 1]} : vector<2x8x32xf32> to vector<2x8x16xf32>
    %724 = arith.truncf %723 : vector<2x8x16xf32> to vector<2x8x16xbf16>
    %725 = vector.extract_strided_slice %689 {offsets = [0, 0, 16], sizes = [2, 8, 16], strides = [1, 1, 1]} : vector<2x8x32xf32> to vector<2x8x16xf32>
    %726 = arith.truncf %725 : vector<2x8x16xf32> to vector<2x8x16xbf16>
    %727 = vector.extract_strided_slice %690 {offsets = [0, 0, 16], sizes = [2, 8, 16], strides = [1, 1, 1]} : vector<2x8x32xf32> to vector<2x8x16xf32>
    %728 = arith.truncf %727 : vector<2x8x16xf32> to vector<2x8x16xbf16>
    "tpu.trace_start"() <{level = 10 : i32, message = "bqd,bkd->bqk"}> : () -> ()
    %cst_210 = arith.constant dense<0.000000e+00> : vector<2x8x8xf32>
    %729 = tpu.matmul %724, %726, %cst_210 {dimension_numbers = #tpu.dot_dimension_numbers<[2], [2], [1], [1], [0, 0, 0, 1, 1, 1], [0], [0]>} : vector<2x8x16xbf16>, vector<2x8x16xbf16>, vector<2x8x8xf32> -> vector<2x8x8xf32>
    "tpu.trace_stop"() : () -> ()
    %cst_211 = arith.constant 2.500000e-01 : f32
    %730 = vector.broadcast %cst_211 : f32 to vector<2x8x8xf32>
    %731 = arith.mulf %729, %730 : vector<2x8x8xf32>
    %732 = vector.shape_cast %2 : vector<8x8xi1> to vector<1x8x8xi1>
    %cst_212 = arith.constant -1.000000e+30 : f32
    %733 = vector.shape_cast %732 : vector<1x8x8xi1> to vector<1x8x8xi1>
    %734 = vector.broadcast %733 : vector<1x8x8xi1> to vector<2x8x8xi1>
    %735 = vector.broadcast %cst_212 : f32 to vector<2x8x8xf32>
    %736 = arith.select %734, %731, %735 : vector<2x8x8xi1>, vector<2x8x8xf32>
    %cst_213 = arith.constant dense<0xFF800000> : vector<2x8xf32>
    %737 = vector.multi_reduction <maximumf>, %736, %cst_213 [2] : vector<2x8x8xf32> to vector<2x8xf32>
    %738 = vector.shape_cast %737 : vector<2x8xf32> to vector<2x8x1xf32>
    %739 = vector.broadcast %738 : vector<2x8x1xf32> to vector<2x8x8xf32>
    %740 = arith.subf %736, %739 : vector<2x8x8xf32>
    %741 = math.exp %740 : vector<2x8x8xf32>
    %cst_214 = arith.constant dense<0.000000e+00> : vector<2x8xf32>
    %742 = vector.multi_reduction <add>, %741, %cst_214 [2] : vector<2x8x8xf32> to vector<2x8xf32>
    %743 = vector.shape_cast %742 : vector<2x8xf32> to vector<2x8x1xf32>
    %744 = tpu.reciprocal %743 {approx = true} : vector<2x8x1xf32> -> vector<2x8x1xf32>
    %745 = vector.broadcast %744 : vector<2x8x1xf32> to vector<2x8x8xf32>
    %746 = arith.mulf %741, %745 : vector<2x8x8xf32>
    %747 = arith.truncf %746 : vector<2x8x8xf32> to vector<2x8x8xbf16>
    "tpu.trace_start"() <{level = 10 : i32, message = "bqk,bkd->bqd"}> : () -> ()
    %cst_215 = arith.constant dense<0.000000e+00> : vector<2x8x16xf32>
    %748 = tpu.matmul %747, %728, %cst_215 {dimension_numbers = #tpu.dot_dimension_numbers<[2], [1], [1], [2], [0, 0, 0, 1, 1, 2], [0], [0]>} : vector<2x8x8xbf16>, vector<2x8x16xbf16>, vector<2x8x16xf32> -> vector<2x8x16xf32>
    "tpu.trace_stop"() : () -> ()
    %749 = vector.shape_cast %748 : vector<2x8x16xf32> to vector<16x16xf32>
    %750 = arith.truncf %749 : vector<16x16xf32> to vector<16x16xbf16>
    %751 = vector.extract_strided_slice %665 {offsets = [3, 0, 0], sizes = [1, 32, 32], strides = [1, 1, 1]} : vector<4x32x32xbf16> to vector<1x32x32xbf16>
    %752 = vector.shape_cast %751 : vector<1x32x32xbf16> to vector<32x32xbf16>
    %753 = vector.extract_strided_slice %752 {offsets = [16, 0], sizes = [16, 32], strides = [1, 1]} : vector<32x32xbf16> to vector<16x32xbf16>
    %cst_216 = arith.constant dense<0.000000e+00> : vector<16x32xf32>
    %754 = tpu.matmul %750, %753, %cst_216 {dimension_numbers = #tpu.dot_dimension_numbers<[1], [0], [0], [1], [0, 0, 1, 1], [], []>} : vector<16x16xbf16>, vector<16x32xbf16>, vector<16x32xf32> -> vector<16x32xf32>
    %755 = arith.addf %722, %754 : vector<16x32xf32>
    %756 = vector.extract_strided_slice %667 {offsets = [3, 0], sizes = [1, 32], strides = [1, 1]} : vector<4x32xf32> to vector<1x32xf32>
    %757 = vector.broadcast %756 : vector<1x32xf32> to vector<16x32xf32>
    %758 = arith.addf %755, %757 : vector<16x32xf32>
    %759 = arith.addf %663, %758 : vector<16x32xf32>
    %760 = vector.extract_strided_slice %637 {offsets = [1, 0], sizes = [1, 32], strides = [1, 1]} : vector<3x32xf32> to vector<1x32xf32>
    %761 = vector.extract_strided_slice %639 {offsets = [1, 0], sizes = [1, 32], strides = [1, 1]} : vector<3x32xf32> to vector<1x32xf32>
    %cst_217 = arith.constant dense<0.000000e+00> : vector<16xf32>
    %762 = vector.multi_reduction <add>, %343, %cst_217 [1] : vector<16x32xf32> to vector<16xf32>
    %763 = vector.shape_cast %762 : vector<16xf32> to vector<16x1xf32>
    %cst_218 = arith.constant 3.200000e+01 : f32
    %764 = vector.broadcast %cst_218 : f32 to vector<16x1xf32>
    %765 = arith.divf %763, %764 : vector<16x1xf32>
    %766 = vector.broadcast %765 : vector<16x1xf32> to vector<16x32xf32>
    %767 = arith.subf %343, %766 : vector<16x32xf32>
    %768 = arith.mulf %767, %767 : vector<16x32xf32>
    %cst_219 = arith.constant dense<0.000000e+00> : vector<16xf32>
    %769 = vector.multi_reduction <add>, %768, %cst_219 [1] : vector<16x32xf32> to vector<16xf32>
    %770 = vector.shape_cast %769 : vector<16xf32> to vector<16x1xf32>
    %cst_220 = arith.constant 3.200000e+01 : f32
    %771 = vector.broadcast %cst_220 : f32 to vector<16x1xf32>
    %772 = arith.divf %770, %771 : vector<16x1xf32>
    %773 = vector.broadcast %765 : vector<16x1xf32> to vector<16x32xf32>
    %774 = arith.subf %343, %773 : vector<16x32xf32>
    %cst_221 = arith.constant 9.99999974E-6 : f32
    %775 = vector.broadcast %cst_221 : f32 to vector<16x1xf32>
    %776 = arith.addf %772, %775 : vector<16x1xf32>
    %777 = math.rsqrt %776 : vector<16x1xf32>
    %778 = vector.broadcast %777 : vector<16x1xf32> to vector<16x32xf32>
    %779 = arith.mulf %774, %778 : vector<16x32xf32>
    %780 = vector.broadcast %760 : vector<1x32xf32> to vector<16x32xf32>
    %781 = arith.mulf %779, %780 : vector<16x32xf32>
    %782 = vector.broadcast %761 : vector<1x32xf32> to vector<16x32xf32>
    %783 = arith.addf %781, %782 : vector<16x32xf32>
    %c1_222 = arith.constant 1 : index
    %c0_223 = arith.constant 0 : index
    %c0_224 = arith.constant 0 : index
    %c0_225 = arith.constant 0 : index
    %784 = vector.load %arg13[%c1_222, %c0_223, %c0_224, %c0_225] : memref<2x4x32x32xbf16, #tpu.memory_space<vmem>>, vector<1x4x32x32xbf16>
    %785 = vector.shape_cast %784 : vector<1x4x32x32xbf16> to vector<4x32x32xbf16>
    %c1_226 = arith.constant 1 : index
    %c0_227 = arith.constant 0 : index
    %c0_228 = arith.constant 0 : index
    %786 = vector.load %arg14[%c1_226, %c0_227, %c0_228] : memref<2x4x32xf32, #tpu.memory_space<vmem>>, vector<1x4x32xf32>
    %787 = vector.shape_cast %786 : vector<1x4x32xf32> to vector<4x32xf32>
    %788 = arith.truncf %759 : vector<16x32xf32> to vector<16x32xbf16>
    %789 = arith.truncf %783 : vector<16x32xf32> to vector<16x32xbf16>
    %790 = vector.extract_strided_slice %785 {offsets = [0, 0, 0], sizes = [1, 32, 32], strides = [1, 1, 1]} : vector<4x32x32xbf16> to vector<1x32x32xbf16>
    %791 = vector.shape_cast %790 : vector<1x32x32xbf16> to vector<32x32xbf16>
    %cst_229 = arith.constant dense<0.000000e+00> : vector<16x32xf32>
    %792 = tpu.matmul %788, %791, %cst_229 {dimension_numbers = #tpu.dot_dimension_numbers<[1], [0], [0], [1], [0, 0, 1, 1], [], []>} : vector<16x32xbf16>, vector<32x32xbf16>, vector<16x32xf32> -> vector<16x32xf32>
    %793 = vector.extract_strided_slice %787 {offsets = [0, 0], sizes = [1, 32], strides = [1, 1]} : vector<4x32xf32> to vector<1x32xf32>
    %794 = vector.broadcast %793 : vector<1x32xf32> to vector<16x32xf32>
    %795 = arith.addf %792, %794 : vector<16x32xf32>
    %796 = vector.extract_strided_slice %785 {offsets = [1, 0, 0], sizes = [1, 32, 32], strides = [1, 1, 1]} : vector<4x32x32xbf16> to vector<1x32x32xbf16>
    %797 = vector.shape_cast %796 : vector<1x32x32xbf16> to vector<32x32xbf16>
    %cst_230 = arith.constant dense<0.000000e+00> : vector<16x32xf32>
    %798 = tpu.matmul %789, %797, %cst_230 {dimension_numbers = #tpu.dot_dimension_numbers<[1], [0], [0], [1], [0, 0, 1, 1], [], []>} : vector<16x32xbf16>, vector<32x32xbf16>, vector<16x32xf32> -> vector<16x32xf32>
    %799 = vector.extract_strided_slice %787 {offsets = [1, 0], sizes = [1, 32], strides = [1, 1]} : vector<4x32xf32> to vector<1x32xf32>
    %800 = vector.broadcast %799 : vector<1x32xf32> to vector<16x32xf32>
    %801 = arith.addf %798, %800 : vector<16x32xf32>
    %802 = vector.extract_strided_slice %785 {offsets = [2, 0, 0], sizes = [1, 32, 32], strides = [1, 1, 1]} : vector<4x32x32xbf16> to vector<1x32x32xbf16>
    %803 = vector.shape_cast %802 : vector<1x32x32xbf16> to vector<32x32xbf16>
    %cst_231 = arith.constant dense<0.000000e+00> : vector<16x32xf32>
    %804 = tpu.matmul %789, %803, %cst_231 {dimension_numbers = #tpu.dot_dimension_numbers<[1], [0], [0], [1], [0, 0, 1, 1], [], []>} : vector<16x32xbf16>, vector<32x32xbf16>, vector<16x32xf32> -> vector<16x32xf32>
    %805 = vector.extract_strided_slice %787 {offsets = [2, 0], sizes = [1, 32], strides = [1, 1]} : vector<4x32xf32> to vector<1x32xf32>
    %806 = vector.broadcast %805 : vector<1x32xf32> to vector<16x32xf32>
    %807 = arith.addf %804, %806 : vector<16x32xf32>
    %808 = vector.shape_cast %795 : vector<16x32xf32> to vector<2x8x32xf32>
    %809 = vector.shape_cast %801 : vector<16x32xf32> to vector<2x8x32xf32>
    %810 = vector.shape_cast %807 : vector<16x32xf32> to vector<2x8x32xf32>
    %811 = vector.extract_strided_slice %808 {offsets = [0, 0, 0], sizes = [2, 8, 16], strides = [1, 1, 1]} : vector<2x8x32xf32> to vector<2x8x16xf32>
    %812 = arith.truncf %811 : vector<2x8x16xf32> to vector<2x8x16xbf16>
    %813 = vector.extract_strided_slice %809 {offsets = [0, 0, 0], sizes = [2, 8, 16], strides = [1, 1, 1]} : vector<2x8x32xf32> to vector<2x8x16xf32>
    %814 = arith.truncf %813 : vector<2x8x16xf32> to vector<2x8x16xbf16>
    %815 = vector.extract_strided_slice %810 {offsets = [0, 0, 0], sizes = [2, 8, 16], strides = [1, 1, 1]} : vector<2x8x32xf32> to vector<2x8x16xf32>
    %816 = arith.truncf %815 : vector<2x8x16xf32> to vector<2x8x16xbf16>
    "tpu.trace_start"() <{level = 10 : i32, message = "bqd,bkd->bqk"}> : () -> ()
    %cst_232 = arith.constant dense<0.000000e+00> : vector<2x8x8xf32>
    %817 = tpu.matmul %812, %814, %cst_232 {dimension_numbers = #tpu.dot_dimension_numbers<[2], [2], [1], [1], [0, 0, 0, 1, 1, 1], [0], [0]>} : vector<2x8x16xbf16>, vector<2x8x16xbf16>, vector<2x8x8xf32> -> vector<2x8x8xf32>
    "tpu.trace_stop"() : () -> ()
    %cst_233 = arith.constant 2.500000e-01 : f32
    %818 = vector.broadcast %cst_233 : f32 to vector<2x8x8xf32>
    %819 = arith.mulf %817, %818 : vector<2x8x8xf32>
    %820 = vector.shape_cast %2 : vector<8x8xi1> to vector<1x8x8xi1>
    %cst_234 = arith.constant -1.000000e+30 : f32
    %821 = vector.shape_cast %820 : vector<1x8x8xi1> to vector<1x8x8xi1>
    %822 = vector.broadcast %821 : vector<1x8x8xi1> to vector<2x8x8xi1>
    %823 = vector.broadcast %cst_234 : f32 to vector<2x8x8xf32>
    %824 = arith.select %822, %819, %823 : vector<2x8x8xi1>, vector<2x8x8xf32>
    %cst_235 = arith.constant dense<0xFF800000> : vector<2x8xf32>
    %825 = vector.multi_reduction <maximumf>, %824, %cst_235 [2] : vector<2x8x8xf32> to vector<2x8xf32>
    %826 = vector.shape_cast %825 : vector<2x8xf32> to vector<2x8x1xf32>
    %827 = vector.broadcast %826 : vector<2x8x1xf32> to vector<2x8x8xf32>
    %828 = arith.subf %824, %827 : vector<2x8x8xf32>
    %829 = math.exp %828 : vector<2x8x8xf32>
    %cst_236 = arith.constant dense<0.000000e+00> : vector<2x8xf32>
    %830 = vector.multi_reduction <add>, %829, %cst_236 [2] : vector<2x8x8xf32> to vector<2x8xf32>
    %831 = vector.shape_cast %830 : vector<2x8xf32> to vector<2x8x1xf32>
    %832 = tpu.reciprocal %831 {approx = true} : vector<2x8x1xf32> -> vector<2x8x1xf32>
    %833 = vector.broadcast %832 : vector<2x8x1xf32> to vector<2x8x8xf32>
    %834 = arith.mulf %829, %833 : vector<2x8x8xf32>
    %835 = arith.truncf %834 : vector<2x8x8xf32> to vector<2x8x8xbf16>
    "tpu.trace_start"() <{level = 10 : i32, message = "bqk,bkd->bqd"}> : () -> ()
    %cst_237 = arith.constant dense<0.000000e+00> : vector<2x8x16xf32>
    %836 = tpu.matmul %835, %816, %cst_237 {dimension_numbers = #tpu.dot_dimension_numbers<[2], [1], [1], [2], [0, 0, 0, 1, 1, 2], [0], [0]>} : vector<2x8x8xbf16>, vector<2x8x16xbf16>, vector<2x8x16xf32> -> vector<2x8x16xf32>
    "tpu.trace_stop"() : () -> ()
    %837 = vector.shape_cast %836 : vector<2x8x16xf32> to vector<16x16xf32>
    %838 = arith.truncf %837 : vector<16x16xf32> to vector<16x16xbf16>
    %839 = vector.extract_strided_slice %785 {offsets = [3, 0, 0], sizes = [1, 32, 32], strides = [1, 1, 1]} : vector<4x32x32xbf16> to vector<1x32x32xbf16>
    %840 = vector.shape_cast %839 : vector<1x32x32xbf16> to vector<32x32xbf16>
    %841 = vector.extract_strided_slice %840 {offsets = [0, 0], sizes = [16, 32], strides = [1, 1]} : vector<32x32xbf16> to vector<16x32xbf16>
    %cst_238 = arith.constant dense<0.000000e+00> : vector<16x32xf32>
    %842 = tpu.matmul %838, %841, %cst_238 {dimension_numbers = #tpu.dot_dimension_numbers<[1], [0], [0], [1], [0, 0, 1, 1], [], []>} : vector<16x16xbf16>, vector<16x32xbf16>, vector<16x32xf32> -> vector<16x32xf32>
    %843 = vector.extract_strided_slice %808 {offsets = [0, 0, 16], sizes = [2, 8, 16], strides = [1, 1, 1]} : vector<2x8x32xf32> to vector<2x8x16xf32>
    %844 = arith.truncf %843 : vector<2x8x16xf32> to vector<2x8x16xbf16>
    %845 = vector.extract_strided_slice %809 {offsets = [0, 0, 16], sizes = [2, 8, 16], strides = [1, 1, 1]} : vector<2x8x32xf32> to vector<2x8x16xf32>
    %846 = arith.truncf %845 : vector<2x8x16xf32> to vector<2x8x16xbf16>
    %847 = vector.extract_strided_slice %810 {offsets = [0, 0, 16], sizes = [2, 8, 16], strides = [1, 1, 1]} : vector<2x8x32xf32> to vector<2x8x16xf32>
    %848 = arith.truncf %847 : vector<2x8x16xf32> to vector<2x8x16xbf16>
    "tpu.trace_start"() <{level = 10 : i32, message = "bqd,bkd->bqk"}> : () -> ()
    %cst_239 = arith.constant dense<0.000000e+00> : vector<2x8x8xf32>
    %849 = tpu.matmul %844, %846, %cst_239 {dimension_numbers = #tpu.dot_dimension_numbers<[2], [2], [1], [1], [0, 0, 0, 1, 1, 1], [0], [0]>} : vector<2x8x16xbf16>, vector<2x8x16xbf16>, vector<2x8x8xf32> -> vector<2x8x8xf32>
    "tpu.trace_stop"() : () -> ()
    %cst_240 = arith.constant 2.500000e-01 : f32
    %850 = vector.broadcast %cst_240 : f32 to vector<2x8x8xf32>
    %851 = arith.mulf %849, %850 : vector<2x8x8xf32>
    %852 = vector.shape_cast %2 : vector<8x8xi1> to vector<1x8x8xi1>
    %cst_241 = arith.constant -1.000000e+30 : f32
    %853 = vector.shape_cast %852 : vector<1x8x8xi1> to vector<1x8x8xi1>
    %854 = vector.broadcast %853 : vector<1x8x8xi1> to vector<2x8x8xi1>
    %855 = vector.broadcast %cst_241 : f32 to vector<2x8x8xf32>
    %856 = arith.select %854, %851, %855 : vector<2x8x8xi1>, vector<2x8x8xf32>
    %cst_242 = arith.constant dense<0xFF800000> : vector<2x8xf32>
    %857 = vector.multi_reduction <maximumf>, %856, %cst_242 [2] : vector<2x8x8xf32> to vector<2x8xf32>
    %858 = vector.shape_cast %857 : vector<2x8xf32> to vector<2x8x1xf32>
    %859 = vector.broadcast %858 : vector<2x8x1xf32> to vector<2x8x8xf32>
    %860 = arith.subf %856, %859 : vector<2x8x8xf32>
    %861 = math.exp %860 : vector<2x8x8xf32>
    %cst_243 = arith.constant dense<0.000000e+00> : vector<2x8xf32>
    %862 = vector.multi_reduction <add>, %861, %cst_243 [2] : vector<2x8x8xf32> to vector<2x8xf32>
    %863 = vector.shape_cast %862 : vector<2x8xf32> to vector<2x8x1xf32>
    %864 = tpu.reciprocal %863 {approx = true} : vector<2x8x1xf32> -> vector<2x8x1xf32>
    %865 = vector.broadcast %864 : vector<2x8x1xf32> to vector<2x8x8xf32>
    %866 = arith.mulf %861, %865 : vector<2x8x8xf32>
    %867 = arith.truncf %866 : vector<2x8x8xf32> to vector<2x8x8xbf16>
    "tpu.trace_start"() <{level = 10 : i32, message = "bqk,bkd->bqd"}> : () -> ()
    %cst_244 = arith.constant dense<0.000000e+00> : vector<2x8x16xf32>
    %868 = tpu.matmul %867, %848, %cst_244 {dimension_numbers = #tpu.dot_dimension_numbers<[2], [1], [1], [2], [0, 0, 0, 1, 1, 2], [0], [0]>} : vector<2x8x8xbf16>, vector<2x8x16xbf16>, vector<2x8x16xf32> -> vector<2x8x16xf32>
    "tpu.trace_stop"() : () -> ()
    %869 = vector.shape_cast %868 : vector<2x8x16xf32> to vector<16x16xf32>
    %870 = arith.truncf %869 : vector<16x16xf32> to vector<16x16xbf16>
    %871 = vector.extract_strided_slice %785 {offsets = [3, 0, 0], sizes = [1, 32, 32], strides = [1, 1, 1]} : vector<4x32x32xbf16> to vector<1x32x32xbf16>
    %872 = vector.shape_cast %871 : vector<1x32x32xbf16> to vector<32x32xbf16>
    %873 = vector.extract_strided_slice %872 {offsets = [16, 0], sizes = [16, 32], strides = [1, 1]} : vector<32x32xbf16> to vector<16x32xbf16>
    %cst_245 = arith.constant dense<0.000000e+00> : vector<16x32xf32>
    %874 = tpu.matmul %870, %873, %cst_245 {dimension_numbers = #tpu.dot_dimension_numbers<[1], [0], [0], [1], [0, 0, 1, 1], [], []>} : vector<16x16xbf16>, vector<16x32xbf16>, vector<16x32xf32> -> vector<16x32xf32>
    %875 = arith.addf %842, %874 : vector<16x32xf32>
    %876 = vector.extract_strided_slice %787 {offsets = [3, 0], sizes = [1, 32], strides = [1, 1]} : vector<4x32xf32> to vector<1x32xf32>
    %877 = vector.broadcast %876 : vector<1x32xf32> to vector<16x32xf32>
    %878 = arith.addf %875, %877 : vector<16x32xf32>
    %879 = arith.addf %759, %878 : vector<16x32xf32>
    %880 = vector.extract_strided_slice %637 {offsets = [2, 0], sizes = [1, 32], strides = [1, 1]} : vector<3x32xf32> to vector<1x32xf32>
    %881 = vector.extract_strided_slice %639 {offsets = [2, 0], sizes = [1, 32], strides = [1, 1]} : vector<3x32xf32> to vector<1x32xf32>
    %cst_246 = arith.constant dense<0.000000e+00> : vector<16xf32>
    %882 = vector.multi_reduction <add>, %879, %cst_246 [1] : vector<16x32xf32> to vector<16xf32>
    %883 = vector.shape_cast %882 : vector<16xf32> to vector<16x1xf32>
    %cst_247 = arith.constant 3.200000e+01 : f32
    %884 = vector.broadcast %cst_247 : f32 to vector<16x1xf32>
    %885 = arith.divf %883, %884 : vector<16x1xf32>
    %886 = vector.broadcast %885 : vector<16x1xf32> to vector<16x32xf32>
    %887 = arith.subf %879, %886 : vector<16x32xf32>
    %888 = arith.mulf %887, %887 : vector<16x32xf32>
    %cst_248 = arith.constant dense<0.000000e+00> : vector<16xf32>
    %889 = vector.multi_reduction <add>, %888, %cst_248 [1] : vector<16x32xf32> to vector<16xf32>
    %890 = vector.shape_cast %889 : vector<16xf32> to vector<16x1xf32>
    %cst_249 = arith.constant 3.200000e+01 : f32
    %891 = vector.broadcast %cst_249 : f32 to vector<16x1xf32>
    %892 = arith.divf %890, %891 : vector<16x1xf32>
    %893 = vector.broadcast %885 : vector<16x1xf32> to vector<16x32xf32>
    %894 = arith.subf %879, %893 : vector<16x32xf32>
    %cst_250 = arith.constant 9.99999974E-6 : f32
    %895 = vector.broadcast %cst_250 : f32 to vector<16x1xf32>
    %896 = arith.addf %892, %895 : vector<16x1xf32>
    %897 = math.rsqrt %896 : vector<16x1xf32>
    %898 = vector.broadcast %897 : vector<16x1xf32> to vector<16x32xf32>
    %899 = arith.mulf %894, %898 : vector<16x32xf32>
    %900 = vector.broadcast %880 : vector<1x32xf32> to vector<16x32xf32>
    %901 = arith.mulf %899, %900 : vector<16x32xf32>
    %902 = vector.broadcast %881 : vector<1x32xf32> to vector<16x32xf32>
    %903 = arith.addf %901, %902 : vector<16x32xf32>
    %c1_251 = arith.constant 1 : index
    %c0_252 = arith.constant 0 : index
    %c0_253 = arith.constant 0 : index
    %c0_254 = arith.constant 0 : index
    %904 = vector.load %arg15[%c1_251, %c0_252, %c0_253, %c0_254] : memref<2x2x32x32xbf16, #tpu.memory_space<vmem>>, vector<1x2x32x32xbf16>
    %905 = vector.shape_cast %904 : vector<1x2x32x32xbf16> to vector<2x32x32xbf16>
    %c1_255 = arith.constant 1 : index
    %c0_256 = arith.constant 0 : index
    %c0_257 = arith.constant 0 : index
    %906 = vector.load %arg16[%c1_255, %c0_256, %c0_257] : memref<2x2x32xf32, #tpu.memory_space<vmem>>, vector<1x2x32xf32>
    %907 = vector.shape_cast %906 : vector<1x2x32xf32> to vector<2x32xf32>
    %908 = arith.truncf %903 : vector<16x32xf32> to vector<16x32xbf16>
    %909 = vector.extract_strided_slice %905 {offsets = [0, 0, 0], sizes = [1, 32, 32], strides = [1, 1, 1]} : vector<2x32x32xbf16> to vector<1x32x32xbf16>
    %910 = vector.shape_cast %909 : vector<1x32x32xbf16> to vector<32x32xbf16>
    %cst_258 = arith.constant dense<0.000000e+00> : vector<16x32xf32>
    %911 = tpu.matmul %908, %910, %cst_258 {dimension_numbers = #tpu.dot_dimension_numbers<[1], [0], [0], [1], [0, 0, 1, 1], [], []>} : vector<16x32xbf16>, vector<32x32xbf16>, vector<16x32xf32> -> vector<16x32xf32>
    %912 = vector.extract_strided_slice %907 {offsets = [0, 0], sizes = [1, 32], strides = [1, 1]} : vector<2x32xf32> to vector<1x32xf32>
    %913 = vector.broadcast %912 : vector<1x32xf32> to vector<16x32xf32>
    %914 = arith.addf %911, %913 : vector<16x32xf32>
    %cst_259 = arith.constant 0.000000e+00 : f32
    %915 = vector.broadcast %cst_259 : f32 to vector<16x32xf32>
    %916 = arith.maximumf %914, %915 : vector<16x32xf32>
    %917 = arith.truncf %916 : vector<16x32xf32> to vector<16x32xbf16>
    %918 = vector.extract_strided_slice %905 {offsets = [1, 0, 0], sizes = [1, 32, 32], strides = [1, 1, 1]} : vector<2x32x32xbf16> to vector<1x32x32xbf16>
    %919 = vector.shape_cast %918 : vector<1x32x32xbf16> to vector<32x32xbf16>
    %cst_260 = arith.constant dense<0.000000e+00> : vector<16x32xf32>
    %920 = tpu.matmul %917, %919, %cst_260 {dimension_numbers = #tpu.dot_dimension_numbers<[1], [0], [0], [1], [0, 0, 1, 1], [], []>} : vector<16x32xbf16>, vector<32x32xbf16>, vector<16x32xf32> -> vector<16x32xf32>
    %921 = vector.extract_strided_slice %907 {offsets = [1, 0], sizes = [1, 32], strides = [1, 1]} : vector<2x32xf32> to vector<1x32xf32>
    %922 = vector.broadcast %921 : vector<1x32xf32> to vector<16x32xf32>
    %923 = arith.addf %920, %922 : vector<16x32xf32>
    %924 = arith.addf %903, %923 : vector<16x32xf32>
    %c0_261 = arith.constant 0 : index
    %c0_262 = arith.constant 0 : index
    %925 = vector.load %arg17[%c0_261, %c0_262] : memref<32x1xf32, #tpu.memory_space<vmem>>, vector<32x1xf32>
    %cst_263 = arith.constant dense<0.000000e+00> : vector<16x1xf32>
    %926 = tpu.matmul %924, %925, %cst_263 {dimension_numbers = #tpu.dot_dimension_numbers<[1], [0], [0], [1], [0, 0, 1, 1], [], []>} : vector<16x32xf32>, vector<32x1xf32>, vector<16x1xf32> -> vector<16x1xf32>
    %c0_264 = arith.constant 0 : index
    %c0_265 = arith.constant 0 : index
    %927 = vector.load %arg18[%c0_264, %c0_265] : memref<1x1xf32, #tpu.memory_space<vmem>>, vector<1x1xf32>
    %928 = vector.extract %927[0, 0] : f32 from vector<1x1xf32>
    %929 = vector.broadcast %928 : f32 to vector<16x1xf32>
    %930 = arith.addf %926, %929 : vector<16x1xf32>
    %931 = arith.negf %930 : vector<16x1xf32>
    %932 = math.exp %931 : vector<16x1xf32>
    %cst_266 = arith.constant 1.000000e+00 : f32
    %933 = vector.broadcast %cst_266 : f32 to vector<16x1xf32>
    %934 = arith.addf %933, %932 : vector<16x1xf32>
    %935 = arith.divf %933, %934 : vector<16x1xf32>
    %c0_267 = arith.constant 0 : index
    %c0_268 = arith.constant 0 : index
    %936 = vector.load %arg19[%c0_267, %c0_268] : memref<16x1xf32, #tpu.memory_space<vmem>>, vector<16x1xf32>
    tpu.vector_store %arg19[%c0_267, %c0_268], %935 {strides = array<i32>} : memref<16x1xf32, #tpu.memory_space<vmem>>, vector<16x1xf32>,
    return
  }
  func.func @transform_0(%arg0: i32) -> (i32, i32, i32) {
    %c0_i32 = arith.constant 0 : i32
    %c0_i32_0 = arith.constant 0 : i32
    %c0_i32_1 = arith.constant 0 : i32
    return %arg0, %c0_i32, %c0_i32_0 : i32, i32, i32
  }
  func.func @transform_1(%arg0: i32) -> (i32, i32, i32) {
    %c0_i32 = arith.constant 0 : i32
    %c0_i32_0 = arith.constant 0 : i32
    %c0_i32_1 = arith.constant 0 : i32
    return %arg0, %c0_i32, %c0_i32_0 : i32, i32, i32
  }
  func.func @transform_2(%arg0: i32) -> (i32, i32, i32) {
    %c0_i32 = arith.constant 0 : i32
    %c0_i32_0 = arith.constant 0 : i32
    %c0_i32_1 = arith.constant 0 : i32
    %c0_i32_2 = arith.constant 0 : i32
    return %c0_i32, %c0_i32_0, %c0_i32_1 : i32, i32, i32
  }
  func.func @transform_3(%arg0: i32) -> (i32, i32, i32) {
    %c0_i32 = arith.constant 0 : i32
    %c0_i32_0 = arith.constant 0 : i32
    %c0_i32_1 = arith.constant 0 : i32
    %c0_i32_2 = arith.constant 0 : i32
    return %c0_i32, %c0_i32_0, %c0_i32_1 : i32, i32, i32
  }
  func.func @transform_4(%arg0: i32) -> (i32, i32, i32, i32) {
    %c0_i32 = arith.constant 0 : i32
    %c0_i32_0 = arith.constant 0 : i32
    %c0_i32_1 = arith.constant 0 : i32
    %c0_i32_2 = arith.constant 0 : i32
    %c0_i32_3 = arith.constant 0 : i32
    return %c0_i32, %c0_i32_0, %c0_i32_1, %c0_i32_2 : i32, i32, i32, i32
  }
  func.func @transform_5(%arg0: i32) -> (i32, i32, i32) {
    %c0_i32 = arith.constant 0 : i32
    %c0_i32_0 = arith.constant 0 : i32
    %c0_i32_1 = arith.constant 0 : i32
    %c0_i32_2 = arith.constant 0 : i32
    return %c0_i32, %c0_i32_0, %c0_i32_1 : i32, i32, i32
  }
  func.func @transform_6(%arg0: i32) -> (i32, i32, i32, i32) {
    %c0_i32 = arith.constant 0 : i32
    %c0_i32_0 = arith.constant 0 : i32
    %c0_i32_1 = arith.constant 0 : i32
    %c0_i32_2 = arith.constant 0 : i32
    %c0_i32_3 = arith.constant 0 : i32
    return %c0_i32, %c0_i32_0, %c0_i32_1, %c0_i32_2 : i32, i32, i32, i32
  }
  func.func @transform_7(%arg0: i32) -> (i32, i32, i32) {
    %c0_i32 = arith.constant 0 : i32
    %c0_i32_0 = arith.constant 0 : i32
    %c0_i32_1 = arith.constant 0 : i32
    %c0_i32_2 = arith.constant 0 : i32
    return %c0_i32, %c0_i32_0, %c0_i32_1 : i32, i32, i32
  }
  func.func @transform_8(%arg0: i32) -> (i32, i32, i32) {
    %c0_i32 = arith.constant 0 : i32
    %c0_i32_0 = arith.constant 0 : i32
    %c0_i32_1 = arith.constant 0 : i32
    %c0_i32_2 = arith.constant 0 : i32
    return %c0_i32, %c0_i32_0, %c0_i32_1 : i32, i32, i32
  }
  func.func @transform_9(%arg0: i32) -> (i32, i32, i32) {
    %c0_i32 = arith.constant 0 : i32
    %c0_i32_0 = arith.constant 0 : i32
    %c0_i32_1 = arith.constant 0 : i32
    %c0_i32_2 = arith.constant 0 : i32
    return %c0_i32, %c0_i32_0, %c0_i32_1 : i32, i32, i32
  }
  func.func @transform_10(%arg0: i32) -> (i32, i32, i32, i32) {
    %c0_i32 = arith.constant 0 : i32
    %c0_i32_0 = arith.constant 0 : i32
    %c0_i32_1 = arith.constant 0 : i32
    %c0_i32_2 = arith.constant 0 : i32
    %c0_i32_3 = arith.constant 0 : i32
    return %c0_i32, %c0_i32_0, %c0_i32_1, %c0_i32_2 : i32, i32, i32, i32
  }
  func.func @transform_11(%arg0: i32) -> (i32, i32, i32) {
    %c0_i32 = arith.constant 0 : i32
    %c0_i32_0 = arith.constant 0 : i32
    %c0_i32_1 = arith.constant 0 : i32
    %c0_i32_2 = arith.constant 0 : i32
    return %c0_i32, %c0_i32_0, %c0_i32_1 : i32, i32, i32
  }
  func.func @transform_12(%arg0: i32) -> (i32, i32, i32, i32) {
    %c0_i32 = arith.constant 0 : i32
    %c0_i32_0 = arith.constant 0 : i32
    %c0_i32_1 = arith.constant 0 : i32
    %c0_i32_2 = arith.constant 0 : i32
    %c0_i32_3 = arith.constant 0 : i32
    return %c0_i32, %c0_i32_0, %c0_i32_1, %c0_i32_2 : i32, i32, i32, i32
  }
  func.func @transform_13(%arg0: i32) -> (i32, i32, i32) {
    %c0_i32 = arith.constant 0 : i32
    %c0_i32_0 = arith.constant 0 : i32
    %c0_i32_1 = arith.constant 0 : i32
    %c0_i32_2 = arith.constant 0 : i32
    return %c0_i32, %c0_i32_0, %c0_i32_1 : i32, i32, i32
  }
  func.func @transform_14(%arg0: i32) -> (i32, i32, i32, i32) {
    %c0_i32 = arith.constant 0 : i32
    %c0_i32_0 = arith.constant 0 : i32
    %c0_i32_1 = arith.constant 0 : i32
    %c0_i32_2 = arith.constant 0 : i32
    %c0_i32_3 = arith.constant 0 : i32
    return %c0_i32, %c0_i32_0, %c0_i32_1, %c0_i32_2 : i32, i32, i32, i32
  }
  func.func @transform_15(%arg0: i32) -> (i32, i32, i32) {
    %c0_i32 = arith.constant 0 : i32
    %c0_i32_0 = arith.constant 0 : i32
    %c0_i32_1 = arith.constant 0 : i32
    %c0_i32_2 = arith.constant 0 : i32
    return %c0_i32, %c0_i32_0, %c0_i32_1 : i32, i32, i32
  }
  func.func @transform_16(%arg0: i32) -> (i32, i32) {
    %c0_i32 = arith.constant 0 : i32
    %c0_i32_0 = arith.constant 0 : i32
    %c0_i32_1 = arith.constant 0 : i32
    return %c0_i32, %c0_i32_0 : i32, i32
  }
  func.func @transform_17(%arg0: i32) -> (i32, i32) {
    %c0_i32 = arith.constant 0 : i32
    %c0_i32_0 = arith.constant 0 : i32
    %c0_i32_1 = arith.constant 0 : i32
    return %c0_i32, %c0_i32_0 : i32, i32
  }
  func.func @transform_18(%arg0: i32) -> (i32, i32) {
    %c0_i32 = arith.constant 0 : i32
    %c0_i32_0 = arith.constant 0 : i32
    return %arg0, %c0_i32 : i32, i32
  }
}

</mosaic_0001>

<bundles_post_ra>
// kernel: tpu_custom_call.1
= control target key start
LH: loop header
LB: loop body
LE: loop exit
PB: predicated region body
PF: predicated region fallthrough
CT: control target
= control target key end

     0   :  { %s8316_s0 = inlined_call_operand.vmem [shape: bf16[2,8,32], index: 0, kind: input, shape index: {}]   ;;  %s8317_s1 = inlined_call_operand.hbm [shape: bf16[2,8,32], index: 1, kind: input, shape index: {}]   ;;  %s8318_s2 = inlined_call_operand.hbm [shape: f32[2,2,32], index: 2, kind: input, shape index: {}]   ;;  %s8319_s3 = inlined_call_operand.hbm [shape: f32[2,2,32], index: 3, kind: input, shape index: {}]   ;;  %s8320_s4 = inlined_call_operand.hbm [shape: bf16[2,4,32,32], index: 4, kind: input, shape index: {}]   ;;  %s8321_s5 = inlined_call_operand.hbm [shape: f32[2,4,32], index: 5, kind: input, shape index: {}]   ;;  %s8322_s6 = inlined_call_operand.vmem [shape: bf16[2,2,32,32], index: 6, kind: input, shape index: {}]   ;;  %s8323_s7 = inlined_call_operand.hbm [shape: f32[2,2,32], index: 7, kind: input, shape index: {}]   ;;  %s8324_s8 = inlined_call_operand.vmem [shape: f32[2,3,32], index: 8, kind: input, shape index: {}]   ;;  %s8325_s9 = inlined_call_operand.vmem [shape: f32[2,3,32], index: 9, kind: input, shape index: {}]   ;;  %s8326_s10 = inlined_call_operand.hbm [shape: bf16[2,4,32,32], index: 10, kind: input, shape index: {}]   ;;  %s8327_s11 = inlined_call_operand.vmem [shape: f32[2,4,32], index: 11, kind: input, shape index: {}]   ;;  %s8328_s12 = inlined_call_operand.hbm [shape: bf16[2,4,32,32], index: 12, kind: input, shape index: {}]   ;;  %s8329_s13 = inlined_call_operand.hbm [shape: f32[2,4,32], index: 13, kind: input, shape index: {}]   ;;  %s8330_s14 = inlined_call_operand.hbm [shape: bf16[2,2,32,32], index: 14, kind: input, shape index: {}]   ;;  %s8331_s15 = inlined_call_operand.vmem [shape: f32[2,2,32], index: 15, kind: input, shape index: {}]   ;;  %s8332_s16 = inlined_call_operand.vmem [shape: f32[32,1], index: 16, kind: input, shape index: {}]   ;;  %s8333_s17 = inlined_call_operand.<no memory space> [shape: f32[1,1], index: 17, kind: input, shape index: {}]   ;;  %s8334_s18 = inlined_call_operand.vmem [shape: f32[16,1], index: 18, kind: output, shape index: {}]  }
   0x1   :  { %8335 = sst [smem:[#allocation25_spill]] %s8316_s0  ;;  %v23_v0 = vstv %s8333_s17 }
   0x2   :  { %8336 = sst [smem:[#allocation26_spill]] %s8317_s1  ;;  %24 = vst [vmem:[#allocation2] sm:$0x1] %v23_v0 }
   0x3   :  { %8337 = sst [smem:[#allocation27_spill]] %s8318_s2 }
   0x4   :  { %25 = vsyncpa [#allocation4], 0 }
   0x5   :  { %26 = vsyncpa [#allocation6], 0 }
   0x6   :  { %27 = vsyncpa [#allocation9], 0 }
   0x7   :  { %28 = vsyncpa [#allocation12], 0 }
   0x8   :  { %29 = vsyncpa [#allocation15], 0 }
   0x9   :  { %30 = vsyncpa [#allocation18], 0  ;;  %s7151_s29 = smov [#allocation5]  }
   0xa   :  { %s50_s30 = sshll.u32 %s7151_s29, 4  ;;  %s51_s30 = int_to_ptr.vmem [resolvable:$true] %s50_s30 }
   0xb   :  { %s6947_s0 = scalar_lea.vmem %s51_s30, 64  ;;  %p6952_p1 = scmp.lt.s32.totalorder %s51_s30, %s51_s30 }
   0xc   :  { %p6948_p0 = scmp.ne.s32.totalorder %s51_s30, %s6947_s0  ;;  %p6953_p2 = scmp.lt.s32.totalorder %s6947_s0, %s6947_s0 }
   0xe   :  { %p6954_p3 = por %p6953_p2, %p6952_p1 }
  0x10   :  { %p6955_p4 = pnand %p6954_p3, %p6948_p0 }
  0x12   :  { %6958 = shalt.err (!%p6955_p4)
}
  0x13   :  { %s7152_s19 = smov 32   ;;  %s7153_s1 = smov 2  }
  0x14   :  { %s8338_s21 = sld [smem:[#allocation27_spill]]  ;;  %s7154_s22 = smov [#allocation8]  }
  0x15   :  { %s74_s2 = sshll.u32 %s7154_s22, 4  ;;  %s7155_s23 = smov [#allocation11]   ;;  %s75_s2 = int_to_ptr.vmem [resolvable:$true] %s74_s2 }
  0x16   :  { %s100_s24 = sshll.u32 %s7155_s23, 4  ;;  %s6967_s25 = scalar_lea.vmem %s75_s2, 2048  ;;  %s101_s24 = int_to_ptr.vmem [resolvable:$true] %s100_s24 }
  0x17   :  { %p6968_p5 = scmp.ne.s32.totalorder %s75_s2, %s6967_s25  ;;  %p6972_p6 = scmp.lt.s32.totalorder %s75_s2, %s75_s2 }
  0x18   :  { %p6973_p7 = scmp.lt.s32.totalorder %s6967_s25, %s6967_s25 }
  0x1a   :  { %56 = dma.hbm_to_vmem [thread:$0]  %s8338_s21, 64, %s51_s30, [#allocation6], %s7152_s19, %s7152_s19, %s7153_s1  }
  0x1b   :  { %p6974_p8 = por %p6973_p7, %p6972_p6 }
  0x1d   :  { %p6975_p9 = pnand %p6974_p8, %p6968_p5 }
  0x1f   :  { %6978 = shalt.err (!%p6975_p9)
}
  0x20   :  { %s7156_s26 = smov 64   ;;  %s7157_s27 = smov 4  }
  0x21   :  { %80 = dma.hbm_to_vmem [thread:$0]  %s8320_s4, 2048, %s75_s2, [#allocation9], %s7156_s26, %s7156_s26, %s7157_s27  }
  0x22   :  { %s6987_s30 = scalar_lea.vmem %s101_s24, 64  ;;  %p6992_p11 = scmp.lt.s32.totalorder %s101_s24, %s101_s24 }
  0x23   :  { %p6988_p10 = scmp.ne.s32.totalorder %s101_s24, %s6987_s30  ;;  %p6993_p12 = scmp.lt.s32.totalorder %s6987_s30, %s6987_s30 }
  0x25   :  { %p6994_p13 = por %p6993_p12, %p6992_p11 }
  0x27   :  { %p6995_p0 = pnand %p6994_p13, %p6988_p10 }
  0x29   :  { %6998 = shalt.err (!%p6995_p0)
}
  0x2a   :  { %106 = dma.hbm_to_vmem [thread:$0]  %s8323_s7, 64, %s101_s24, [#allocation12], %s7152_s19, %s7152_s19, %s7153_s1  }
  0x2b   :  { %s7158_s20 = smov [#allocation14]   ;;  %s7159_s22 = smov [#allocation3]  }
  0x2c   :  { %s130_s21 = sshll.u32 %s7158_s20, 4  ;;  %s38_s4 = sshll.u32 %s7159_s22, 4  ;;  %s131_s21 = int_to_ptr.vmem [resolvable:$true] %s130_s21  ;;  %s39_s4 = int_to_ptr.vmem [resolvable:$true] %s38_s4 }
  0x2d   :  { %s7007_s2 = scalar_lea.vmem %s131_s21, 2048  ;;  %p7012_p2 = scmp.lt.s32.totalorder %s131_s21, %s131_s21 }
  0x2e   :  { %p7008_p1 = scmp.ne.s32.totalorder %s131_s21, %s7007_s2  ;;  %p7013_p3 = scmp.lt.s32.totalorder %s7007_s2, %s7007_s2 }
  0x30   :  { %p7014_p4 = por %p7013_p3, %p7012_p2 }
  0x32   :  { %p7015_p5 = pnand %p7014_p4, %p7008_p1 }
  0x34   :  { %7018 = shalt.err (!%p7015_p5)
}
  0x35   :  { %136 = dma.hbm_to_vmem [thread:$0]  %s8328_s12, 2048, %s131_s21, [#allocation15], %s7156_s26, %s7156_s26, %s7157_s27  }
  0x36   :  { %s7027_s7 = scalar_lea.vmem %s39_s4, 128  ;;  %p7032_p7 = scmp.lt.s32.totalorder %s39_s4, %s39_s4 }
  0x37   :  { %p7028_p6 = scmp.ne.s32.totalorder %s39_s4, %s7027_s7  ;;  %p7033_p8 = scmp.lt.s32.totalorder %s7027_s7, %s7027_s7 }
  0x39   :  { %p7034_p9 = por %p7033_p8, %p7032_p7 }
  0x3b   :  { %p7035_p10 = pnand %p7034_p9, %p7028_p6 }
  0x3d   :  { %7038 = shalt.err (!%p7035_p10)
}
  0x3e   :  { %s8339_s29 = sld [smem:[#allocation26_spill]]  ;;  %s7160_s30 = smov [#allocation7]  }
  0x3f   :  { %s62_s0 = sshll.u32 %s7160_s30, 4  ;;  %s7161_s17 = smov [#allocation10]   ;;  %s63_s0 = int_to_ptr.vmem [resolvable:$true] %s62_s0 }
  0x40   :  { %s86_s12 = sshll.u32 %s7161_s17, 4  ;;  %s7047_s20 = scalar_lea.vmem %s63_s0, 64  ;;  %s87_s12 = int_to_ptr.vmem [resolvable:$true] %s86_s12 }
  0x41   :  { %p7048_p11 = scmp.ne.s32.totalorder %s63_s0, %s7047_s20  ;;  %p7052_p12 = scmp.lt.s32.totalorder %s63_s0, %s63_s0 }
  0x42   :  { %p7053_p13 = scmp.lt.s32.totalorder %s7047_s20, %s7047_s20 }
  0x44   :  { %44 = dma.hbm_to_vmem [thread:$0]  %s8339_s29, 128, %s39_s4, [#allocation4], %s7156_s26, %s7156_s26, %s7157_s27  }
  0x45   :  { %p7054_p0 = por %p7053_p13, %p7052_p12 }
  0x47   :  { %p7055_p1 = pnand %p7054_p0, %p7048_p11 }
  0x49   :  { %7058 = shalt.err (!%p7055_p1)
}
  0x4a   :  { %68 = dma.hbm_to_vmem [thread:$0]  %s8319_s3, 64, %s63_s0, [#allocation6], %s7152_s19, %s7152_s19, %s7153_s1  }
  0x4b   :  { %s7067_s4 = scalar_lea.vmem %s87_s12, 128  ;;  %p7072_p3 = scmp.lt.s32.totalorder %s87_s12, %s87_s12 }
  0x4c   :  { %p7068_p2 = scmp.ne.s32.totalorder %s87_s12, %s7067_s4  ;;  %p7073_p4 = scmp.lt.s32.totalorder %s7067_s4, %s7067_s4 }
  0x4e   :  { %p7074_p5 = por %p7073_p4, %p7072_p3 }
  0x50   :  { %p7075_p6 = pnand %p7074_p5, %p7068_p2 }
  0x52   :  { %7078 = shalt.err (!%p7075_p6)
}
  0x53   :  { %92 = dma.hbm_to_vmem [thread:$0]  %s8321_s5, 128, %s87_s12, [#allocation9], %s7156_s26, %s7156_s26, %s7157_s27  }
  0x54   :  { %s7162_s25 = smov [#allocation13]   ;;  %s7163_s24 = smov [#allocation16]  }
  0x55   :  { %s116_s7 = sshll.u32 %s7162_s25, 4  ;;  %s142_s3 = sshll.u32 %s7163_s24, 4  ;;  %s117_s7 = int_to_ptr.vmem [resolvable:$true] %s116_s7  ;;  %s143_s3 = int_to_ptr.vmem [resolvable:$true] %s142_s3 }
  0x56   :  { %s7087_s19 = scalar_lea.vmem %s117_s7, 2048  ;;  %p7092_p8 = scmp.lt.s32.totalorder %s117_s7, %s117_s7 }
  0x57   :  { %p7088_p7 = scmp.ne.s32.totalorder %s117_s7, %s7087_s19  ;;  %p7093_p9 = scmp.lt.s32.totalorder %s7087_s19, %s7087_s19 }
  0x59   :  { %p7094_p10 = por %p7093_p9, %p7092_p8 }
  0x5b   :  { %p7095_p11 = pnand %p7094_p10, %p7088_p7 }
  0x5d   :  { %7098 = shalt.err (!%p7095_p11)
}
  0x5e   :  { %122 = dma.hbm_to_vmem [thread:$0]  %s8326_s10, 2048, %s117_s7, [#allocation12], %s7156_s26, %s7156_s26, %s7157_s27  }
  0x5f   :  { %s7107_s5 = scalar_lea.vmem %s143_s3, 128  ;;  %p7112_p13 = scmp.lt.s32.totalorder %s143_s3, %s143_s3 }
  0x60   :  { %p7108_p12 = scmp.ne.s32.totalorder %s143_s3, %s7107_s5  ;;  %p7113_p0 = scmp.lt.s32.totalorder %s7107_s5, %s7107_s5 }
  0x62   :  { %p7114_p1 = por %p7113_p0, %p7112_p13 }
  0x64   :  { %p7115_p2 = pnand %p7114_p1, %p7108_p12 }
  0x66   :  { %7118 = shalt.err (!%p7115_p2)
}
  0x67   :  { %148 = dma.hbm_to_vmem [thread:$0]  %s8329_s13, 128, %s143_s3, [#allocation15], %s7156_s26, %s7156_s26, %s7157_s27  }
  0x68   :  { %s7164_s0 = smov [#allocation17]  }
  0x69   :  { %s154_s17 = sshll.u32 %s7164_s0, 4  ;;  %s155_s17 = int_to_ptr.vmem [resolvable:$true] %s154_s17 }
  0x6a   :  { %s7127_s12 = scalar_lea.vmem %s155_s17, 1024  ;;  %p7132_p4 = scmp.lt.s32.totalorder %s155_s17, %s155_s17 }
  0x6b   :  { %p7128_p3 = scmp.ne.s32.totalorder %s155_s17, %s7127_s12  ;;  %p7133_p5 = scmp.lt.s32.totalorder %s7127_s12, %s7127_s12 }
  0x6d   :  { %p7134_p6 = por %p7133_p5, %p7132_p4 }
  0x6f   :  { %p7135_p7 = pnand %p7134_p6, %p7128_p3 }
  0x71   :  { %7138 = shalt.err (!%p7135_p7)
}
  0x72   :  { %160 = dma.hbm_to_vmem [thread:$0]  %s8330_s14, 1024, %s155_s17, [#allocation18], %s7156_s26, %s7156_s26, %s7157_s27  }
  0x73   :  { %7139 = dma.done.wait [#allocation4], 128  }
  0x74   :  { %7140 = vsyncadd [#allocation4], 4294967168 }
  0x75   :  { %7141 = dma.done.wait [#allocation6], 128  }
  0x76   :  { %7142 = vsyncadd [#allocation6], 4294967168 }
  0x77   :  { %7143 = dma.done.wait [#allocation9], 2176  }
  0x78   :  { %7144 = vsyncadd [#allocation9], 4294965120 }
  0x79   :  { %7145 = dma.done.wait [#allocation12], 2112  }
  0x7a   :  { %7146 = vsyncadd [#allocation12], 4294965184 }
  0x7b   :  { %7147 = dma.done.wait [#allocation15], 2176  }
  0x7c   :  { %7148 = vsyncadd [#allocation15], 4294965120 }
  0x7d   :  { %7149 = dma.done.wait [#allocation18], 1024  }
  0x7e   :  { %7150 = vsyncadd [#allocation18], 4294966272  ;;  %s8340_s22 = sld [smem:[#allocation25_spill]]  ;;  %vm209_vm0 = vcmask 261120   ;;  %v6731_v16 = vld [vmem:[#allocation8 + $0x8] sm:$0xff]   ;;  %v6732_v17 = vld [vmem:[#allocation8 + $0x18] sm:$0xff]   ;;  %v198_v27 = vlaneseq }
  0x7f   :  { %v7165_v18 = vmov 0.0   ;;  %v6733_v19 = vld [vmem:[#allocation8] sm:$0xff]   ;;  %v6734_v20 = vld [vmem:[#allocation8 + $0x10] sm:$0xff]   ;;  %vm7166_vm1 = vmmov 0   ;;  %v7349_v30 = vld [vmem:[#allocation5] sm:$0x3] }
  0x80   :  { %6133 = vmatprep.subr.bf16.mxu0 %v7165_v18  ;;  %6141 = vmatprep.subr.bf16.mxu1 %v7165_v18  ;;  %v7344_v28 = vshrl.u32 %v198_v27, 7  ;;  %v7353_v34 = vld [vmem:[#allocation7] sm:$0x3]  ;;  %v6735_v42 = vld [vmem:[#allocation8 + $0x28] sm:$0xff]   ;;  %v6736_v44 = vld [vmem:[#allocation8 + $0x20] sm:$0xff]   ;;  %vm447_vm2 = vcmask 130048  }
  0x81   :  { %6134 = vmatpush3.bf16.msra.mxu0 %v6731_v16  ;;  %6142 = vmatpush3.bf16.msra.mxu1 %v6732_v17  ;;  %v7377_v46 = vld [vmem:[#allocation10] sm:$0xf]  ;;  %vm574_vm3 = vcmask 1043456   ;;  %vm546_vm5 = vcmask 64512   ;;  %s7167_s14 = smov 112   ;;  %vm5742_vm6 = vcmask 7168  }
  0x82   :  { %6135 = vmatprep.subr.bf16.mxu0 %v7165_v18  ;;  %6143 = vmatprep.subr.bf16.mxu1 %v7165_v18  ;;  %v7347_v29 = vsub.s32 0, %v7344_v28  ;;  %v7375_v45 = vsub.s32 1, %v7344_v28  ;;  %v7382_v51 = vsub.s32 2, %v7344_v28 }
  0x83   :  { %6137 = vmatprep.mubr.msk.bf16.mxu0 %vm7166_vm1, %v7165_v18  ;;  %6145 = vmatprep.mubr.msk.bf16.mxu1 %vm7166_vm1, %v7165_v18 }
  0x84   :  { %v5922_v1 = vld [vmem:[%s8340_s22] sm:$0xff]   ;;  %v240_v33 = vrot.slane %v7349_v30, %v7347_v29  ;;  %v246_v38 = vrot.slane %v7353_v34, %v7347_v29  ;;  %v330_v47 = vrot.slane %v7377_v46, %v7375_v45  ;;  %v270_v54 = vrot.slane %v7377_v46, %v7347_v29 }
  0x85   :  { %v5923_v2 = vunpack.c.l.bf16 %v5922_v1  ;;  %v5924_v3 = vunpack.c.h.bf16 %v5922_v1  ;;  %6136 = vmatpush3.bf16.msra.mxu0 %v6733_v19  ;;  %6144 = vmatpush3.bf16.msra.mxu1 %v6734_v20  ;;  %v387_v60 = vrot.slane %v7377_v46, %v7382_v51 }
  0x86   :  { %6149 = vmatprep.subr.bf16.mxu0 %v7165_v18  ;;  %6157 = vmatprep.subr.bf16.mxu1 %v7165_v18 }
  0x87   :  { %v210_v4 = vsel %vm209_vm0, %v5923_v2, 0.0  ;;  %v213_v5 = vsel %vm209_vm0, %v5924_v3, 0.0 }
  0x88   :  { %211 = vadd.xlane.f32.xlu0 %v210_v4 }
  0x8c   :  { %214 = vadd.xlane.f32.xlu0 %v213_v5 }
 0x111   :  { %v212_v6 = vpop.xlane.xlu0 %211 }
 0x112   :  { %v217_v7 = vmul.f32 0.03125, %v212_v6 }
 0x114   :  { %v219_v8 = vsub.f32 %v5923_v2, %v217_v7 }
 0x115   :  { %v215_v9 = vpop.xlane.xlu0 %214 }
 0x116   :  { %v218_v10 = vmul.f32 0.03125, %v215_v9  ;;  %v221_v11 = vmul.f32 %v219_v8, %v219_v8 }
 0x118   :  { %v220_v12 = vsub.f32 %v5924_v3, %v218_v10  ;;  %v223_v13 = vsel %vm209_vm0, %v221_v11, 0.0 }
 0x119   :  { %224 = vadd.xlane.f32.xlu1 %v223_v13 }
 0x11a   :  { %v222_v14 = vmul.f32 %v220_v12, %v220_v12 }
 0x11c   :  { %v226_v15 = vsel %vm209_vm0, %v222_v14, 0.0 }
 0x11d   :  { %227 = vadd.xlane.f32.xlu1 %v226_v15  ;;  %v201_v15 = vand.u32 127, %v198_v27 }
 0x11f   :  { %vm7413_vm4 = vcmp.le.s32.totalorder %v201_v15, %v7344_v28 }
 0x1a2   :  { %v225_v21 = vpop.xlane.xlu1 %224 }
 0x1a3   :  { %v229_v22 = vmul.f32 0.03125, %v225_v21 }
 0x1a5   :  { %v231_v23 = vadd.f32 1e-05, %v229_v22 }
 0x1a6   :  { %v228_v24 = vpop.xlane.xlu1 %227 }
 0x1a7   :  { %6795 = vrsqrt.f32 %v231_v23  ;;  %v230_v25 = vmul.f32 0.03125, %v228_v24 }
 0x1a9   :  { %v232_v26 = vadd.f32 1e-05, %v230_v25 }
 0x1ab   :  { %6797 = vrsqrt.f32 %v232_v26 }
 0x1b4   :  { %v6796_v31 = vpop.eup %6795 }
 0x1b5   :  { %v235_v32 = vmul.f32 %v6796_v31, %v219_v8 }
 0x1b7   :  { %v241_v37 = vmul.f32 %v240_v33, %v235_v32 }
 0x1b8   :  { %v6798_v35 = vpop.eup %6797 }
 0x1b9   :  { %v236_v36 = vmul.f32 %v6798_v35, %v220_v12  ;;  %v7357_v40 = vadd.f32 %v246_v38, %v241_v37 }
 0x1bb   :  { %v242_v39 = vmul.f32 %v240_v33, %v236_v36 }
 0x1bd   :  { %v7359_v41 = vadd.f32 %v246_v38, %v242_v39 }
 0x1bf   :  { %v266_v43 = vpack.c.bf16 %v7359_v41, %v7357_v40 }
 0x1c1   :  { %6138 = vmatmul.mubr.msk.bf16.vlgmr.msra.gmra.mxu0 %vm209_vm0, %v266_v43  ;;  %6146 = vmatmul.mubr.msk.bf16.vlgmr.msra.gmra.mxu1 %vm209_vm0, %v266_v43 }
 0x1c2   :  { %6150 = vmatpush3.bf16.msra.mxu0 %v6735_v42  ;;  %6153 = vmatprep.mubr.msk.bf16.mxu0 %vm7166_vm1, %v7165_v18 }
 0x1c3   :  { %6151 = vmatprep.subr.bf16.mxu0 %v7165_v18  ;;  %6159 = vmatprep.mubr.msk.bf16.mxu1 %vm7166_vm1, %v7165_v18 }
 0x1c6   :  { %6152 = vmatpush3.bf16.msra.mxu0 %v6736_v44 }
 0x1c7   :  { %6163 = vmatprep.subr.bf16.mxu0 %v7165_v18 }
 0x1c9   :  { %6154 = vmatmul.mubr.msk.bf16.vlgmr.msra.gmra.mxu0 %vm209_vm0, %v266_v43 }
 0x1ca   :  { %6165 = vmatprep.mubr.msk.bf16.mxu0 %vm7166_vm1, %v7165_v18 }
 0x281   :  { %v320_v48 = vpop.f32.mrf.mxu0  ;;  %v377_v49 = vpop.f32.mrf.mxu1 }
 0x282   :  { %v378_v50 = vadd.f32 %v377_v49, %v330_v47  ;;  %v321_v63 = vadd.f32 %v320_v48, %v270_v54 }
 0x283   :  { %v6139_v52 = vpop.f32.mrf.mxu0  ;;  %v6147_v53 = vpop.f32.mrf.mxu1 }
 0x284   :  { %v7386_v55 = vpack.c.bf16 %v378_v50, %v378_v50  ;;  %v441_v5 = vpack.c.bf16 %v321_v63, %v321_v63 }
 0x285   :  { %v323_v56 = vpop.f32.mrf.mxu0  ;;  %v380_v57 = vpop.f32.mrf.mxu1 }
 0x286   :  { %v452_v58 = vsel %vm447_vm2, %v7386_v55, 0  ;;  %v381_v59 = vadd.f32 %v380_v57, %v330_v47  ;;  %v324_v6 = vadd.f32 %v323_v56, %v270_v54 }
 0x287   :  { %v6140_v61 = vpop.f32.mrf.mxu0  ;;  %v6148_v62 = vpop.f32.mrf.mxu1  ;;  %6158 = vmatpush3.bf16.xpose.msra.mxu1 %v452_v58 }
 0x288   :  { %v444_v0 = vpack.c.bf16 %v381_v59, %v381_v59  ;;  %6169 = vmatprep.subr.bf16.mxu1 %v7165_v18  ;;  %v442_v12 = vpack.c.bf16 %v324_v6, %v324_v6 }
 0x289   :  { %v434_v1 = vpop.f32.mrf.mxu0 }
 0x28a   :  { %v498_v2 = vsel %vm447_vm2, %v444_v0, 0  ;;  %v435_v3 = vadd.f32 %v434_v1, %v387_v60 }
 0x28b   :  { %v6155_v4 = vpop.f32.mrf.mxu0  ;;  %6164 = vmatpush3.bf16.xpose.msra.mxu0 %v498_v2 }
 0x28c   :  { %v7394_v7 = vpack.c.bf16 %v435_v3, %v435_v3  ;;  %6175 = vmatprep.subr.bf16.mxu0 %v7165_v18 }
 0x28d   :  { %v437_v8 = vpop.f32.mrf.mxu0 }
 0x28e   :  { %v576_v9 = vsel %vm574_vm3, %v7394_v7, 0  ;;  %v438_v10 = vadd.f32 %v437_v8, %v387_v60  ;;  %6160 = vmatmul.mubr.msk.bf16.vlgmr.msra.gmra.mxu1 %vm447_vm2, %v441_v5 }
 0x28f   :  { %v6156_v11 = vpop.f32.mrf.mxu0  ;;  %6170 = vmatpush3.bf16.msra.mxu1 %v576_v9  ;;  %6171 = vmatprep.mubr.msk.bf16.mxu1 %vm7166_vm1, %v7165_v18 }
 0x290   :  { %v7402_v13 = vpack.c.bf16 %v438_v10, %v438_v10  ;;  %6181 = vmatprep.subr.bf16.mxu1 %v7165_v18 }
 0x292   :  { %v622_v14 = vsel %vm574_vm3, %v7402_v13, 0  ;;  %6166 = vmatmul.mubr.msk.bf16.vlgmr.msra.gmra.mxu0 %vm447_vm2, %v442_v12 }
 0x293   :  { %6176 = vmatpush3.bf16.msra.mxu0 %v622_v14  ;;  %6177 = vmatprep.mubr.msk.bf16.mxu0 %vm7166_vm1, %v7165_v18 }
 0x294   :  { %6187 = vmatprep.subr.bf16.mxu0 %v7165_v18 }
 0x34e   :  { %v488_v16 = vpop.f32.mrf.mxu1 }
 0x34f   :  { %v540_v19 = vmul.f32 0.25, %v488_v16 }
 0x350   :  { %v6161_v20 = vpop.f32.mrf.mxu1 }
 0x351   :  { %v544_v21 = vsel %vm7413_vm4, %v540_v19, -1e+30 }
 0x352   :  { %v491_v22 = vpop.f32.mrf.mxu1  ;;  %v534_v23 = vpop.f32.mrf.mxu0  ;;  %v547_v24 = vsel %vm546_vm5, %v544_v21, -inf }
 0x353   :  { %v541_v25 = vmul.f32 0.25, %v534_v23  ;;  %548 = vmax.xlane.f32.xlu0 %v547_v24 }
 0x354   :  { %v6162_v26 = vpop.f32.mrf.mxu1  ;;  %v6167_v27 = vpop.f32.mrf.mxu0 }
 0x355   :  { %v545_v31 = vsel %vm7413_vm4, %v541_v25, -1e+30 }
 0x356   :  { %v537_v32 = vpop.f32.mrf.mxu0  ;;  %v550_v33 = vsel %vm546_vm5, %v545_v31, -inf }
 0x357   :  { %551 = vmax.xlane.f32.xlu1 %v550_v33 }
 0x358   :  { %v6168_v35 = vpop.f32.mrf.mxu0 }
 0x368   :  { %721 = vrot.lane.b32.xlu1 %v444_v0, %s7167_s14 }
 0x3dc   :  { %v549_v36 = vpop.xlane.xlu0 %548 }
 0x3dd   :  { %v553_v37 = vsub.f32 %v544_v21, %v549_v36 }
 0x3df   :  { %v555_v38 = vmul.f32 1.442695, %v553_v37 }
 0x3e0   :  { %v552_v39 = vpop.xlane.xlu1 %551 }
 0x3e1   :  { %6799 = vpow2.f32 %v555_v38  ;;  %v554_v42 = vsub.f32 %v545_v31, %v552_v39 }
 0x3e3   :  { %v557_v43 = vmul.f32 1.442695, %v554_v42 }
 0x3e4   :  { %v722_v50 = vpop.permute.xlu1 %721 }
 0x3e5   :  { %6801 = vpow2.f32 %v557_v43  ;;  %v727_v62 = vsel %vm447_vm2, %v722_v50, 0 }
 0x3ee   :  { %v6800_v44 = vpop.eup %6799 }
 0x3ef   :  { %v559_v47 = vsel %vm546_vm5, %v6800_v44, 0.0 }
 0x3f0   :  { %560 = vadd.xlane.f32.xlu0 %v559_v47 }
 0x3f2   :  { %v6802_v48 = vpop.eup %6801 }
 0x3f3   :  { %v562_v49 = vsel %vm546_vm5, %v6802_v48, 0.0 }
 0x3f4   :  { %563 = vadd.xlane.f32.xlu1 %v562_v49 }
 0x405   :  { %666 = vrot.lane.b32.xlu1 %v441_v5, %s7167_s14 }
 0x406   :  { %669 = vrot.lane.b32.xlu0 %v7386_v55, %s7167_s14 }
 0x409   :  { %718 = vrot.lane.b32.xlu1 %v442_v12, %s7167_s14 }
 0x479   :  { %v561_v52 = vpop.xlane.xlu0 %560 }
 0x47a   :  { %6803 = vrcp.f32 %v561_v52 }
 0x47d   :  { %v564_v53 = vpop.xlane.xlu1 %563  ;;  %v670_v57 = vpop.permute.xlu0 %669 }
 0x47e   :  { %6805 = vrcp.f32 %v564_v53  ;;  %v675_v60 = vsel %vm447_vm2, %v670_v57, 0 }
 0x481   :  { %v667_v63 = vpop.permute.xlu1 %666 }
 0x485   :  { %v719_v0 = vpop.permute.xlu1 %718 }
 0x487   :  { %v6804_v54 = vpop.eup %6803 }
 0x488   :  { %v567_v56 = vmul.f32 %v6804_v54, %v6800_v44 }
 0x48a   :  { %v569_v58 = vpack.c.bf16 %v567_v56, %v567_v56 }
 0x48b   :  { %v6806_v59 = vpop.eup %6805 }
 0x48c   :  { %6172 = vmatmul.mubr.msk.bf16.vlgmr.msra.gmra.mxu1 %vm546_vm5, %v569_v58  ;;  %v568_v61 = vmul.f32 %v6806_v59, %v6802_v48  ;;  %v6737_v58 = vld [vmem:[#allocation8 + $0x30] sm:$0xff]   ;;  %v6738_v59 = vld [vmem:[#allocation8 + $0x38] sm:$0xff]  }
 0x48d   :  { %6182 = vmatpush3.bf16.xpose.msra.mxu1 %v675_v60  ;;  %6183 = vmatprep.mubr.msk.bf16.mxu1 %vm7166_vm1, %v7165_v18 }
 0x48e   :  { %v570_v55 = vpack.c.bf16 %v568_v61, %v568_v61  ;;  %6193 = vmatprep.subr.bf16.mxu1 %v7165_v18 }
 0x490   :  { %6178 = vmatmul.mubr.msk.bf16.vlgmr.msra.gmra.mxu0 %vm546_vm5, %v570_v55 }
 0x491   :  { %6188 = vmatpush3.bf16.xpose.msra.mxu0 %v727_v62  ;;  %6189 = vmatprep.mubr.msk.bf16.mxu0 %vm7166_vm1, %v7165_v18 }
 0x492   :  { %6199 = vmatprep.subr.bf16.mxu0 %v7165_v18 }
 0x494   :  { %6184 = vmatmul.mubr.msk.bf16.vlgmr.msra.gmra.mxu1 %vm447_vm2, %v667_v63 }
 0x495   :  { %6195 = vmatprep.mubr.msk.bf16.mxu1 %vm7166_vm1, %v7165_v18 }
 0x498   :  { %6190 = vmatmul.mubr.msk.bf16.vlgmr.msra.gmra.mxu0 %vm447_vm2, %v719_v0 }
 0x499   :  { %6201 = vmatprep.mubr.msk.bf16.mxu0 %vm7166_vm1, %v7165_v18 }
 0x54c   :  { %v7446_v1 = vpop.f32.mrf.mxu1 }
 0x54e   :  { %v6173_v2 = vpop.f32.mrf.mxu1 }
 0x550   :  { %v615_v3 = vpop.f32.mrf.mxu1  ;;  %v7448_v4 = vpop.f32.mrf.mxu0 }
 0x551   :  { %v664_v5 = vpack.c.bf16 %v7448_v4, %v7446_v1 }
 0x552   :  { %v6174_v6 = vpop.f32.mrf.mxu1  ;;  %v6179_v8 = vpop.f32.mrf.mxu0 }
 0x554   :  { %v661_v9 = vpop.f32.mrf.mxu0  ;;  %v711_v10 = vpop.f32.mrf.mxu1 }
 0x555   :  { %v769_v11 = vmul.f32 0.25, %v711_v10  ;;  %v7483_v9 = vsub.s32 3, %v7344_v28 }
 0x556   :  { %v6180_v12 = vpop.f32.mrf.mxu0  ;;  %v6185_v14 = vpop.f32.mrf.mxu1 }
 0x557   :  { %v771_v15 = vsel %vm7413_vm4, %v769_v11, -1e+30  ;;  %v999_v10 = vrot.slane %v7377_v46, %v7483_v9 }
 0x558   :  { %v714_v16 = vpop.f32.mrf.mxu1  ;;  %v763_v19 = vpop.f32.mrf.mxu0  ;;  %v773_v20 = vsel %vm546_vm5, %v771_v15, -inf }
 0x559   :  { %v770_v21 = vmul.f32 0.25, %v763_v19  ;;  %774 = vmax.xlane.f32.xlu0 %v773_v20 }
 0x55a   :  { %v6186_v22 = vpop.f32.mrf.mxu1  ;;  %v6191_v23 = vpop.f32.mrf.mxu0 }
 0x55b   :  { %v772_v24 = vsel %vm7413_vm4, %v770_v21, -1e+30 }
 0x55c   :  { %v766_v25 = vpop.f32.mrf.mxu0  ;;  %v776_v26 = vsel %vm546_vm5, %v772_v24, -inf }
 0x55d   :  { %777 = vmax.xlane.f32.xlu1 %v776_v26 }
 0x55e   :  { %v6192_v27 = vpop.f32.mrf.mxu0 }
 0x56e   :  { %847 = vrot.lane.b32.xlu1 %v7402_v13, %s7167_s14 }
 0x5e2   :  { %v775_v31 = vpop.xlane.xlu0 %774 }
 0x5e3   :  { %v779_v32 = vsub.f32 %v771_v15, %v775_v31 }
 0x5e5   :  { %v781_v33 = vmul.f32 1.442695, %v779_v32 }
 0x5e6   :  { %v778_v35 = vpop.xlane.xlu1 %777 }
 0x5e7   :  { %6807 = vpow2.f32 %v781_v33  ;;  %v780_v36 = vsub.f32 %v772_v24, %v778_v35 }
 0x5e9   :  { %v783_v37 = vmul.f32 1.442695, %v780_v36 }
 0x5ea   :  { %v848_v38 = vpop.permute.xlu1 %847 }
 0x5eb   :  { %6809 = vpow2.f32 %v783_v37  ;;  %v853_v39 = vsel %vm574_vm3, %v848_v38, 0  ;;  %v6740_v37 = vld [vmem:[%s8322_s6] sm:$0xff]  }
 0x5ec   :  { %6200 = vmatpush3.bf16.msra.mxu0 %v853_v39 }
 0x5ed   :  { %6211 = vmatprep.subr.bf16.mxu0 %v7165_v18 }
 0x5f4   :  { %v6808_v42 = vpop.eup %6807 }
 0x5f5   :  { %v785_v43 = vsel %vm546_vm5, %v6808_v42, 0.0 }
 0x5f6   :  { %786 = vadd.xlane.f32.xlu0 %v785_v43 }
 0x5f8   :  { %v6810_v44 = vpop.eup %6809 }
 0x5f9   :  { %v788_v13 = vsel %vm546_vm5, %v6810_v44, 0.0 }
 0x5fa   :  { %789 = vadd.xlane.f32.xlu0 %v788_v13 }
 0x610   :  { %798 = vrot.lane.b32.xlu0 %v7394_v7, %s7167_s14 }
 0x67f   :  { %v787_v47 = vpop.xlane.xlu0 %786 }
 0x680   :  { %6811 = vrcp.f32 %v787_v47  ;;  %v1033_v47 = vrot.slane %v7349_v30, %v7375_v45  ;;  %v6741_v30 = vld [vmem:[%s8322_s6 + $0x18] sm:$0xff]  }
 0x683   :  { %v790_v48 = vpop.xlane.xlu0 %789 }
 0x684   :  { %6813 = vrcp.f32 %v790_v48 }
 0x687   :  { %v799_v49 = vpop.permute.xlu0 %798 }
 0x688   :  { %v804_v50 = vsel %vm574_vm3, %v799_v49, 0  ;;  %v1039_v49 = vrot.slane %v7353_v34, %v7375_v45  ;;  %v6742_v34 = vld [vmem:[%s8322_s6 + $0x10] sm:$0xff]  }
 0x689   :  { %6194 = vmatpush3.bf16.msra.mxu1 %v804_v50 }
 0x68a   :  { %6205 = vmatprep.subr.bf16.mxu1 %v7165_v18 }
 0x68d   :  { %v6812_v52 = vpop.eup %6811 }
 0x68e   :  { %v793_v53 = vmul.f32 %v6812_v52, %v6808_v42 }
 0x690   :  { %v795_v54 = vpack.c.bf16 %v793_v53, %v793_v53 }
 0x691   :  { %v6814_v56 = vpop.eup %6813 }
 0x692   :  { %6196 = vmatmul.mubr.msk.bf16.vlgmr.msra.gmra.mxu1 %vm546_vm5, %v795_v54  ;;  %v794_v57 = vmul.f32 %v6814_v56, %v6810_v44 }
 0x693   :  { %6207 = vmatprep.mubr.msk.bf16.mxu1 %vm7166_vm1, %v7165_v18  ;;  %6206 = vmatpush3.bf16.msra.mxu1 %v6738_v59  ;;  %v1050_v59 = vld [vmem:[#allocation11] sm:$0x3] }
 0x694   :  { %v796_v7 = vpack.c.bf16 %v794_v57, %v794_v57  ;;  %6217 = vmatprep.subr.bf16.mxu1 %v7165_v18 }
 0x696   :  { %6202 = vmatmul.mubr.msk.bf16.vlgmr.msra.gmra.mxu0 %vm546_vm5, %v796_v7 }
 0x697   :  { %6212 = vmatpush3.bf16.msra.mxu0 %v6737_v58  ;;  %6213 = vmatprep.mubr.msk.bf16.mxu0 %vm7166_vm1, %v7165_v18 }
 0x698   :  { %6225 = vmatprep.subr.bf16.mxu0 %v7165_v18 }
 0x69e   :  { %6214 = vmatmul.mubr.msk.bf16.vlgmr.msra.gmra.mxu0 %vm447_vm2, %v664_v5 }
 0x69f   :  { %6229 = vmatprep.mubr.msk.bf16.mxu0 %vm7166_vm1, %v7165_v18  ;;  %6226 = vmatpush3.bf16.msra.mxu0 %v6741_v30  ;;  %v6748_v30 = vld [vmem:[#allocation8 + $0x60] sm:$0xff]  }
 0x6a0   :  { %6227 = vmatprep.subr.bf16.mxu0 %v7165_v18 }
 0x6a3   :  { %6228 = vmatpush3.bf16.msra.mxu0 %v6742_v34  ;;  %v7554_v34 = vld [vmem:[#allocation10 + $0x4] sm:$0xf] }
 0x6a4   :  { %6241 = vmatprep.subr.bf16.mxu0 %v7165_v18 }
 0x752   :  { %v840_v60 = vpop.f32.mrf.mxu1 }
 0x754   :  { %v6197_v61 = vpop.f32.mrf.mxu1 }
 0x756   :  { %v843_v55 = vpop.f32.mrf.mxu1  ;;  %v889_v62 = vpop.f32.mrf.mxu0 }
 0x757   :  { %v895_v63 = vpack.c.bf16 %v889_v62, %v840_v60  ;;  %v1055_v60 = vrot.slane %v1050_v59, %v7347_v29 }
 0x758   :  { %v6198_v0 = vpop.f32.mrf.mxu1  ;;  %v6203_v1 = vpop.f32.mrf.mxu0 }
 0x759   :  { %6208 = vmatmul.mubr.msk.bf16.vlgmr.msra.gmra.mxu1 %vm447_vm2, %v895_v63 }
 0x75a   :  { %v892_v2 = vpop.f32.mrf.mxu0  ;;  %6221 = vmatprep.mubr.msk.bf16.mxu1 %vm7166_vm1, %v7165_v18 }
 0x75c   :  { %v6204_v3 = vpop.f32.mrf.mxu0 }
 0x75e   :  { %v989_v4 = vpop.f32.mrf.mxu0 }
 0x760   :  { %v6215_v5 = vpop.f32.mrf.mxu0 }
 0x761   :  { %v1118_v5 = vrot.slane %v1050_v59, %v7375_v45  ;;  %v1302_v59 = vrot.slane %v7554_v34, %v7375_v45 }
 0x762   :  { %v992_v6 = vpop.f32.mrf.mxu0 }
 0x764   :  { %v6216_v8 = vpop.f32.mrf.mxu0 }
 0x819   :  { %v939_v11 = vpop.f32.mrf.mxu1 }
 0x81a   :  { %v990_v12 = vadd.f32 %v989_v4, %v939_v11 }
 0x81b   :  { %v6209_v14 = vpop.f32.mrf.mxu1 }
 0x81c   :  { %v1000_v15 = vadd.f32 %v999_v10, %v990_v12 }
 0x81d   :  { %v942_v16 = vpop.f32.mrf.mxu1 }
 0x81e   :  { %v993_v19 = vadd.f32 %v992_v6, %v942_v16  ;;  %v1002_v20 = vadd.f32 %v1000_v15, %v7357_v40 }
 0x81f   :  { %v6210_v21 = vpop.f32.mrf.mxu1 }
 0x820   :  { %v1001_v22 = vadd.f32 %v999_v10, %v993_v19  ;;  %v1004_v23 = vsel %vm209_vm0, %v1002_v20, 0.0 }
 0x821   :  { %1005 = vadd.xlane.f32.xlu1 %v1004_v23 }
 0x822   :  { %v1003_v24 = vadd.f32 %v1001_v22, %v7359_v41  ;;  %v6739_v41 = vld [vmem:[%s8322_s6 + $0x8] sm:$0xff]  }
 0x823   :  { %6218 = vmatpush3.bf16.msra.mxu1 %v6739_v41 }
 0x824   :  { %v1007_v28 = vsel %vm209_vm0, %v1003_v24, 0.0  ;;  %6219 = vmatprep.subr.bf16.mxu1 %v7165_v18 }
 0x825   :  { %1008 = vadd.xlane.f32.xlu0 %v1007_v28 }
 0x827   :  { %6220 = vmatpush3.bf16.msra.mxu1 %v6740_v37 }
 0x828   :  { %6233 = vmatprep.subr.bf16.mxu1 %v7165_v18 }
 0x8aa   :  { %v1006_v25 = vpop.xlane.xlu1 %1005 }
 0x8ab   :  { %v1010_v46 = vmul.f32 0.03125, %v1006_v25 }
 0x8ad   :  { %v1012_v26 = vsub.f32 %v1002_v20, %v1010_v46 }
 0x8ae   :  { %v1009_v27 = vpop.xlane.xlu0 %1008 }
 0x8af   :  { %v1011_v31 = vmul.f32 0.03125, %v1009_v27  ;;  %v1014_v32 = vmul.f32 %v1012_v26, %v1012_v26 }
 0x8b1   :  { %v1013_v33 = vsub.f32 %v1003_v24, %v1011_v31  ;;  %v1016_v35 = vsel %vm209_vm0, %v1014_v32, 0.0  ;;  %v6743_v32 = vld [vmem:[#allocation8 + $0x48] sm:$0xff]  }
 0x8b2   :  { %1017 = vadd.xlane.f32.xlu0 %v1016_v35  ;;  %v6745_v35 = vld [vmem:[#allocation8 + $0x40] sm:$0xff]  }
 0x8b3   :  { %v1015_v40 = vmul.f32 %v1013_v33, %v1013_v33 }
 0x8b5   :  { %v1019_v36 = vsel %vm209_vm0, %v1015_v40, 0.0  ;;  %v6746_v40 = vld [vmem:[#allocation8 + $0x50] sm:$0xff]  }
 0x8b6   :  { %1020 = vadd.xlane.f32.xlu1 %v1019_v36 }
 0x93b   :  { %v1018_v38 = vpop.xlane.xlu0 %1017 }
 0x93c   :  { %v1022_v39 = vmul.f32 0.03125, %v1018_v38 }
 0x93e   :  { %v1024_v42 = vadd.f32 1e-05, %v1022_v39 }
 0x93f   :  { %v1021_v43 = vpop.xlane.xlu1 %1020 }
 0x940   :  { %6815 = vrsqrt.f32 %v1024_v42  ;;  %v1023_v44 = vmul.f32 0.03125, %v1021_v43  ;;  %v7529_v43 = vld [vmem:[#allocation5 + $0x2] sm:$0x3] }
 0x942   :  { %v1025_v13 = vadd.f32 1e-05, %v1023_v44 }
 0x944   :  { %6817 = vrsqrt.f32 %v1025_v13 }
 0x94d   :  { %v6816_v48 = vpop.eup %6815 }
 0x94e   :  { %v1028_v50 = vmul.f32 %v6816_v48, %v1012_v26  ;;  %v7533_v48 = vld [vmem:[#allocation7 + $0x2] sm:$0x3] }
 0x950   :  { %v1034_v52 = vmul.f32 %v1033_v47, %v1028_v50 }
 0x951   :  { %v6818_v53 = vpop.eup %6817 }
 0x952   :  { %v1029_v54 = vmul.f32 %v6818_v53, %v1013_v33  ;;  %v1040_v56 = vadd.f32 %v1039_v49, %v1034_v52  ;;  %v6744_v33 = vld [vmem:[#allocation8 + $0x58] sm:$0xff]   ;;  %v1216_v53 = vrot.slane %v7533_v48, %v7347_v29 }
 0x954   :  { %v1035_v57 = vmul.f32 %v1033_v47, %v1029_v54  ;;  %v1210_v47 = vrot.slane %v7529_v43, %v7347_v29 }
 0x956   :  { %v1041_v58 = vadd.f32 %v1039_v49, %v1035_v57 }
 0x958   :  { %v1051_v7 = vpack.c.bf16 %v1041_v58, %v1040_v56 }
 0x95a   :  { %6222 = vmatmul.mubr.msk.bf16.vlgmr.msra.gmra.mxu1 %vm209_vm0, %v1051_v7 }
 0x95b   :  { %6237 = vmatprep.mubr.msk.bf16.mxu1 %vm7166_vm1, %v7165_v18  ;;  %6234 = vmatpush3.bf16.msra.mxu1 %v6743_v32 }
 0x95c   :  { %6235 = vmatprep.subr.bf16.mxu1 %v7165_v18 }
 0x95f   :  { %6236 = vmatpush3.bf16.msra.mxu1 %v6745_v35 }
 0x960   :  { %6249 = vmatprep.subr.bf16.mxu1 %v7165_v18 }
 0xa1a   :  { %v1105_v61 = vpop.f32.mrf.mxu1 }
 0xa1b   :  { %v1106_v62 = vadd.f32 %v1105_v61, %v1055_v60 }
 0xa1c   :  { %v6223_v55 = vpop.f32.mrf.mxu1 }
 0xa1d   :  { %v1112_v2 = vmax.f32 %v1106_v62, 0.0 }
 0xa1e   :  { %v1108_v63 = vpop.f32.mrf.mxu1 }
 0xa1f   :  { %v1109_v0 = vadd.f32 %v1108_v63, %v1055_v60 }
 0xa20   :  { %v6224_v1 = vpop.f32.mrf.mxu1 }
 0xa21   :  { %v1113_v3 = vmax.f32 %v1109_v0, 0.0  ;;  %v1242_v0 = vrot.slane %v7554_v34, %v7347_v29 }
 0xa23   :  { %v1114_v4 = vpack.c.bf16 %v1113_v3, %v1112_v2 }
 0xa25   :  { %6230 = vmatmul.mubr.msk.bf16.vlgmr.msra.gmra.mxu0 %vm209_vm0, %v1114_v4 }
 0xa26   :  { %6245 = vmatprep.mubr.msk.bf16.mxu0 %vm7166_vm1, %v7165_v18  ;;  %6242 = vmatpush3.bf16.msra.mxu0 %v6744_v33 }
 0xa27   :  { %6243 = vmatprep.subr.bf16.mxu0 %v7165_v18 }
 0xa2a   :  { %6244 = vmatpush3.bf16.msra.mxu0 %v6746_v40 }
 0xa2b   :  { %6257 = vmatprep.subr.bf16.mxu0 %v7165_v18 }
 0xae5   :  { %v1168_v6 = vpop.f32.mrf.mxu0 }
 0xae6   :  { %v1169_v8 = vadd.f32 %v1168_v6, %v1118_v5  ;;  %v1359_v6 = vrot.slane %v7554_v34, %v7382_v51 }
 0xae7   :  { %v6231_v10 = vpop.f32.mrf.mxu0 }
 0xae8   :  { %v1175_v11 = vadd.f32 %v1169_v8, %v1040_v56 }
 0xae9   :  { %v1171_v12 = vpop.f32.mrf.mxu0 }
 0xaea   :  { %v1172_v14 = vadd.f32 %v1171_v12, %v1118_v5  ;;  %v1181_v15 = vsel %vm209_vm0, %v1175_v11, 0.0 }
 0xaeb   :  { %1182 = vadd.xlane.f32.xlu0 %v1181_v15  ;;  %v6232_v16 = vpop.f32.mrf.mxu0 }
 0xaec   :  { %v1176_v19 = vadd.f32 %v1172_v14, %v1041_v58  ;;  %v6747_v58 = vld [vmem:[#allocation8 + $0x68] sm:$0xff]  }
 0xaee   :  { %v1184_v20 = vsel %vm209_vm0, %v1176_v19, 0.0 }
 0xaef   :  { %1185 = vadd.xlane.f32.xlu1 %v1184_v20 }
 0xb74   :  { %v1183_v21 = vpop.xlane.xlu0 %1182 }
 0xb75   :  { %v1187_v22 = vmul.f32 0.03125, %v1183_v21 }
 0xb77   :  { %v1189_v23 = vsub.f32 %v1175_v11, %v1187_v22 }
 0xb78   :  { %v1186_v24 = vpop.xlane.xlu1 %1185 }
 0xb79   :  { %v1188_v28 = vmul.f32 0.03125, %v1186_v24  ;;  %v1191_v25 = vmul.f32 %v1189_v23, %v1189_v23 }
 0xb7b   :  { %v1190_v46 = vsub.f32 %v1176_v19, %v1188_v28  ;;  %v1193_v26 = vsel %vm209_vm0, %v1191_v25, 0.0 }
 0xb7c   :  { %1194 = vadd.xlane.f32.xlu0 %v1193_v26 }
 0xb7d   :  { %v1192_v27 = vmul.f32 %v1190_v46, %v1190_v46 }
 0xb7f   :  { %v1196_v31 = vsel %vm209_vm0, %v1192_v27, 0.0 }
 0xb80   :  { %1197 = vadd.xlane.f32.xlu1 %v1196_v31 }
 0xc05   :  { %v1195_v36 = vpop.xlane.xlu0 %1194 }
 0xc06   :  { %v1199_v41 = vmul.f32 0.03125, %v1195_v36 }
 0xc08   :  { %v1201_v37 = vadd.f32 1e-05, %v1199_v41 }
 0xc09   :  { %v1198_v38 = vpop.xlane.xlu1 %1197 }
 0xc0a   :  { %6819 = vrsqrt.f32 %v1201_v37  ;;  %v1200_v39 = vmul.f32 0.03125, %v1198_v38 }
 0xc0c   :  { %v1202_v42 = vadd.f32 1e-05, %v1200_v39 }
 0xc0e   :  { %6821 = vrsqrt.f32 %v1202_v42 }
 0xc17   :  { %v6820_v44 = vpop.eup %6819 }
 0xc18   :  { %v1205_v13 = vmul.f32 %v6820_v44, %v1189_v23 }
 0xc1a   :  { %v1211_v52 = vmul.f32 %v1210_v47, %v1205_v13 }
 0xc1b   :  { %v6822_v49 = vpop.eup %6821 }
 0xc1c   :  { %v1206_v50 = vmul.f32 %v6822_v49, %v1190_v46  ;;  %v7537_v56 = vadd.f32 %v1216_v53, %v1211_v52 }
 0xc1e   :  { %v1212_v54 = vmul.f32 %v1210_v47, %v1206_v50 }
 0xc20   :  { %v7539_v57 = vadd.f32 %v1216_v53, %v1212_v54 }
 0xc22   :  { %v1238_v7 = vpack.c.bf16 %v7539_v57, %v7537_v56 }
 0xc24   :  { %6238 = vmatmul.mubr.msk.bf16.vlgmr.msra.gmra.mxu1 %vm209_vm0, %v1238_v7  ;;  %6246 = vmatmul.mubr.msk.bf16.vlgmr.msra.gmra.mxu0 %vm209_vm0, %v1238_v7 }
 0xc25   :  { %6250 = vmatpush3.bf16.msra.mxu1 %v6747_v58  ;;  %6253 = vmatprep.mubr.msk.bf16.mxu1 %vm7166_vm1, %v7165_v18 }
 0xc26   :  { %6251 = vmatprep.subr.bf16.mxu1 %v7165_v18  ;;  %6259 = vmatprep.mubr.msk.bf16.mxu0 %vm7166_vm1, %v7165_v18 }
 0xc29   :  { %6252 = vmatpush3.bf16.msra.mxu1 %v6748_v30 }
 0xc2a   :  { %6263 = vmatprep.subr.bf16.mxu1 %v7165_v18 }
 0xc2c   :  { %6254 = vmatmul.mubr.msk.bf16.vlgmr.msra.gmra.mxu1 %vm209_vm0, %v1238_v7 }
 0xc2d   :  { %6265 = vmatprep.mubr.msk.bf16.mxu1 %vm7166_vm1, %v7165_v18 }
 0xce4   :  { %v1292_v60 = vpop.f32.mrf.mxu1  ;;  %v1349_v61 = vpop.f32.mrf.mxu0 }
 0xce5   :  { %v1350_v55 = vadd.f32 %v1349_v61, %v1302_v59  ;;  %v1293_v11 = vadd.f32 %v1292_v60, %v1242_v0 }
 0xce6   :  { %v6239_v62 = vpop.f32.mrf.mxu1  ;;  %v6247_v63 = vpop.f32.mrf.mxu0 }
 0xce7   :  { %v7560_v1 = vpack.c.bf16 %v1350_v55, %v1350_v55  ;;  %v1413_v20 = vpack.c.bf16 %v1293_v11, %v1293_v11 }
 0xce8   :  { %v1295_v2 = vpop.f32.mrf.mxu1  ;;  %v1352_v3 = vpop.f32.mrf.mxu0 }
 0xce9   :  { %v1423_v4 = vsel %vm447_vm2, %v7560_v1, 0  ;;  %v1353_v5 = vadd.f32 %v1352_v3, %v1302_v59  ;;  %v1296_v21 = vadd.f32 %v1295_v2, %v1242_v0 }
 0xcea   :  { %v6240_v8 = vpop.f32.mrf.mxu1  ;;  %v6248_v10 = vpop.f32.mrf.mxu0  ;;  %6258 = vmatpush3.bf16.xpose.msra.mxu0 %v1423_v4 }
 0xceb   :  { %v1416_v12 = vpack.c.bf16 %v1353_v5, %v1353_v5  ;;  %6269 = vmatprep.subr.bf16.mxu0 %v7165_v18  ;;  %v1414_v46 = vpack.c.bf16 %v1296_v21, %v1296_v21 }
 0xcec   :  { %v1406_v14 = vpop.f32.mrf.mxu1 }
 0xced   :  { %v1469_v15 = vsel %vm447_vm2, %v1416_v12, 0  ;;  %v1407_v16 = vadd.f32 %v1406_v14, %v1359_v6 }
 0xcee   :  { %v6255_v19 = vpop.f32.mrf.mxu1  ;;  %6264 = vmatpush3.bf16.xpose.msra.mxu1 %v1469_v15 }
 0xcef   :  { %v7568_v22 = vpack.c.bf16 %v1407_v16, %v1407_v16  ;;  %6275 = vmatprep.subr.bf16.mxu1 %v7165_v18 }
 0xcf0   :  { %v1409_v23 = vpop.f32.mrf.mxu1 }
 0xcf1   :  { %v1543_v24 = vsel %vm574_vm3, %v7568_v22, 0  ;;  %v1410_v28 = vadd.f32 %v1409_v23, %v1359_v6  ;;  %6260 = vmatmul.mubr.msk.bf16.vlgmr.msra.gmra.mxu0 %vm447_vm2, %v1413_v20 }
 0xcf2   :  { %v6256_v25 = vpop.f32.mrf.mxu1  ;;  %6270 = vmatpush3.bf16.msra.mxu0 %v1543_v24  ;;  %6271 = vmatprep.mubr.msk.bf16.mxu0 %vm7166_vm1, %v7165_v18 }
 0xcf3   :  { %v7576_v26 = vpack.c.bf16 %v1410_v28, %v1410_v28  ;;  %6281 = vmatprep.subr.bf16.mxu0 %v7165_v18 }
 0xcf5   :  { %v1589_v27 = vsel %vm574_vm3, %v7576_v26, 0  ;;  %6266 = vmatmul.mubr.msk.bf16.vlgmr.msra.gmra.mxu1 %vm447_vm2, %v1414_v46 }
 0xcf6   :  { %6276 = vmatpush3.bf16.msra.mxu1 %v1589_v27  ;;  %6277 = vmatprep.mubr.msk.bf16.mxu1 %vm7166_vm1, %v7165_v18 }
 0xcf7   :  { %6287 = vmatprep.subr.bf16.mxu1 %v7165_v18 }
 0xdb1   :  { %v1459_v31 = vpop.f32.mrf.mxu0 }
 0xdb2   :  { %v1511_v32 = vmul.f32 0.25, %v1459_v31 }
 0xdb3   :  { %v6261_v33 = vpop.f32.mrf.mxu0 }
 0xdb4   :  { %v1513_v35 = vsel %vm7413_vm4, %v1511_v32, -1e+30 }
 0xdb5   :  { %v1462_v40 = vpop.f32.mrf.mxu0  ;;  %v1505_v36 = vpop.f32.mrf.mxu1  ;;  %v1515_v41 = vsel %vm546_vm5, %v1513_v35, -inf }
 0xdb6   :  { %v1512_v37 = vmul.f32 0.25, %v1505_v36  ;;  %1516 = vmax.xlane.f32.xlu0 %v1515_v41 }
 0xdb7   :  { %v6262_v38 = vpop.f32.mrf.mxu0  ;;  %v6267_v39 = vpop.f32.mrf.mxu1 }
 0xdb8   :  { %v1514_v42 = vsel %vm7413_vm4, %v1512_v37, -1e+30 }
 0xdb9   :  { %v1508_v44 = vpop.f32.mrf.mxu1  ;;  %v1518_v13 = vsel %vm546_vm5, %v1514_v42, -inf }
 0xdba   :  { %1519 = vmax.xlane.f32.xlu1 %v1518_v13 }
 0xdbb   :  { %v6268_v47 = vpop.f32.mrf.mxu1 }
 0xdcb   :  { %1688 = vrot.lane.b32.xlu1 %v1416_v12, %s7167_s14 }
 0xe3f   :  { %v1517_v49 = vpop.xlane.xlu0 %1516 }
 0xe40   :  { %v1521_v50 = vsub.f32 %v1513_v35, %v1517_v49 }
 0xe42   :  { %v1523_v52 = vmul.f32 1.442695, %v1521_v50 }
 0xe43   :  { %v1520_v53 = vpop.xlane.xlu1 %1519 }
 0xe44   :  { %6823 = vpow2.f32 %v1523_v52  ;;  %v1522_v54 = vsub.f32 %v1514_v42, %v1520_v53 }
 0xe46   :  { %v1525_v58 = vmul.f32 1.442695, %v1522_v54 }
 0xe47   :  { %v1689_v61 = vpop.permute.xlu1 %1688 }
 0xe48   :  { %6825 = vpow2.f32 %v1525_v58  ;;  %v1694_v8 = vsel %vm447_vm2, %v1689_v61, 0 }
 0xe51   :  { %v6824_v7 = vpop.eup %6823 }
 0xe52   :  { %v1527_v30 = vsel %vm546_vm5, %v6824_v7, 0.0 }
 0xe53   :  { %1528 = vadd.xlane.f32.xlu0 %v1527_v30 }
 0xe55   :  { %v6826_v59 = vpop.eup %6825 }
 0xe56   :  { %v1530_v60 = vsel %vm546_vm5, %v6826_v59, 0.0 }
 0xe57   :  { %1531 = vadd.xlane.f32.xlu1 %v1530_v60 }
 0xe68   :  { %1633 = vrot.lane.b32.xlu1 %v1413_v20, %s7167_s14 }
 0xe69   :  { %1636 = vrot.lane.b32.xlu0 %v7560_v1, %s7167_s14 }
 0xe6c   :  { %1685 = vrot.lane.b32.xlu1 %v1414_v46, %s7167_s14 }
 0xedc   :  { %v1529_v55 = vpop.xlane.xlu0 %1528 }
 0xedd   :  { %6827 = vrcp.f32 %v1529_v55 }
 0xee0   :  { %v1532_v62 = vpop.xlane.xlu1 %1531  ;;  %v1637_v2 = vpop.permute.xlu0 %1636 }
 0xee1   :  { %6829 = vrcp.f32 %v1532_v62  ;;  %v1642_v5 = vsel %vm447_vm2, %v1637_v2, 0 }
 0xee4   :  { %v1634_v10 = vpop.permute.xlu1 %1633 }
 0xee8   :  { %v1686_v11 = vpop.permute.xlu1 %1685 }
 0xeea   :  { %v6828_v63 = vpop.eup %6827 }
 0xeeb   :  { %v1535_v0 = vmul.f32 %v6828_v63, %v6824_v7 }
 0xeed   :  { %v1537_v3 = vpack.c.bf16 %v1535_v0, %v1535_v0 }
 0xeee   :  { %v6830_v4 = vpop.eup %6829 }
 0xeef   :  { %6272 = vmatmul.mubr.msk.bf16.vlgmr.msra.gmra.mxu0 %vm546_vm5, %v1537_v3  ;;  %v1536_v6 = vmul.f32 %v6830_v4, %v6826_v59  ;;  %v6749_v3 = vld [vmem:[#allocation8 + $0x70] sm:$0xff]   ;;  %v6750_v4 = vld [vmem:[#allocation8 + $0x78] sm:$0xff]  }
 0xef0   :  { %6282 = vmatpush3.bf16.xpose.msra.mxu0 %v1642_v5  ;;  %6283 = vmatprep.mubr.msk.bf16.mxu0 %vm7166_vm1, %v7165_v18 }
 0xef1   :  { %v1538_v1 = vpack.c.bf16 %v1536_v6, %v1536_v6  ;;  %6293 = vmatprep.subr.bf16.mxu0 %v7165_v18 }
 0xef3   :  { %6278 = vmatmul.mubr.msk.bf16.vlgmr.msra.gmra.mxu1 %vm546_vm5, %v1538_v1 }
 0xef4   :  { %6288 = vmatpush3.bf16.xpose.msra.mxu1 %v1694_v8  ;;  %6289 = vmatprep.mubr.msk.bf16.mxu1 %vm7166_vm1, %v7165_v18 }
 0xef5   :  { %6299 = vmatprep.subr.bf16.mxu1 %v7165_v18 }
 0xef7   :  { %6284 = vmatmul.mubr.msk.bf16.vlgmr.msra.gmra.mxu0 %vm447_vm2, %v1634_v10 }
 0xef8   :  { %6295 = vmatprep.mubr.msk.bf16.mxu0 %vm7166_vm1, %v7165_v18 }
 0xefb   :  { %6290 = vmatmul.mubr.msk.bf16.vlgmr.msra.gmra.mxu1 %vm447_vm2, %v1686_v11 }
 0xefc   :  { %6301 = vmatprep.mubr.msk.bf16.mxu1 %vm7166_vm1, %v7165_v18 }
 0xfaf   :  { %v7614_v12 = vpop.f32.mrf.mxu0 }
 0xfb1   :  { %v6273_v14 = vpop.f32.mrf.mxu0 }
 0xfb3   :  { %v1582_v15 = vpop.f32.mrf.mxu0  ;;  %v7616_v16 = vpop.f32.mrf.mxu1 }
 0xfb4   :  { %v1631_v19 = vpack.c.bf16 %v7616_v16, %v7614_v12 }
 0xfb5   :  { %v6274_v20 = vpop.f32.mrf.mxu0  ;;  %v6279_v21 = vpop.f32.mrf.mxu1 }
 0xfb7   :  { %v1628_v23 = vpop.f32.mrf.mxu1  ;;  %v1678_v24 = vpop.f32.mrf.mxu0 }
 0xfb8   :  { %v1736_v28 = vmul.f32 0.25, %v1678_v24  ;;  %v1966_v23 = vrot.slane %v7554_v34, %v7483_v9 }
 0xfb9   :  { %v6280_v25 = vpop.f32.mrf.mxu1  ;;  %v6285_v46 = vpop.f32.mrf.mxu0 }
 0xfba   :  { %v1738_v27 = vsel %vm7413_vm4, %v1736_v28, -1e+30 }
 0xfbb   :  { %v1681_v31 = vpop.f32.mrf.mxu0  ;;  %v1730_v32 = vpop.f32.mrf.mxu1  ;;  %v1740_v33 = vsel %vm546_vm5, %v1738_v27, -inf }
 0xfbc   :  { %v1737_v35 = vmul.f32 0.25, %v1730_v32  ;;  %1741 = vmax.xlane.f32.xlu0 %v1740_v33 }
 0xfbd   :  { %v6286_v40 = vpop.f32.mrf.mxu0  ;;  %v6291_v36 = vpop.f32.mrf.mxu1 }
 0xfbe   :  { %v1739_v41 = vsel %vm7413_vm4, %v1737_v35, -1e+30 }
 0xfbf   :  { %v1733_v37 = vpop.f32.mrf.mxu1  ;;  %v1743_v38 = vsel %vm546_vm5, %v1739_v41, -inf }
 0xfc0   :  { %1744 = vmax.xlane.f32.xlu1 %v1743_v38  ;;  %v5926_v38 = vld [vmem:[#allocation3] sm:$0xff]  }
 0xfc1   :  { %v6292_v39 = vpop.f32.mrf.mxu1 }
 0xfd1   :  { %1814 = vrot.lane.b32.xlu1 %v7576_v26, %s7167_s14 }
0x1045   :  { %v1742_v42 = vpop.xlane.xlu0 %1741 }
0x1046   :  { %v1746_v44 = vsub.f32 %v1738_v27, %v1742_v42 }
0x1048   :  { %v1748_v13 = vmul.f32 1.442695, %v1746_v44 }
0x1049   :  { %v1745_v47 = vpop.xlane.xlu1 %1744 }
0x104a   :  { %6831 = vpow2.f32 %v1748_v13  ;;  %v1747_v49 = vsub.f32 %v1739_v41, %v1745_v47  ;;  %v5927_v47 = vunpack.c.l.bf16 %v5926_v38 }
0x104c   :  { %v1750_v50 = vmul.f32 1.442695, %v1747_v49 }
0x104d   :  { %v1815_v52 = vpop.permute.xlu1 %1814 }
0x104e   :  { %6833 = vpow2.f32 %v1750_v50  ;;  %v1820_v53 = vsel %vm574_vm3, %v1815_v52, 0  ;;  %v2152_v50 = vsel %vm209_vm0, %v5927_v47, 0.0 }
0x104f   :  { %6300 = vmatpush3.bf16.msra.mxu1 %v1820_v53  ;;  %v5928_v53 = vunpack.c.h.bf16 %v5926_v38 }
0x1050   :  { %6311 = vmatprep.subr.bf16.mxu1 %v7165_v18 }
0x1057   :  { %v6832_v54 = vpop.eup %6831 }
0x1058   :  { %v1752_v58 = vsel %vm546_vm5, %v6832_v54, 0.0 }
0x1059   :  { %1753 = vadd.xlane.f32.xlu0 %v1752_v58  ;;  %v6751_v58 = vld [vmem:[%s8322_s6 + $0x28] sm:$0xff]  }
0x105b   :  { %v6834_v7 = vpop.eup %6833 }
0x105c   :  { %v1755_v26 = vsel %vm546_vm5, %v6834_v7, 0.0 }
0x105d   :  { %1756 = vadd.xlane.f32.xlu0 %v1755_v26 }
0x1073   :  { %1765 = vrot.lane.b32.xlu0 %v7568_v22, %s7167_s14 }
0x10e2   :  { %v1754_v30 = vpop.xlane.xlu0 %1753 }
0x10e3   :  { %6835 = vrcp.f32 %v1754_v30 }
0x10e6   :  { %v1757_v59 = vpop.xlane.xlu0 %1756 }
0x10e7   :  { %6837 = vrcp.f32 %v1757_v59 }
0x10ea   :  { %v1766_v60 = vpop.permute.xlu0 %1765 }
0x10eb   :  { %v1771_v61 = vsel %vm574_vm3, %v1766_v60, 0 }
0x10ec   :  { %6294 = vmatpush3.bf16.msra.mxu0 %v1771_v61 }
0x10ed   :  { %6305 = vmatprep.subr.bf16.mxu0 %v7165_v18 }
0x10f0   :  { %v6836_v55 = vpop.eup %6835 }
0x10f1   :  { %v1760_v62 = vmul.f32 %v6836_v55, %v6832_v54  ;;  %v2155_v54 = vsel %vm209_vm0, %v5928_v53, 0.0 }
0x10f3   :  { %v1762_v63 = vpack.c.bf16 %v1760_v62, %v1760_v62 }
0x10f4   :  { %v6838_v0 = vpop.eup %6837 }
0x10f5   :  { %6296 = vmatmul.mubr.msk.bf16.vlgmr.msra.gmra.mxu0 %vm546_vm5, %v1762_v63  ;;  %v1761_v2 = vmul.f32 %v6838_v0, %v6834_v7  ;;  %v6752_v7 = vld [vmem:[%s8322_s6 + $0x20] sm:$0xff]  }
0x10f6   :  { %6307 = vmatprep.mubr.msk.bf16.mxu0 %vm7166_vm1, %v7165_v18  ;;  %6306 = vmatpush3.bf16.msra.mxu0 %v6750_v4 }
0x10f7   :  { %v1763_v22 = vpack.c.bf16 %v1761_v2, %v1761_v2  ;;  %6317 = vmatprep.subr.bf16.mxu0 %v7165_v18 }
0x10f9   :  { %6302 = vmatmul.mubr.msk.bf16.vlgmr.msra.gmra.mxu1 %vm546_vm5, %v1763_v22 }
0x10fa   :  { %6312 = vmatpush3.bf16.msra.mxu1 %v6749_v3  ;;  %6313 = vmatprep.mubr.msk.bf16.mxu1 %vm7166_vm1, %v7165_v18 }
0x10fb   :  { %6325 = vmatprep.subr.bf16.mxu1 %v7165_v18 }
0x1101   :  { %6314 = vmatmul.mubr.msk.bf16.vlgmr.msra.gmra.mxu1 %vm447_vm2, %v1631_v19 }
0x1102   :  { %6329 = vmatprep.mubr.msk.bf16.mxu1 %vm7166_vm1, %v7165_v18 }
0x11b5   :  { %v1807_v5 = vpop.f32.mrf.mxu0 }
0x11b7   :  { %v6297_v6 = vpop.f32.mrf.mxu0 }
0x11b9   :  { %v1810_v1 = vpop.f32.mrf.mxu0  ;;  %v1856_v8 = vpop.f32.mrf.mxu1 }
0x11ba   :  { %v1862_v10 = vpack.c.bf16 %v1856_v8, %v1807_v5 }
0x11bb   :  { %v6298_v11 = vpop.f32.mrf.mxu0  ;;  %v6303_v12 = vpop.f32.mrf.mxu1 }
0x11bc   :  { %6308 = vmatmul.mubr.msk.bf16.vlgmr.msra.gmra.mxu0 %vm447_vm2, %v1862_v10  ;;  %v2000_v11 = vrot.slane %v7529_v43, %v7375_v45  ;;  %v6753_v43 = vld [vmem:[#allocation13 + $0x8] sm:$0xff]  }
0x11bd   :  { %v1859_v14 = vpop.f32.mrf.mxu1  ;;  %6321 = vmatprep.mubr.msk.bf16.mxu0 %vm7166_vm1, %v7165_v18  ;;  %6318 = vmatpush3.bf16.msra.mxu0 %v6751_v58 }
0x11be   :  { %6319 = vmatprep.subr.bf16.mxu0 %v7165_v18 }
0x11bf   :  { %v6304_v15 = vpop.f32.mrf.mxu1 }
0x11c1   :  { %v1956_v16 = vpop.f32.mrf.mxu1  ;;  %6320 = vmatpush3.bf16.msra.mxu0 %v6752_v7 }
0x11c2   :  { %6333 = vmatprep.subr.bf16.mxu0 %v7165_v18 }
0x11c3   :  { %v6315_v19 = vpop.f32.mrf.mxu1 }
0x11c5   :  { %v1959_v20 = vpop.f32.mrf.mxu1 }
0x11c7   :  { %v6316_v21 = vpop.f32.mrf.mxu1 }
0x127c   :  { %v1906_v24 = vpop.f32.mrf.mxu0 }
0x127d   :  { %v1957_v28 = vadd.f32 %v1956_v16, %v1906_v24  ;;  %v2006_v16 = vrot.slane %v7533_v48, %v7375_v45  ;;  %v6754_v24 = vld [vmem:[#allocation13] sm:$0xff]  }
0x127e   :  { %v6309_v25 = vpop.f32.mrf.mxu0  ;;  %v6757_v48 = vld [vmem:[%s8322_s6 + $0x38] sm:$0xff]  }
0x127f   :  { %v1967_v46 = vadd.f32 %v1966_v23, %v1957_v28  ;;  %6326 = vmatpush3.bf16.msra.mxu1 %v6757_v48  ;;  %v6758_v28 = vld [vmem:[%s8322_s6 + $0x30] sm:$0xff]  }
0x1280   :  { %v1909_v27 = vpop.f32.mrf.mxu0  ;;  %6327 = vmatprep.subr.bf16.mxu1 %v7165_v18 }
0x1281   :  { %v1960_v31 = vadd.f32 %v1959_v20, %v1909_v27  ;;  %v1969_v32 = vadd.f32 %v1967_v46, %v7537_v56 }
0x1282   :  { %v6310_v33 = vpop.f32.mrf.mxu0 }
0x1283   :  { %v1968_v35 = vadd.f32 %v1966_v23, %v1960_v31  ;;  %v1971_v40 = vsel %vm209_vm0, %v1969_v32, 0.0  ;;  %6328 = vmatpush3.bf16.msra.mxu1 %v6758_v28 }
0x1284   :  { %1972 = vadd.xlane.f32.xlu1 %v1971_v40  ;;  %6341 = vmatprep.subr.bf16.mxu1 %v7165_v18 }
0x1285   :  { %v1970_v36 = vadd.f32 %v1968_v35, %v7539_v57  ;;  %v7696_v35 = vld [vmem:[%s8324_s8] sm:$0x7] }
0x1287   :  { %v1974_v41 = vsel %vm209_vm0, %v1970_v36, 0.0 }
0x1288   :  { %1975 = vadd.xlane.f32.xlu0 %v1974_v41  ;;  %v2181_v41 = vrot.slane %v7696_v35, %v7347_v29 }
0x130d   :  { %v1973_v37 = vpop.xlane.xlu1 %1972 }
0x130e   :  { %v1977_v34 = vmul.f32 0.03125, %v1973_v37  ;;  %v7703_v37 = vld [vmem:[%s8325_s9] sm:$0x7] }
0x1310   :  { %v1979_v39 = vsub.f32 %v1969_v32, %v1977_v34 }
0x1311   :  { %v1976_v42 = vpop.xlane.xlu0 %1975 }
0x1312   :  { %v1978_v44 = vmul.f32 0.03125, %v1976_v42  ;;  %v1981_v13 = vmul.f32 %v1979_v39, %v1979_v39  ;;  %v2187_v42 = vrot.slane %v7703_v37, %v7347_v29 }
0x1314   :  { %v1980_v49 = vsub.f32 %v1970_v36, %v1978_v44  ;;  %v1983_v56 = vsel %vm209_vm0, %v1981_v13, 0.0 }
0x1315   :  { %1984 = vadd.xlane.f32.xlu0 %v1983_v56 }
0x1316   :  { %v1982_v52 = vmul.f32 %v1980_v49, %v1980_v49 }
0x1318   :  { %v1986_v57 = vsel %vm209_vm0, %v1982_v52, 0.0  ;;  %v2019_v52 = vld [vmem:[#allocation11 + $0x2] sm:$0x3] }
0x1319   :  { %2153 = vadd.xlane.f32.xlu0 %v2152_v50  ;;  %1987 = vadd.xlane.f32.xlu1 %v1986_v57  ;;  %v6756_v50 = vld [vmem:[#allocation13 + $0x20] sm:$0xff]  }
0x131d   :  { %2156 = vadd.xlane.f32.xlu1 %v2155_v54 }
0x139e   :  { %v1985_v26 = vpop.xlane.xlu0 %1984 }
0x139f   :  { %v1989_v30 = vmul.f32 0.03125, %v1985_v26 }
0x13a1   :  { %v1991_v59 = vadd.f32 1e-05, %v1989_v30 }
0x13a2   :  { %v1988_v60 = vpop.xlane.xlu1 %1987  ;;  %v2154_v61 = vpop.xlane.xlu0 %2153 }
0x13a3   :  { %6839 = vrsqrt.f32 %v1991_v59  ;;  %v1990_v55 = vmul.f32 0.03125, %v1988_v60  ;;  %v2158_v62 = vmul.f32 0.03125, %v2154_v61  ;;  %v6759_v61 = vld [vmem:[#allocation13 + $0x18] sm:$0xff]  }
0x13a5   :  { %v1992_v63 = vadd.f32 1e-05, %v1990_v55  ;;  %v2160_v0 = vsub.f32 %v5927_v47, %v2158_v62  ;;  %v6760_v62 = vld [vmem:[#allocation13 + $0x10] sm:$0xff]  }
0x13a6   :  { %v2157_v2 = vpop.xlane.xlu1 %2156 }
0x13a7   :  { %6841 = vrsqrt.f32 %v1992_v63  ;;  %v2159_v3 = vmul.f32 0.03125, %v2157_v2  ;;  %v2162_v22 = vmul.f32 %v2160_v0, %v2160_v0 }
0x13a9   :  { %v2161_v4 = vsub.f32 %v5928_v53, %v2159_v3  ;;  %v2164_v5 = vsel %vm209_vm0, %v2162_v22, 0.0  ;;  %v2024_v53 = vrot.slane %v2019_v52, %v7347_v29 }
0x13aa   :  { %2165 = vadd.xlane.f32.xlu0 %v2164_v5 }
0x13ab   :  { %v2163_v6 = vmul.f32 %v2161_v4, %v2161_v4 }
0x13ad   :  { %v2167_v1 = vsel %vm209_vm0, %v2163_v6, 0.0 }
0x13ae   :  { %2168 = vadd.xlane.f32.xlu1 %v2167_v1 }
0x13b0   :  { %v6840_v8 = vpop.eup %6839 }
0x13b1   :  { %v1995_v10 = vmul.f32 %v6840_v8, %v1979_v39 }
0x13b3   :  { %v2001_v15 = vmul.f32 %v2000_v11, %v1995_v10  ;;  %v7733_v10 = vrot.slane %v2019_v52, %v7375_v45 }
0x13b4   :  { %v6842_v12 = vpop.eup %6841 }
0x13b5   :  { %v1996_v14 = vmul.f32 %v6842_v12, %v1980_v49  ;;  %v7674_v20 = vadd.f32 %v2006_v16, %v2001_v15  ;;  %v6755_v49 = vld [vmem:[#allocation13 + $0x28] sm:$0xff]  }
0x13b7   :  { %v2002_v19 = vmul.f32 %v2000_v11, %v1996_v14  ;;  %v7738_v11 = vld [vmem:[%s8327_s11] sm:$0xf] }
0x13b8   :  { %v2271_v15 = vrot.slane %v7738_v11, %v7375_v45  ;;  %v2211_v48 = vrot.slane %v7738_v11, %v7347_v29 }
0x13b9   :  { %v7676_v21 = vadd.f32 %v2006_v16, %v2002_v19 }
0x13bb   :  { %v2020_v23 = vpack.c.bf16 %v7676_v21, %v7674_v20 }
0x13bd   :  { %6322 = vmatmul.mubr.msk.bf16.vlgmr.msra.gmra.mxu0 %vm209_vm0, %v2020_v23  ;;  %v2328_v23 = vrot.slane %v7738_v11, %v7382_v51 }
0x13be   :  { %6337 = vmatprep.mubr.msk.bf16.mxu0 %vm7166_vm1, %v7165_v18  ;;  %6334 = vmatpush3.bf16.msra.mxu0 %v6753_v43 }
0x13bf   :  { %6335 = vmatprep.subr.bf16.mxu0 %v7165_v18 }
0x13c2   :  { %6336 = vmatpush3.bf16.msra.mxu0 %v6754_v24 }
0x13c3   :  { %6349 = vmatprep.subr.bf16.mxu0 %v7165_v18 }
0x1433   :  { %v2166_v25 = vpop.xlane.xlu0 %2165 }
0x1434   :  { %v2170_v46 = vmul.f32 0.03125, %v2166_v25 }
0x1436   :  { %v2172_v27 = vadd.f32 1e-05, %v2170_v46 }
0x1437   :  { %v2169_v31 = vpop.xlane.xlu1 %2168 }
0x1438   :  { %6843 = vrsqrt.f32 %v2172_v27  ;;  %v2171_v32 = vmul.f32 0.03125, %v2169_v31 }
0x143a   :  { %v2173_v33 = vadd.f32 1e-05, %v2171_v32 }
0x143c   :  { %6845 = vrsqrt.f32 %v2173_v33 }
0x1445   :  { %v6844_v40 = vpop.eup %6843 }
0x1446   :  { %v2176_v36 = vmul.f32 %v6844_v40, %v2160_v0 }
0x1448   :  { %v2182_v39 = vmul.f32 %v2181_v41, %v2176_v36 }
0x1449   :  { %v6846_v34 = vpop.eup %6845 }
0x144a   :  { %v2177_v38 = vmul.f32 %v6846_v34, %v2161_v4  ;;  %v7707_v13 = vadd.f32 %v2187_v42, %v2182_v39 }
0x144c   :  { %v2183_v44 = vmul.f32 %v2181_v41, %v2177_v38 }
0x144e   :  { %v7709_v47 = vadd.f32 %v2187_v42, %v2183_v44 }
0x1450   :  { %v2207_v56 = vpack.c.bf16 %v7709_v47, %v7707_v13 }
0x1452   :  { %6338 = vmatmul.mubr.msk.bf16.vlgmr.msra.gmra.mxu0 %vm209_vm0, %v2207_v56 }
0x1453   :  { %6350 = vmatpush3.bf16.msra.mxu0 %v6755_v49  ;;  %6353 = vmatprep.mubr.msk.bf16.mxu0 %vm7166_vm1, %v7165_v18 }
0x1454   :  { %6351 = vmatprep.subr.bf16.mxu0 %v7165_v18 }
0x1457   :  { %6352 = vmatpush3.bf16.msra.mxu0 %v6756_v50 }
0x1458   :  { %6363 = vmatprep.subr.bf16.mxu0 %v7165_v18 }
0x145a   :  { %6354 = vmatmul.mubr.msk.bf16.vlgmr.msra.gmra.mxu0 %vm209_vm0, %v2207_v56 }
0x145b   :  { %6365 = vmatprep.mubr.msk.bf16.mxu0 %vm7166_vm1, %v7165_v18 }
0x147d   :  { %v2074_v57 = vpop.f32.mrf.mxu0 }
0x147e   :  { %v2075_v58 = vadd.f32 %v2074_v57, %v2024_v53 }
0x147f   :  { %v6323_v54 = vpop.f32.mrf.mxu0 }
0x1480   :  { %v2081_v59 = vmax.f32 %v2075_v58, 0.0 }
0x1481   :  { %v2077_v7 = vpop.f32.mrf.mxu0 }
0x1482   :  { %v2078_v26 = vadd.f32 %v2077_v7, %v2024_v53 }
0x1483   :  { %v6324_v30 = vpop.f32.mrf.mxu0 }
0x1484   :  { %v2082_v60 = vmax.f32 %v2078_v26, 0.0 }
0x1486   :  { %v2083_v55 = vpack.c.bf16 %v2082_v60, %v2081_v59 }
0x1488   :  { %6330 = vmatmul.mubr.msk.bf16.vlgmr.msra.gmra.mxu1 %vm209_vm0, %v2083_v55 }
0x1489   :  { %6342 = vmatpush3.bf16.msra.mxu1 %v6759_v61  ;;  %6345 = vmatprep.mubr.msk.bf16.mxu1 %vm7166_vm1, %v7165_v18 }
0x148a   :  { %6343 = vmatprep.subr.bf16.mxu1 %v7165_v18 }
0x148d   :  { %6344 = vmatpush3.bf16.msra.mxu1 %v6760_v62 }
0x148e   :  { %6357 = vmatprep.subr.bf16.mxu1 %v7165_v18 }
0x1490   :  { %6346 = vmatmul.mubr.msk.bf16.vlgmr.msra.gmra.mxu1 %vm209_vm0, %v2207_v56 }
0x1491   :  { %6359 = vmatprep.mubr.msk.bf16.mxu1 %vm7166_vm1, %v7165_v18 }
0x1512   :  { %v2261_v63 = vpop.f32.mrf.mxu0 }
0x1513   :  { %v2262_v33 = vadd.f32 %v2261_v63, %v2211_v48 }
0x1514   :  { %v6339_v0 = vpop.f32.mrf.mxu0 }
0x1515   :  { %v2382_v38 = vpack.c.bf16 %v2262_v33, %v2262_v33 }
0x1516   :  { %v2264_v2 = vpop.f32.mrf.mxu0 }
0x1517   :  { %v2265_v39 = vadd.f32 %v2264_v2, %v2211_v48 }
0x1518   :  { %v6340_v3 = vpop.f32.mrf.mxu0 }
0x1519   :  { %v2383_v49 = vpack.c.bf16 %v2265_v39, %v2265_v39 }
0x151a   :  { %v2375_v22 = vpop.f32.mrf.mxu0 }
0x151b   :  { %v2376_v46 = vadd.f32 %v2375_v22, %v2328_v23 }
0x151c   :  { %v6355_v4 = vpop.f32.mrf.mxu0 }
0x151d   :  { %v7751_v36 = vpack.c.bf16 %v2376_v46, %v2376_v46 }
0x151e   :  { %v2378_v5 = vpop.f32.mrf.mxu0 }
0x151f   :  { %v2379_v41 = vadd.f32 %v2378_v5, %v2328_v23  ;;  %v2512_v42 = vsel %vm574_vm3, %v7751_v36, 0 }
0x1520   :  { %v6356_v6 = vpop.f32.mrf.mxu0 }
0x1521   :  { %v7757_v44 = vpack.c.bf16 %v2379_v41, %v2379_v41 }
0x1523   :  { %v2558_v56 = vsel %vm574_vm3, %v7757_v44, 0 }
0x1548   :  { %v7730_v1 = vpop.f32.mrf.mxu1 }
0x154a   :  { %v6331_v8 = vpop.f32.mrf.mxu1 }
0x154c   :  { %v2140_v12 = vpop.f32.mrf.mxu1 }
0x154d   :  { %v7741_v14 = vadd.f32 %v2140_v12, %v7733_v10 }
0x154e   :  { %v6332_v16 = vpop.f32.mrf.mxu1 }
0x1550   :  { %v2318_v19 = vpop.f32.mrf.mxu1 }
0x1551   :  { %v2319_v43 = vadd.f32 %v2318_v19, %v2271_v15 }
0x1552   :  { %v6347_v24 = vpop.f32.mrf.mxu1 }
0x1553   :  { %v2384_v28 = vpack.c.bf16 %v2319_v43, %v2319_v43 }
0x1554   :  { %v2321_v25 = vpop.f32.mrf.mxu1 }
0x1555   :  { %v2392_v27 = vsel %vm447_vm2, %v2384_v28, 0  ;;  %v2322_v31 = vadd.f32 %v2321_v25, %v2271_v15 }
0x1556   :  { %v6348_v32 = vpop.f32.mrf.mxu1  ;;  %6358 = vmatpush3.bf16.xpose.msra.mxu1 %v2392_v27 }
0x1557   :  { %v2385_v40 = vpack.c.bf16 %v2322_v31, %v2322_v31  ;;  %6369 = vmatprep.subr.bf16.mxu1 %v7165_v18 }
0x1559   :  { %v2438_v34 = vsel %vm447_vm2, %v2385_v40, 0 }
0x155a   :  { %6364 = vmatpush3.bf16.xpose.msra.mxu0 %v2438_v34 }
0x155b   :  { %6375 = vmatprep.subr.bf16.mxu0 %v7165_v18 }
0x155d   :  { %6360 = vmatmul.mubr.msk.bf16.vlgmr.msra.gmra.mxu1 %vm447_vm2, %v2382_v38 }
0x155e   :  { %6370 = vmatpush3.bf16.msra.mxu1 %v2512_v42  ;;  %6371 = vmatprep.mubr.msk.bf16.mxu1 %vm7166_vm1, %v7165_v18 }
0x155f   :  { %6381 = vmatprep.subr.bf16.mxu1 %v7165_v18 }
0x1561   :  { %6366 = vmatmul.mubr.msk.bf16.vlgmr.msra.gmra.mxu0 %vm447_vm2, %v2383_v49 }
0x1562   :  { %6376 = vmatpush3.bf16.msra.mxu0 %v2558_v56  ;;  %6377 = vmatprep.mubr.msk.bf16.mxu0 %vm7166_vm1, %v7165_v18 }
0x1563   :  { %6387 = vmatprep.subr.bf16.mxu0 %v7165_v18 }
0x161d   :  { %v2428_v50 = vpop.f32.mrf.mxu1 }
0x161e   :  { %v2480_v52 = vmul.f32 0.25, %v2428_v50 }
0x161f   :  { %v6361_v53 = vpop.f32.mrf.mxu1 }
0x1620   :  { %v2482_v57 = vsel %vm7413_vm4, %v2480_v52, -1e+30 }
0x1621   :  { %v2431_v54 = vpop.f32.mrf.mxu1  ;;  %v2474_v58 = vpop.f32.mrf.mxu0  ;;  %v2484_v7 = vsel %vm546_vm5, %v2482_v57, -inf }
0x1622   :  { %v2481_v26 = vmul.f32 0.25, %v2474_v58  ;;  %2485 = vmax.xlane.f32.xlu0 %v2484_v7 }
0x1623   :  { %v6362_v30 = vpop.f32.mrf.mxu1  ;;  %v6367_v59 = vpop.f32.mrf.mxu0 }
0x1624   :  { %v2483_v60 = vsel %vm7413_vm4, %v2481_v26, -1e+30 }
0x1625   :  { %v2477_v61 = vpop.f32.mrf.mxu0  ;;  %v2487_v55 = vsel %vm546_vm5, %v2483_v60, -inf }
0x1626   :  { %2488 = vmax.xlane.f32.xlu1 %v2487_v55 }
0x1627   :  { %v6368_v62 = vpop.f32.mrf.mxu0 }
0x1637   :  { %2657 = vrot.lane.b32.xlu1 %v2385_v40, %s7167_s14 }
0x16ab   :  { %v2486_v63 = vpop.xlane.xlu0 %2485 }
0x16ac   :  { %v2490_v0 = vsub.f32 %v2482_v57, %v2486_v63 }
0x16ae   :  { %v2492_v2 = vmul.f32 1.442695, %v2490_v0  ;;  %v2138_v0 = vadd.f32 %v7730_v1, %v7733_v10 }
0x16af   :  { %v2489_v3 = vpop.xlane.xlu1 %2488 }
0x16b0   :  { %6847 = vpow2.f32 %v2492_v2  ;;  %v2491_v22 = vsub.f32 %v2483_v60, %v2489_v3  ;;  %v2144_v2 = vadd.f32 %v2138_v0, %v7674_v20 }
0x16b2   :  { %v2494_v4 = vmul.f32 1.442695, %v2491_v22  ;;  %v2940_v3 = vsel %vm209_vm0, %v2144_v2, 0.0 }
0x16b3   :  { %v2658_v15 = vpop.permute.xlu1 %2657 }
0x16b4   :  { %6849 = vpow2.f32 %v2494_v4  ;;  %v2663_v31 = vsel %vm447_vm2, %v2658_v15, 0 }
0x16bd   :  { %v6848_v5 = vpop.eup %6847 }
0x16be   :  { %v2496_v6 = vsel %vm546_vm5, %v6848_v5, 0.0 }
0x16bf   :  { %2497 = vadd.xlane.f32.xlu0 %v2496_v6 }
0x16c1   :  { %v6850_v8 = vpop.eup %6849 }
0x16c2   :  { %v2499_v12 = vsel %vm546_vm5, %v6850_v8, 0.0 }
0x16c3   :  { %2500 = vadd.xlane.f32.xlu1 %v2499_v12 }
0x16d4   :  { %2602 = vrot.lane.b32.xlu1 %v2382_v38, %s7167_s14 }
0x16d5   :  { %2605 = vrot.lane.b32.xlu0 %v2384_v28, %s7167_s14 }
0x16d8   :  { %2654 = vrot.lane.b32.xlu1 %v2383_v49, %s7167_s14 }
0x1748   :  { %v2498_v16 = vpop.xlane.xlu0 %2497 }
0x1749   :  { %6851 = vrcp.f32 %v2498_v16 }
0x174c   :  { %v2501_v19 = vpop.xlane.xlu1 %2500  ;;  %v2606_v24 = vpop.permute.xlu0 %2605 }
0x174d   :  { %6853 = vrcp.f32 %v2501_v19  ;;  %v2611_v46 = vsel %vm447_vm2, %v2606_v24, 0  ;;  %v2145_v24 = vadd.f32 %v7741_v14, %v7676_v21 }
0x1750   :  { %v2603_v32 = vpop.permute.xlu1 %2602 }
0x1754   :  { %v2655_v33 = vpop.permute.xlu1 %2654 }
0x1756   :  { %v6852_v23 = vpop.eup %6851 }
0x1757   :  { %v2504_v43 = vmul.f32 %v6852_v23, %v6848_v5 }
0x1759   :  { %v2506_v48 = vpack.c.bf16 %v2504_v43, %v2504_v43 }
0x175a   :  { %v6854_v25 = vpop.eup %6853 }
0x175b   :  { %6372 = vmatmul.mubr.msk.bf16.vlgmr.msra.gmra.mxu1 %vm546_vm5, %v2506_v48  ;;  %v2505_v27 = vmul.f32 %v6854_v25, %v6850_v8  ;;  %v2943_v48 = vsel %vm209_vm0, %v2145_v24, 0.0 }
0x175c   :  { %6382 = vmatpush3.bf16.xpose.msra.mxu1 %v2611_v46  ;;  %6383 = vmatprep.mubr.msk.bf16.mxu1 %vm7166_vm1, %v7165_v18 }
0x175d   :  { %v2507_v28 = vpack.c.bf16 %v2505_v27, %v2505_v27  ;;  %6393 = vmatprep.subr.bf16.mxu1 %v7165_v18 }
0x175f   :  { %6378 = vmatmul.mubr.msk.bf16.vlgmr.msra.gmra.mxu0 %vm546_vm5, %v2507_v28 }
0x1760   :  { %6388 = vmatpush3.bf16.xpose.msra.mxu0 %v2663_v31  ;;  %6389 = vmatprep.mubr.msk.bf16.mxu0 %vm7166_vm1, %v7165_v18 }
0x1761   :  { %6399 = vmatprep.subr.bf16.mxu0 %v7165_v18 }
0x1763   :  { %6384 = vmatmul.mubr.msk.bf16.vlgmr.msra.gmra.mxu1 %vm447_vm2, %v2603_v32 }
0x1764   :  { %6395 = vmatprep.mubr.msk.bf16.mxu1 %vm7166_vm1, %v7165_v18 }
0x1767   :  { %6390 = vmatmul.mubr.msk.bf16.vlgmr.msra.gmra.mxu0 %vm447_vm2, %v2655_v33 }
0x1768   :  { %6401 = vmatprep.mubr.msk.bf16.mxu0 %vm7166_vm1, %v7165_v18 }
0x181b   :  { %v7797_v40 = vpop.f32.mrf.mxu1 }
0x181d   :  { %v6373_v41 = vpop.f32.mrf.mxu1 }
0x181f   :  { %v2551_v34 = vpop.f32.mrf.mxu1  ;;  %v7799_v38 = vpop.f32.mrf.mxu0 }
0x1820   :  { %v2600_v39 = vpack.c.bf16 %v7799_v38, %v7797_v40  ;;  %v6761_v34 = vld [vmem:[#allocation13 + $0x30] sm:$0xff]  }
0x1821   :  { %v6374_v42 = vpop.f32.mrf.mxu1  ;;  %v6379_v49 = vpop.f32.mrf.mxu0  ;;  %v6764_v40 = vld [vmem:[#allocation14 + $0x10] sm:$0xff]  }
0x1823   :  { %v2597_v56 = vpop.f32.mrf.mxu0  ;;  %v2647_v50 = vpop.f32.mrf.mxu1 }
0x1824   :  { %v2705_v52 = vmul.f32 0.25, %v2647_v50 }
0x1825   :  { %v6380_v53 = vpop.f32.mrf.mxu0  ;;  %v6385_v57 = vpop.f32.mrf.mxu1 }
0x1826   :  { %v2707_v54 = vsel %vm7413_vm4, %v2705_v52, -1e+30  ;;  %v6762_v57 = vld [vmem:[#allocation13 + $0x38] sm:$0xff]  }
0x1827   :  { %v2650_v58 = vpop.f32.mrf.mxu1  ;;  %v2699_v7 = vpop.f32.mrf.mxu0  ;;  %v2709_v26 = vsel %vm546_vm5, %v2707_v54, -inf }
0x1828   :  { %v2706_v30 = vmul.f32 0.25, %v2699_v7  ;;  %2710 = vmax.xlane.f32.xlu0 %v2709_v26 }
0x1829   :  { %v6386_v59 = vpop.f32.mrf.mxu1  ;;  %v6391_v60 = vpop.f32.mrf.mxu0 }
0x182a   :  { %v2708_v61 = vsel %vm7413_vm4, %v2706_v30, -1e+30 }
0x182b   :  { %v2702_v55 = vpop.f32.mrf.mxu0  ;;  %v2712_v62 = vsel %vm546_vm5, %v2708_v61, -inf }
0x182c   :  { %2713 = vmax.xlane.f32.xlu1 %v2712_v62  ;;  %v7847_v55 = vld [vmem:[%s8324_s8 + $0x4] sm:$0x7] }
0x182d   :  { %v6392_v63 = vpop.f32.mrf.mxu0 }
0x183d   :  { %2783 = vrot.lane.b32.xlu1 %v7757_v44, %s7167_s14 }
0x1861   :  { %2941 = vadd.xlane.f32.xlu1 %v2940_v3 }
0x18b1   :  { %v2711_v22 = vpop.xlane.xlu0 %2710 }
0x18b2   :  { %v2715_v4 = vsub.f32 %v2707_v54, %v2711_v22  ;;  %v6763_v54 = vld [vmem:[#allocation14 + $0x18] sm:$0xff]  }
0x18b4   :  { %v2717_v5 = vmul.f32 1.442695, %v2715_v4 }
0x18b5   :  { %v2714_v6 = vpop.xlane.xlu1 %2713 }
0x18b6   :  { %6855 = vpow2.f32 %v2717_v5  ;;  %v2716_v8 = vsub.f32 %v2708_v61, %v2714_v6  ;;  %v2969_v5 = vrot.slane %v7696_v35, %v7375_v45  ;;  %v7857_v6 = vld [vmem:[%s8325_s9 + $0x4] sm:$0x7] }
0x18b7   :  { %v4708_v35 = vrot.slane %v7857_v6, %v7375_v45 }
0x18b8   :  { %v2719_v12 = vmul.f32 1.442695, %v2716_v8 }
0x18b9   :  { %v2784_v15 = vpop.permute.xlu1 %2783 }
0x18ba   :  { %6857 = vpow2.f32 %v2719_v12  ;;  %v2789_v16 = vsel %vm574_vm3, %v2784_v15, 0  ;;  %v2975_v15 = vrot.slane %v7703_v37, %v7375_v45 }
0x18bb   :  { %6400 = vmatpush3.bf16.msra.mxu0 %v2789_v16 }
0x18bc   :  { %6411 = vmatprep.subr.bf16.mxu0 %v7165_v18 }
0x18c3   :  { %v6856_v1 = vpop.eup %6855 }
0x18c4   :  { %v2721_v20 = vsel %vm546_vm5, %v6856_v1, 0.0 }
0x18c5   :  { %2722 = vadd.xlane.f32.xlu0 %v2721_v20 }
0x18c7   :  { %v6858_v10 = vpop.eup %6857 }
0x18c8   :  { %v2724_v44 = vsel %vm546_vm5, %v6858_v10, 0.0 }
0x18c9   :  { %2725 = vadd.xlane.f32.xlu0 %v2724_v44 }
0x18df   :  { %2734 = vrot.lane.b32.xlu0 %v7751_v36, %s7167_s14 }
0x18ea   :  { %v2942_v19 = vpop.xlane.xlu1 %2941 }
0x18eb   :  { %v2946_v23 = vmul.f32 0.03125, %v2942_v19 }
0x18ed   :  { %v2948_v43 = vsub.f32 %v2144_v2, %v2946_v23  ;;  %v4702_v2 = vrot.slane %v7847_v55, %v7375_v45 }
0x18ef   :  { %v2950_v25 = vmul.f32 %v2948_v43, %v2948_v43 }
0x18f1   :  { %v2952_v46 = vsel %vm209_vm0, %v2950_v25, 0.0 }
0x18fe   :  { %2944 = vadd.xlane.f32.xlu0 %v2943_v48 }
0x1902   :  { %2953 = vadd.xlane.f32.xlu0 %v2952_v46 }
0x194e   :  { %v2723_v27 = vpop.xlane.xlu0 %2722 }
0x194f   :  { %6859 = vrcp.f32 %v2723_v27 }
0x1952   :  { %v2726_v28 = vpop.xlane.xlu0 %2725 }
0x1953   :  { %6861 = vrcp.f32 %v2726_v28 }
0x1956   :  { %v2735_v31 = vpop.permute.xlu0 %2734 }
0x1957   :  { %v2740_v36 = vsel %vm574_vm3, %v2735_v31, 0 }
0x1958   :  { %6394 = vmatpush3.bf16.msra.mxu1 %v2740_v36  ;;  %v6765_v36 = vld [vmem:[#allocation14 + $0x8] sm:$0xff]  }
0x1959   :  { %6405 = vmatprep.subr.bf16.mxu1 %v7165_v18 }
0x195c   :  { %v6860_v32 = vpop.eup %6859 }
0x195d   :  { %v2729_v33 = vmul.f32 %v6860_v32, %v6856_v1  ;;  %v6766_v32 = vld [vmem:[#allocation14] sm:$0xff]  }
0x195f   :  { %v2731_v21 = vpack.c.bf16 %v2729_v33, %v2729_v33 }
0x1960   :  { %v6862_v14 = vpop.eup %6861 }
0x1961   :  { %6396 = vmatmul.mubr.msk.bf16.vlgmr.msra.gmra.mxu1 %vm546_vm5, %v2731_v21  ;;  %v2730_v41 = vmul.f32 %v6862_v14, %v6858_v10  ;;  %v2935_v14 = vrot.slane %v7738_v11, %v7483_v9 }
0x1962   :  { %6407 = vmatprep.mubr.msk.bf16.mxu1 %vm7166_vm1, %v7165_v18  ;;  %6406 = vmatpush3.bf16.msra.mxu1 %v6762_v57 }
0x1963   :  { %v2732_v42 = vpack.c.bf16 %v2730_v41, %v2730_v41  ;;  %6417 = vmatprep.subr.bf16.mxu1 %v7165_v18 }
0x1965   :  { %6402 = vmatmul.mubr.msk.bf16.vlgmr.msra.gmra.mxu0 %vm546_vm5, %v2732_v42 }
0x1966   :  { %6412 = vmatpush3.bf16.msra.mxu0 %v6761_v34  ;;  %6413 = vmatprep.mubr.msk.bf16.mxu0 %vm7166_vm1, %v7165_v18 }
0x1967   :  { %6425 = vmatprep.subr.bf16.mxu0 %v7165_v18 }
0x196d   :  { %6414 = vmatmul.mubr.msk.bf16.vlgmr.msra.gmra.mxu0 %vm447_vm2, %v2600_v39 }
0x196e   :  { %6429 = vmatprep.mubr.msk.bf16.mxu0 %vm7166_vm1, %v7165_v18  ;;  %6426 = vmatpush3.bf16.msra.mxu0 %v6763_v54 }
0x196f   :  { %6427 = vmatprep.subr.bf16.mxu0 %v7165_v18 }
0x1972   :  { %6428 = vmatpush3.bf16.msra.mxu0 %v6764_v40  ;;  %v6767_v40 = vld [vmem:[#allocation14 + $0x28] sm:$0xff]  }
0x1973   :  { %6441 = vmatprep.subr.bf16.mxu0 %v7165_v18 }
0x1987   :  { %v2945_v49 = vpop.xlane.xlu0 %2944 }
0x1988   :  { %v2947_v56 = vmul.f32 0.03125, %v2945_v49 }
0x198a   :  { %v2949_v50 = vsub.f32 %v2145_v24, %v2947_v56  ;;  %v7874_v56 = vld [vmem:[#allocation16] sm:$0xf] }
0x198b   :  { %v2954_v38 = vpop.xlane.xlu0 %2953 }
0x198c   :  { %v2951_v52 = vmul.f32 %v2949_v50, %v2949_v50  ;;  %v2958_v39 = vmul.f32 0.03125, %v2954_v38 }
0x198e   :  { %v2955_v53 = vsel %vm209_vm0, %v2951_v52, 0.0  ;;  %v2960_v58 = vadd.f32 1e-05, %v2958_v39 }
0x198f   :  { %2956 = vadd.xlane.f32.xlu1 %v2955_v53  ;;  %v3060_v53 = vrot.slane %v7874_v56, %v7375_v45 }
0x1990   :  { %6863 = vrsqrt.f32 %v2960_v58 }
0x199d   :  { %v6864_v61 = vpop.eup %6863 }
0x199e   :  { %v2964_v3 = vmul.f32 %v6864_v61, %v2948_v43 }
0x19a0   :  { %v4703_v16 = vmul.f32 %v4702_v2, %v2964_v3  ;;  %v2970_v10 = vmul.f32 %v2969_v5, %v2964_v3 }
0x19a2   :  { %v2976_v24 = vadd.f32 %v2975_v15, %v2970_v10  ;;  %v4709_v25 = vadd.f32 %v4708_v35, %v4703_v16 }
0x1a18   :  { %v2957_v7 = vpop.xlane.xlu1 %2956 }
0x1a19   :  { %v2959_v26 = vmul.f32 0.03125, %v2957_v7 }
0x1a1b   :  { %v2961_v30 = vadd.f32 1e-05, %v2959_v26  ;;  %v6768_v26 = vld [vmem:[#allocation14 + $0x20] sm:$0xff]  }
0x1a1d   :  { %6865 = vrsqrt.f32 %v2961_v30 }
0x1a21   :  { %v2776_v59 = vpop.f32.mrf.mxu1 }
0x1a23   :  { %v6397_v60 = vpop.f32.mrf.mxu1 }
0x1a25   :  { %v2779_v62 = vpop.f32.mrf.mxu1  ;;  %v2825_v63 = vpop.f32.mrf.mxu0 }
0x1a26   :  { %v2831_v0 = vpack.c.bf16 %v2825_v63, %v2776_v59  ;;  %v3000_v62 = vrot.slane %v7874_v56, %v7347_v29 }
0x1a27   :  { %v6398_v22 = vpop.f32.mrf.mxu1  ;;  %v6403_v4 = vpop.f32.mrf.mxu0 }
0x1a28   :  { %6408 = vmatmul.mubr.msk.bf16.vlgmr.msra.gmra.mxu1 %vm447_vm2, %v2831_v0 }
0x1a29   :  { %v2828_v8 = vpop.f32.mrf.mxu0  ;;  %6421 = vmatprep.mubr.msk.bf16.mxu1 %vm7166_vm1, %v7165_v18  ;;  %6418 = vmatpush3.bf16.msra.mxu1 %v6765_v36 }
0x1a2a   :  { %v6866_v12 = vpop.eup %6865  ;;  %6419 = vmatprep.subr.bf16.mxu1 %v7165_v18 }
0x1a2b   :  { %v2965_v1 = vmul.f32 %v6866_v12, %v2949_v50  ;;  %v6404_v20 = vpop.f32.mrf.mxu0 }
0x1a2d   :  { %v4704_v44 = vmul.f32 %v4702_v2, %v2965_v1  ;;  %v2925_v19 = vpop.f32.mrf.mxu0  ;;  %v2971_v23 = vmul.f32 %v2969_v5, %v2965_v1  ;;  %6420 = vmatpush3.bf16.msra.mxu1 %v6766_v32  ;;  %v3120_v5 = vrot.slane %v7874_v56, %v7382_v51 }
0x1a2e   :  { %6433 = vmatprep.subr.bf16.mxu1 %v7165_v18 }
0x1a2f   :  { %v6415_v43 = vpop.f32.mrf.mxu0  ;;  %v2977_v48 = vadd.f32 %v2975_v15, %v2971_v23  ;;  %v4710_v46 = vadd.f32 %v4708_v35, %v4704_v44 }
0x1a31   :  { %v2928_v27 = vpop.f32.mrf.mxu0  ;;  %v2996_v28 = vpack.c.bf16 %v2977_v48, %v2976_v24  ;;  %v7865_v31 = vpack.c.bf16 %v4710_v46, %v4709_v25 }
0x1a33   :  { %v6416_v37 = vpop.f32.mrf.mxu0  ;;  %6430 = vmatmul.mubr.msk.bf16.vlgmr.msra.gmra.mxu0 %vm209_vm0, %v2996_v28 }
0x1a34   :  { %6443 = vmatprep.mubr.msk.bf16.mxu0 %vm7166_vm1, %v7165_v18 }
0x1ae8   :  { %v2875_v33 = vpop.f32.mrf.mxu1 }
0x1ae9   :  { %v2926_v21 = vadd.f32 %v2925_v19, %v2875_v33 }
0x1aea   :  { %v6409_v41 = vpop.f32.mrf.mxu1 }
0x1aeb   :  { %v2936_v42 = vadd.f32 %v2935_v14, %v2926_v21 }
0x1aec   :  { %v2878_v34 = vpop.f32.mrf.mxu1 }
0x1aed   :  { %v2929_v49 = vadd.f32 %v2928_v27, %v2878_v34  ;;  %v7879_v57 = vadd.f32 %v2936_v42, %v7707_v13 }
0x1aee   :  { %v6410_v50 = vpop.f32.mrf.mxu1 }
0x1aef   :  { %v2937_v52 = vadd.f32 %v2935_v14, %v2929_v49 }
0x1af1   :  { %v7882_v54 = vadd.f32 %v2937_v52, %v7709_v47 }
0x1af3   :  { %v2995_v11 = vpack.c.bf16 %v7882_v54, %v7879_v57  ;;  %v3110_v38 = vpop.f32.mrf.mxu0 }
0x1af4   :  { %v3111_v39 = vadd.f32 %v3110_v38, %v3060_v53 }
0x1af5   :  { %6422 = vmatmul.mubr.msk.bf16.vlgmr.msra.gmra.mxu1 %vm209_vm0, %v2995_v11  ;;  %v6431_v58 = vpop.f32.mrf.mxu0 }
0x1af6   :  { %v7887_v7 = vpack.c.bf16 %v3111_v39, %v3111_v39  ;;  %6434 = vmatpush3.bf16.msra.mxu1 %v6767_v40  ;;  %6437 = vmatprep.mubr.msk.bf16.mxu1 %vm7166_vm1, %v7165_v18 }
0x1af7   :  { %v3113_v13 = vpop.f32.mrf.mxu0  ;;  %6435 = vmatprep.subr.bf16.mxu1 %v7165_v18 }
0x1af8   :  { %v3184_v47 = vsel %vm447_vm2, %v7887_v7, 0  ;;  %v3114_v30 = vadd.f32 %v3113_v13, %v3060_v53 }
0x1af9   :  { %v6432_v59 = vpop.f32.mrf.mxu0  ;;  %6442 = vmatpush3.bf16.xpose.msra.mxu0 %v3184_v47 }
0x1afa   :  { %v3177_v60 = vpack.c.bf16 %v3114_v30, %v3114_v30  ;;  %6436 = vmatpush3.bf16.msra.mxu1 %v6768_v26  ;;  %6453 = vmatprep.subr.bf16.mxu0 %v7165_v18 }
0x1afb   :  { %6447 = vmatprep.subr.bf16.mxu1 %v7165_v18 }
0x1afc   :  { %v3230_v61 = vsel %vm447_vm2, %v3177_v60, 0 }
0x1afd   :  { %6438 = vmatmul.mubr.msk.bf16.vlgmr.msra.gmra.mxu1 %vm209_vm0, %v2996_v28 }
0x1afe   :  { %6448 = vmatpush3.bf16.xpose.msra.mxu1 %v3230_v61  ;;  %6449 = vmatprep.mubr.msk.bf16.mxu1 %vm7166_vm1, %v7165_v18 }
0x1aff   :  { %6459 = vmatprep.subr.bf16.mxu1 %v7165_v18 }
0x1bb5   :  { %v3050_v63 = vpop.f32.mrf.mxu1 }
0x1bb6   :  { %v3051_v0 = vadd.f32 %v3050_v63, %v3000_v62 }
0x1bb7   :  { %v6423_v2 = vpop.f32.mrf.mxu1 }
0x1bb8   :  { %v3174_v3 = vpack.c.bf16 %v3051_v0, %v3051_v0 }
0x1bb9   :  { %v3053_v22 = vpop.f32.mrf.mxu1 }
0x1bba   :  { %v3054_v4 = vadd.f32 %v3053_v22, %v3000_v62  ;;  %6444 = vmatmul.mubr.msk.bf16.vlgmr.msra.gmra.mxu0 %vm447_vm2, %v3174_v3 }
0x1bbb   :  { %v6424_v8 = vpop.f32.mrf.mxu1  ;;  %6455 = vmatprep.mubr.msk.bf16.mxu0 %vm7166_vm1, %v7165_v18 }
0x1bbc   :  { %v3175_v12 = vpack.c.bf16 %v3054_v4, %v3054_v4 }
0x1bbd   :  { %v3167_v15 = vpop.f32.mrf.mxu1 }
0x1bbe   :  { %v3168_v16 = vadd.f32 %v3167_v15, %v3120_v5  ;;  %6450 = vmatmul.mubr.msk.bf16.vlgmr.msra.gmra.mxu1 %vm447_vm2, %v3175_v12 }
0x1bbf   :  { %v6439_v1 = vpop.f32.mrf.mxu1  ;;  %6461 = vmatprep.mubr.msk.bf16.mxu1 %vm7166_vm1, %v7165_v18 }
0x1bc0   :  { %v7911_v20 = vpack.c.bf16 %v3168_v16, %v3168_v16 }
0x1bc1   :  { %v3170_v10 = vpop.f32.mrf.mxu1 }
0x1bc2   :  { %v3304_v35 = vsel %vm574_vm3, %v7911_v20, 0  ;;  %v3171_v44 = vadd.f32 %v3170_v10, %v3120_v5 }
0x1bc3   :  { %v6440_v19 = vpop.f32.mrf.mxu1  ;;  %6454 = vmatpush3.bf16.msra.mxu0 %v3304_v35 }
0x1bc4   :  { %v7915_v23 = vpack.c.bf16 %v3171_v44, %v3171_v44  ;;  %6465 = vmatprep.subr.bf16.mxu0 %v7165_v18 }
0x1bc6   :  { %v3350_v43 = vsel %vm574_vm3, %v7915_v23, 0 }
0x1bc7   :  { %6460 = vmatpush3.bf16.msra.mxu1 %v3350_v43 }
0x1bc8   :  { %6471 = vmatprep.subr.bf16.mxu1 %v7165_v18 }
0x1c7a   :  { %v3220_v24 = vpop.f32.mrf.mxu0 }
0x1c7b   :  { %v3272_v48 = vmul.f32 0.25, %v3220_v24 }
0x1c7c   :  { %v6445_v25 = vpop.f32.mrf.mxu0 }
0x1c7d   :  { %v3274_v46 = vsel %vm7413_vm4, %v3272_v48, -1e+30 }
0x1c7e   :  { %v3223_v27 = vpop.f32.mrf.mxu0  ;;  %v3266_v28 = vpop.f32.mrf.mxu1  ;;  %v3276_v37 = vsel %vm546_vm5, %v3274_v46, -inf }
0x1c7f   :  { %v3273_v36 = vmul.f32 0.25, %v3266_v28  ;;  %3277 = vmax.xlane.f32.xlu0 %v3276_v37 }
0x1c80   :  { %v6446_v32 = vpop.f32.mrf.mxu0  ;;  %v6451_v33 = vpop.f32.mrf.mxu1 }
0x1c81   :  { %v3275_v21 = vsel %vm7413_vm4, %v3273_v36, -1e+30 }
0x1c82   :  { %v3269_v14 = vpop.f32.mrf.mxu1  ;;  %v3279_v41 = vsel %vm546_vm5, %v3275_v21, -inf }
0x1c83   :  { %3280 = vmax.xlane.f32.xlu1 %v3279_v41 }
0x1c84   :  { %v6452_v34 = vpop.f32.mrf.mxu1 }
0x1c94   :  { %3449 = vrot.lane.b32.xlu1 %v3177_v60, %s7167_s14 }
0x1d08   :  { %v3278_v42 = vpop.xlane.xlu0 %3277 }
0x1d09   :  { %v3282_v49 = vsub.f32 %v3274_v46, %v3278_v42 }
0x1d0b   :  { %v3284_v50 = vmul.f32 1.442695, %v3282_v49 }
0x1d0c   :  { %v3281_v52 = vpop.xlane.xlu1 %3280 }
0x1d0d   :  { %6867 = vpow2.f32 %v3284_v50  ;;  %v3283_v53 = vsub.f32 %v3275_v21, %v3281_v52 }
0x1d0f   :  { %v3286_v40 = vmul.f32 1.442695, %v3283_v53 }
0x1d10   :  { %v3450_v26 = vpop.permute.xlu1 %3449 }
0x1d11   :  { %6869 = vpow2.f32 %v3286_v40  ;;  %v3455_v2 = vsel %vm447_vm2, %v3450_v26, 0 }
0x1d1a   :  { %v6868_v11 = vpop.eup %6867 }
0x1d1b   :  { %v3288_v38 = vsel %vm546_vm5, %v6868_v11, 0.0 }
0x1d1c   :  { %3289 = vadd.xlane.f32.xlu0 %v3288_v38 }
0x1d1e   :  { %v6870_v39 = vpop.eup %6869 }
0x1d1f   :  { %v3291_v58 = vsel %vm546_vm5, %v6870_v39, 0.0 }
0x1d20   :  { %3292 = vadd.xlane.f32.xlu1 %v3291_v58 }
0x1d31   :  { %3394 = vrot.lane.b32.xlu1 %v3174_v3, %s7167_s14 }
0x1d32   :  { %3397 = vrot.lane.b32.xlu0 %v7887_v7, %s7167_s14 }
0x1d35   :  { %3446 = vrot.lane.b32.xlu1 %v3175_v12, %s7167_s14 }
0x1da5   :  { %v3290_v13 = vpop.xlane.xlu0 %3289 }
0x1da6   :  { %6871 = vrcp.f32 %v3290_v13 }
0x1da9   :  { %v3293_v47 = vpop.xlane.xlu1 %3292  ;;  %v3398_v60 = vpop.permute.xlu0 %3397 }
0x1daa   :  { %6873 = vrcp.f32 %v3293_v47  ;;  %v3403_v63 = vsel %vm447_vm2, %v3398_v60, 0 }
0x1dad   :  { %v3395_v3 = vpop.permute.xlu1 %3394 }
0x1db1   :  { %v3447_v22 = vpop.permute.xlu1 %3446 }
0x1db3   :  { %v6872_v30 = vpop.eup %6871 }
0x1db4   :  { %v3296_v59 = vmul.f32 %v6872_v30, %v6868_v11 }
0x1db6   :  { %v3298_v61 = vpack.c.bf16 %v3296_v59, %v3296_v59 }
0x1db7   :  { %v6874_v62 = vpop.eup %6873 }
0x1db8   :  { %6456 = vmatmul.mubr.msk.bf16.vlgmr.msra.gmra.mxu0 %vm546_vm5, %v3298_v61  ;;  %v3297_v0 = vmul.f32 %v6874_v62, %v6870_v39  ;;  %v6769_v62 = vld [vmem:[#allocation14 + $0x30] sm:$0xff]  }
0x1db9   :  { %6466 = vmatpush3.bf16.xpose.msra.mxu0 %v3403_v63  ;;  %6467 = vmatprep.mubr.msk.bf16.mxu0 %vm7166_vm1, %v7165_v18  ;;  %v6770_v63 = vld [vmem:[#allocation14 + $0x38] sm:$0xff]  }
0x1dba   :  { %v3299_v7 = vpack.c.bf16 %v3297_v0, %v3297_v0  ;;  %6477 = vmatprep.subr.bf16.mxu0 %v7165_v18 }
0x1dbc   :  { %6462 = vmatmul.mubr.msk.bf16.vlgmr.msra.gmra.mxu1 %vm546_vm5, %v3299_v7 }
0x1dbd   :  { %6472 = vmatpush3.bf16.xpose.msra.mxu1 %v3455_v2  ;;  %6473 = vmatprep.mubr.msk.bf16.mxu1 %vm7166_vm1, %v7165_v18 }
0x1dbe   :  { %6483 = vmatprep.subr.bf16.mxu1 %v7165_v18 }
0x1dc0   :  { %6468 = vmatmul.mubr.msk.bf16.vlgmr.msra.gmra.mxu0 %vm447_vm2, %v3395_v3 }
0x1dc1   :  { %6479 = vmatprep.mubr.msk.bf16.mxu0 %vm7166_vm1, %v7165_v18 }
0x1dc4   :  { %6474 = vmatmul.mubr.msk.bf16.vlgmr.msra.gmra.mxu1 %vm447_vm2, %v3447_v22 }
0x1dc5   :  { %6485 = vmatprep.mubr.msk.bf16.mxu1 %vm7166_vm1, %v7165_v18 }
0x1e78   :  { %v7950_v4 = vpop.f32.mrf.mxu0 }
0x1e7a   :  { %v6457_v5 = vpop.f32.mrf.mxu0 }
0x1e7c   :  { %v3343_v8 = vpop.f32.mrf.mxu0  ;;  %v7952_v12 = vpop.f32.mrf.mxu1 }
0x1e7d   :  { %v3392_v15 = vpack.c.bf16 %v7952_v12, %v7950_v4 }
0x1e7e   :  { %v6458_v16 = vpop.f32.mrf.mxu0  ;;  %v6463_v1 = vpop.f32.mrf.mxu1 }
0x1e80   :  { %v3389_v10 = vpop.f32.mrf.mxu1  ;;  %v3439_v35 = vpop.f32.mrf.mxu0 }
0x1e81   :  { %v3497_v44 = vmul.f32 0.25, %v3439_v35  ;;  %v3727_v35 = vrot.slane %v7874_v56, %v7483_v9 }
0x1e82   :  { %v6464_v19 = vpop.f32.mrf.mxu1  ;;  %v6469_v43 = vpop.f32.mrf.mxu0 }
0x1e83   :  { %v3499_v24 = vsel %vm7413_vm4, %v3497_v44, -1e+30 }
0x1e84   :  { %v3442_v48 = vpop.f32.mrf.mxu0  ;;  %v3491_v25 = vpop.f32.mrf.mxu1  ;;  %v3501_v46 = vsel %vm546_vm5, %v3499_v24, -inf }
0x1e85   :  { %v3498_v27 = vmul.f32 0.25, %v3491_v25  ;;  %3502 = vmax.xlane.f32.xlu0 %v3501_v46 }
0x1e86   :  { %v6470_v28 = vpop.f32.mrf.mxu0  ;;  %v6475_v37 = vpop.f32.mrf.mxu1 }
0x1e87   :  { %v3500_v36 = vsel %vm7413_vm4, %v3498_v27, -1e+30 }
0x1e88   :  { %v3494_v32 = vpop.f32.mrf.mxu1  ;;  %v3504_v33 = vsel %vm546_vm5, %v3500_v36, -inf }
0x1e89   :  { %3505 = vmax.xlane.f32.xlu1 %v3504_v33 }
0x1e8a   :  { %v6476_v21 = vpop.f32.mrf.mxu1 }
0x1e9a   :  { %3575 = vrot.lane.b32.xlu1 %v7915_v23, %s7167_s14 }
0x1f0e   :  { %v3503_v14 = vpop.xlane.xlu0 %3502 }
0x1f0f   :  { %v3507_v41 = vsub.f32 %v3499_v24, %v3503_v14 }
0x1f11   :  { %v3509_v34 = vmul.f32 1.442695, %v3507_v41 }
0x1f12   :  { %v3506_v42 = vpop.xlane.xlu1 %3505 }
0x1f13   :  { %6875 = vpow2.f32 %v3509_v34  ;;  %v3508_v49 = vsub.f32 %v3500_v36, %v3506_v42 }
0x1f15   :  { %v3511_v50 = vmul.f32 1.442695, %v3508_v49 }
0x1f16   :  { %v3576_v52 = vpop.permute.xlu1 %3575 }
0x1f17   :  { %6877 = vpow2.f32 %v3511_v50  ;;  %v3581_v53 = vsel %vm574_vm3, %v3576_v52, 0  ;;  %v6771_v52 = vld [vmem:[#allocation17 + $0x8] sm:$0xff]  }
0x1f18   :  { %6484 = vmatpush3.bf16.msra.mxu1 %v3581_v53 }
0x1f19   :  { %6495 = vmatprep.subr.bf16.mxu1 %v7165_v18 }
0x1f20   :  { %v6876_v40 = vpop.eup %6875 }
0x1f21   :  { %v3513_v11 = vsel %vm546_vm5, %v6876_v40, 0.0 }
0x1f22   :  { %3514 = vadd.xlane.f32.xlu0 %v3513_v11 }
0x1f24   :  { %v6878_v38 = vpop.eup %6877 }
0x1f25   :  { %v3516_v23 = vsel %vm546_vm5, %v6878_v38, 0.0 }
0x1f26   :  { %3517 = vadd.xlane.f32.xlu0 %v3516_v23 }
0x1f3c   :  { %3526 = vrot.lane.b32.xlu0 %v7911_v20, %s7167_s14 }
0x1fab   :  { %v3515_v39 = vpop.xlane.xlu0 %3514 }
0x1fac   :  { %6879 = vrcp.f32 %v3515_v39 }
0x1faf   :  { %v3518_v58 = vpop.xlane.xlu0 %3517 }
0x1fb0   :  { %6881 = vrcp.f32 %v3518_v58 }
0x1fb3   :  { %v3527_v26 = vpop.permute.xlu0 %3526 }
0x1fb4   :  { %v3532_v13 = vsel %vm574_vm3, %v3527_v26, 0  ;;  %v6935_v26 = vld [vmem:[%s8324_s8] sm:$0x7] }
0x1fb5   :  { %6478 = vmatpush3.bf16.msra.mxu0 %v3532_v13  ;;  %v3761_v13 = vrot.slane %v6935_v26, %v7382_v51 }
0x1fb6   :  { %6489 = vmatprep.subr.bf16.mxu0 %v7165_v18 }
0x1fb9   :  { %v6880_v47 = vpop.eup %6879 }
0x1fba   :  { %v3521_v30 = vmul.f32 %v6880_v47, %v6876_v40 }
0x1fbc   :  { %v3523_v59 = vpack.c.bf16 %v3521_v30, %v3521_v30 }
0x1fbd   :  { %v6882_v60 = vpop.eup %6881 }
0x1fbe   :  { %6480 = vmatmul.mubr.msk.bf16.vlgmr.msra.gmra.mxu0 %vm546_vm5, %v3523_v59  ;;  %v3522_v61 = vmul.f32 %v6882_v60, %v6878_v38  ;;  %v6936_v59 = vld [vmem:[%s8325_s9] sm:$0x7] }
0x1fbf   :  { %6491 = vmatprep.mubr.msk.bf16.mxu0 %vm7166_vm1, %v7165_v18  ;;  %6490 = vmatpush3.bf16.msra.mxu0 %v6770_v63  ;;  %v3767_v60 = vrot.slane %v6936_v59, %v7382_v51 }
0x1fc0   :  { %v3524_v20 = vpack.c.bf16 %v3522_v61, %v3522_v61  ;;  %6501 = vmatprep.subr.bf16.mxu0 %v7165_v18 }
0x1fc2   :  { %6486 = vmatmul.mubr.msk.bf16.vlgmr.msra.gmra.mxu1 %vm546_vm5, %v3524_v20 }
0x1fc3   :  { %6496 = vmatpush3.bf16.msra.mxu1 %v6769_v62  ;;  %6497 = vmatprep.mubr.msk.bf16.mxu1 %vm7166_vm1, %v7165_v18 }
0x1fc4   :  { %6509 = vmatprep.subr.bf16.mxu1 %v7165_v18 }
0x1fca   :  { %6498 = vmatmul.mubr.msk.bf16.vlgmr.msra.gmra.mxu1 %vm447_vm2, %v3392_v15 }
0x1fcb   :  { %6513 = vmatprep.mubr.msk.bf16.mxu1 %vm7166_vm1, %v7165_v18 }
0x207e   :  { %v3568_v0 = vpop.f32.mrf.mxu0 }
0x2080   :  { %v6481_v7 = vpop.f32.mrf.mxu0 }
0x2082   :  { %v3571_v2 = vpop.f32.mrf.mxu0  ;;  %v3617_v3 = vpop.f32.mrf.mxu1 }
0x2083   :  { %v3623_v22 = vpack.c.bf16 %v3617_v3, %v3568_v0  ;;  %v6773_v2 = vld [vmem:[#allocation17 + $0x18] sm:$0xff]   ;;  %v6774_v3 = vld [vmem:[#allocation17 + $0x10] sm:$0xff]  }
0x2084   :  { %v6482_v4 = vpop.f32.mrf.mxu0  ;;  %v6487_v5 = vpop.f32.mrf.mxu1  ;;  %6510 = vmatpush3.bf16.msra.mxu1 %v6773_v2 }
0x2085   :  { %6492 = vmatmul.mubr.msk.bf16.vlgmr.msra.gmra.mxu0 %vm447_vm2, %v3623_v22  ;;  %6511 = vmatprep.subr.bf16.mxu1 %v7165_v18  ;;  %v3778_v22 = vld [vmem:[%s8331_s15] sm:$0x3] }
0x2086   :  { %v3620_v8 = vpop.f32.mrf.mxu1  ;;  %6505 = vmatprep.mubr.msk.bf16.mxu0 %vm7166_vm1, %v7165_v18  ;;  %6502 = vmatpush3.bf16.msra.mxu0 %v6771_v52  ;;  %v3783_v4 = vrot.slane %v3778_v22, %v7347_v29  ;;  %v6775_v52 = vld [vmem:[#allocation13 + $0x48] sm:$0xff]  }
0x2087   :  { %6503 = vmatprep.subr.bf16.mxu0 %v7165_v18 }
0x2088   :  { %v6488_v12 = vpop.f32.mrf.mxu1  ;;  %6512 = vmatpush3.bf16.msra.mxu1 %v6774_v3 }
0x2089   :  { %6525 = vmatprep.subr.bf16.mxu1 %v7165_v18 }
0x208a   :  { %v3717_v15 = vpop.f32.mrf.mxu1 }
0x208c   :  { %v6499_v16 = vpop.f32.mrf.mxu1 }
0x208e   :  { %v3720_v1 = vpop.f32.mrf.mxu1 }
0x2090   :  { %v6500_v10 = vpop.f32.mrf.mxu1 }
0x2145   :  { %v3667_v44 = vpop.f32.mrf.mxu0 }
0x2146   :  { %v3718_v19 = vadd.f32 %v3717_v15, %v3667_v44 }
0x2147   :  { %v6493_v43 = vpop.f32.mrf.mxu0 }
0x2148   :  { %v3728_v24 = vadd.f32 %v3727_v35, %v3718_v19  ;;  %v3846_v19 = vrot.slane %v3778_v22, %v7375_v45 }
0x2149   :  { %v3670_v48 = vpop.f32.mrf.mxu0 }
0x214a   :  { %v3721_v25 = vadd.f32 %v3720_v1, %v3670_v48  ;;  %v3730_v46 = vadd.f32 %v3728_v24, %v7879_v57 }
0x214b   :  { %v6494_v27 = vpop.f32.mrf.mxu0 }
0x214c   :  { %v3729_v28 = vadd.f32 %v3727_v35, %v3721_v25  ;;  %v3732_v37 = vsel %vm209_vm0, %v3730_v46, 0.0 }
0x214d   :  { %3733 = vadd.xlane.f32.xlu1 %v3732_v37 }
0x214e   :  { %v3731_v36 = vadd.f32 %v3729_v28, %v7882_v54  ;;  %v6772_v54 = vld [vmem:[#allocation17] sm:$0xff]  }
0x214f   :  { %6504 = vmatpush3.bf16.msra.mxu0 %v6772_v54  ;;  %v6776_v54 = vld [vmem:[#allocation13 + $0x58] sm:$0xff]  }
0x2150   :  { %v3735_v32 = vsel %vm209_vm0, %v3731_v36, 0.0  ;;  %6517 = vmatprep.subr.bf16.mxu0 %v7165_v18 }
0x2151   :  { %3736 = vadd.xlane.f32.xlu0 %v3735_v32 }
0x21d6   :  { %v3734_v33 = vpop.xlane.xlu1 %3733 }
0x21d7   :  { %v3738_v56 = vmul.f32 0.03125, %v3734_v33 }
0x21d9   :  { %v3740_v21 = vsub.f32 %v3730_v46, %v3738_v56 }
0x21da   :  { %v3737_v14 = vpop.xlane.xlu0 %3736 }
0x21db   :  { %v3739_v41 = vmul.f32 0.03125, %v3737_v14  ;;  %v3742_v34 = vmul.f32 %v3740_v21, %v3740_v21 }
0x21dd   :  { %v3741_v42 = vsub.f32 %v3731_v36, %v3739_v41  ;;  %v3744_v49 = vsel %vm209_vm0, %v3742_v34, 0.0 }
0x21de   :  { %3745 = vadd.xlane.f32.xlu0 %v3744_v49 }
0x21df   :  { %v3743_v57 = vmul.f32 %v3741_v42, %v3741_v42 }
0x21e1   :  { %v3747_v50 = vsel %vm209_vm0, %v3743_v57, 0.0 }
0x21e2   :  { %3748 = vadd.xlane.f32.xlu1 %v3747_v50 }
0x2267   :  { %v3746_v53 = vpop.xlane.xlu0 %3745 }
0x2268   :  { %v3750_v40 = vmul.f32 0.03125, %v3746_v53  ;;  %v6777_v53 = vld [vmem:[#allocation13 + $0x40] sm:$0xff]  }
0x226a   :  { %v3752_v11 = vadd.f32 1e-05, %v3750_v40  ;;  %v6778_v40 = vld [vmem:[#allocation13 + $0x50] sm:$0xff]  }
0x226b   :  { %v3749_v38 = vpop.xlane.xlu1 %3748 }
0x226c   :  { %6883 = vrsqrt.f32 %v3752_v11  ;;  %v3751_v23 = vmul.f32 0.03125, %v3749_v38 }
0x226e   :  { %v3753_v39 = vadd.f32 1e-05, %v3751_v23 }
0x2270   :  { %6885 = vrsqrt.f32 %v3753_v39 }
0x2279   :  { %v6884_v58 = vpop.eup %6883 }
0x227a   :  { %v3756_v47 = vmul.f32 %v6884_v58, %v3740_v21 }
0x227c   :  { %v3762_v61 = vmul.f32 %v3761_v13, %v3756_v47  ;;  %v3938_v47 = vrot.slane %v7847_v55, %v7347_v29  ;;  %v6780_v55 = vld [vmem:[#allocation13 + $0x60] sm:$0xff]  }
0x227d   :  { %v6886_v30 = vpop.eup %6885 }
0x227e   :  { %v3757_v62 = vmul.f32 %v6886_v30, %v3741_v42  ;;  %v3768_v63 = vadd.f32 %v3767_v60, %v3762_v61 }
0x2280   :  { %v3763_v20 = vmul.f32 %v3761_v13, %v3757_v62  ;;  %v3944_v62 = vrot.slane %v7857_v6, %v7347_v29  ;;  %v8049_v6 = vld [vmem:[%s8327_s11 + $0x4] sm:$0xf] }
0x2281   :  { %v4030_v3 = vrot.slane %v8049_v6, %v7375_v45 }
0x2282   :  { %v3769_v0 = vadd.f32 %v3767_v60, %v3763_v20 }
0x2284   :  { %v3779_v7 = vpack.c.bf16 %v3769_v0, %v3768_v63 }
0x2286   :  { %6506 = vmatmul.mubr.msk.bf16.vlgmr.msra.gmra.mxu0 %vm209_vm0, %v3779_v7  ;;  %v6779_v7 = vld [vmem:[#allocation13 + $0x68] sm:$0xff]  }
0x2287   :  { %6521 = vmatprep.mubr.msk.bf16.mxu0 %vm7166_vm1, %v7165_v18  ;;  %6518 = vmatpush3.bf16.msra.mxu0 %v6775_v52 }
0x2288   :  { %6519 = vmatprep.subr.bf16.mxu0 %v7165_v18 }
0x228b   :  { %6520 = vmatpush3.bf16.msra.mxu0 %v6777_v53 }
0x228c   :  { %6533 = vmatprep.subr.bf16.mxu0 %v7165_v18 }
0x2346   :  { %v3833_v5 = vpop.f32.mrf.mxu0 }
0x2347   :  { %v3834_v12 = vadd.f32 %v3833_v5, %v3783_v4 }
0x2348   :  { %v6507_v8 = vpop.f32.mrf.mxu0 }
0x2349   :  { %v3840_v10 = vmax.f32 %v3834_v12, 0.0 }
0x234a   :  { %v3836_v15 = vpop.f32.mrf.mxu0 }
0x234b   :  { %v3837_v16 = vadd.f32 %v3836_v15, %v3783_v4  ;;  %v3970_v15 = vrot.slane %v8049_v6, %v7347_v29 }
0x234c   :  { %v6508_v1 = vpop.f32.mrf.mxu0 }
0x234d   :  { %v3841_v35 = vmax.f32 %v3837_v16, 0.0 }
0x234f   :  { %v3842_v44 = vpack.c.bf16 %v3841_v35, %v3840_v10 }
0x2351   :  { %6514 = vmatmul.mubr.msk.bf16.vlgmr.msra.gmra.mxu1 %vm209_vm0, %v3842_v44 }
0x2352   :  { %6529 = vmatprep.mubr.msk.bf16.mxu1 %vm7166_vm1, %v7165_v18  ;;  %6526 = vmatpush3.bf16.msra.mxu1 %v6776_v54 }
0x2353   :  { %6527 = vmatprep.subr.bf16.mxu1 %v7165_v18 }
0x2356   :  { %6528 = vmatpush3.bf16.msra.mxu1 %v6778_v40 }
0x2357   :  { %6541 = vmatprep.subr.bf16.mxu1 %v7165_v18 }
0x2411   :  { %v3896_v43 = vpop.f32.mrf.mxu1 }
0x2412   :  { %v3897_v24 = vadd.f32 %v3896_v43, %v3846_v19 }
0x2413   :  { %v6515_v48 = vpop.f32.mrf.mxu1 }
0x2414   :  { %v3903_v25 = vadd.f32 %v3897_v24, %v3768_v63 }
0x2415   :  { %v3899_v46 = vpop.f32.mrf.mxu1 }
0x2416   :  { %v3900_v27 = vadd.f32 %v3899_v46, %v3846_v19  ;;  %v3909_v28 = vsel %vm209_vm0, %v3903_v25, 0.0  ;;  %v4087_v19 = vrot.slane %v8049_v6, %v7382_v51 }
0x2417   :  { %3910 = vadd.xlane.f32.xlu0 %v3909_v28  ;;  %v6516_v37 = vpop.f32.mrf.mxu1 }
0x2418   :  { %v3904_v36 = vadd.f32 %v3900_v27, %v3769_v0 }
0x241a   :  { %v3912_v32 = vsel %vm209_vm0, %v3904_v36, 0.0 }
0x241b   :  { %3913 = vadd.xlane.f32.xlu1 %v3912_v32 }
0x24a0   :  { %v3911_v33 = vpop.xlane.xlu0 %3910 }
0x24a1   :  { %v3915_v56 = vmul.f32 0.03125, %v3911_v33 }
0x24a3   :  { %v3917_v21 = vsub.f32 %v3903_v25, %v3915_v56 }
0x24a4   :  { %v3914_v14 = vpop.xlane.xlu1 %3913 }
0x24a5   :  { %v3916_v41 = vmul.f32 0.03125, %v3914_v14  ;;  %v3919_v34 = vmul.f32 %v3917_v21, %v3917_v21 }
0x24a7   :  { %v3918_v42 = vsub.f32 %v3904_v36, %v3916_v41  ;;  %v3921_v49 = vsel %vm209_vm0, %v3919_v34, 0.0 }
0x24a8   :  { %3922 = vadd.xlane.f32.xlu0 %v3921_v49 }
0x24a9   :  { %v3920_v57 = vmul.f32 %v3918_v42, %v3918_v42 }
0x24ab   :  { %v3924_v50 = vsel %vm209_vm0, %v3920_v57, 0.0 }
0x24ac   :  { %3925 = vadd.xlane.f32.xlu1 %v3924_v50 }
0x2531   :  { %v3923_v11 = vpop.xlane.xlu0 %3922 }
0x2532   :  { %v3927_v38 = vmul.f32 0.03125, %v3923_v11 }
0x2534   :  { %v3929_v23 = vadd.f32 1e-05, %v3927_v38 }
0x2535   :  { %v3926_v39 = vpop.xlane.xlu1 %3925 }
0x2536   :  { %6887 = vrsqrt.f32 %v3929_v23  ;;  %v3928_v58 = vmul.f32 0.03125, %v3926_v39 }
0x2538   :  { %v3930_v26 = vadd.f32 1e-05, %v3928_v58 }
0x253a   :  { %6889 = vrsqrt.f32 %v3930_v26 }
0x2543   :  { %v6888_v13 = vpop.eup %6887 }
0x2544   :  { %v3933_v30 = vmul.f32 %v6888_v13, %v3917_v21 }
0x2546   :  { %v3939_v60 = vmul.f32 %v3938_v47, %v3933_v30 }
0x2547   :  { %v6890_v59 = vpop.eup %6889 }
0x2548   :  { %v3934_v61 = vmul.f32 %v6890_v59, %v3918_v42  ;;  %v8029_v63 = vadd.f32 %v3944_v62, %v3939_v60 }
0x254a   :  { %v3940_v20 = vmul.f32 %v3938_v47, %v3934_v61 }
0x254c   :  { %v8031_v0 = vadd.f32 %v3944_v62, %v3940_v20 }
0x254e   :  { %v3966_v2 = vpack.c.bf16 %v8031_v0, %v8029_v63 }
0x2550   :  { %6522 = vmatmul.mubr.msk.bf16.vlgmr.msra.gmra.mxu0 %vm209_vm0, %v3966_v2  ;;  %6530 = vmatmul.mubr.msk.bf16.vlgmr.msra.gmra.mxu1 %vm209_vm0, %v3966_v2 }
0x2551   :  { %6534 = vmatpush3.bf16.msra.mxu0 %v6779_v7  ;;  %6537 = vmatprep.mubr.msk.bf16.mxu0 %vm7166_vm1, %v7165_v18 }
0x2552   :  { %6535 = vmatprep.subr.bf16.mxu0 %v7165_v18  ;;  %6543 = vmatprep.mubr.msk.bf16.mxu1 %vm7166_vm1, %v7165_v18 }
0x2555   :  { %6536 = vmatpush3.bf16.msra.mxu0 %v6780_v55 }
0x2556   :  { %6547 = vmatprep.subr.bf16.mxu0 %v7165_v18 }
0x2558   :  { %6538 = vmatmul.mubr.msk.bf16.vlgmr.msra.gmra.mxu0 %vm209_vm0, %v3966_v2 }
0x2559   :  { %6549 = vmatprep.mubr.msk.bf16.mxu0 %vm7166_vm1, %v7165_v18 }
0x2610   :  { %v4020_v22 = vpop.f32.mrf.mxu0  ;;  %v4077_v4 = vpop.f32.mrf.mxu1 }
0x2611   :  { %v4078_v5 = vadd.f32 %v4077_v4, %v4030_v3  ;;  %v4021_v48 = vadd.f32 %v4020_v22, %v3970_v15 }
0x2612   :  { %v6523_v8 = vpop.f32.mrf.mxu0  ;;  %v6531_v12 = vpop.f32.mrf.mxu1 }
0x2613   :  { %v8055_v16 = vpack.c.bf16 %v4078_v5, %v4078_v5  ;;  %v4141_v36 = vpack.c.bf16 %v4021_v48, %v4021_v48 }
0x2614   :  { %v4023_v1 = vpop.f32.mrf.mxu0  ;;  %v4080_v10 = vpop.f32.mrf.mxu1 }
0x2615   :  { %v4151_v35 = vsel %vm447_vm2, %v8055_v16, 0  ;;  %v4081_v44 = vadd.f32 %v4080_v10, %v4030_v3  ;;  %v4024_v32 = vadd.f32 %v4023_v1, %v3970_v15 }
0x2616   :  { %v6524_v43 = vpop.f32.mrf.mxu0  ;;  %v6532_v24 = vpop.f32.mrf.mxu1  ;;  %6542 = vmatpush3.bf16.xpose.msra.mxu1 %v4151_v35 }
0x2617   :  { %v4144_v25 = vpack.c.bf16 %v4081_v44, %v4081_v44  ;;  %6553 = vmatprep.subr.bf16.mxu1 %v7165_v18  ;;  %v4142_v34 = vpack.c.bf16 %v4024_v32, %v4024_v32 }
0x2618   :  { %v4134_v46 = vpop.f32.mrf.mxu0 }
0x2619   :  { %v4197_v27 = vsel %vm447_vm2, %v4144_v25, 0  ;;  %v4135_v28 = vadd.f32 %v4134_v46, %v4087_v19 }
0x261a   :  { %v6539_v37 = vpop.f32.mrf.mxu0  ;;  %6548 = vmatpush3.bf16.xpose.msra.mxu0 %v4197_v27 }
0x261b   :  { %v8063_v33 = vpack.c.bf16 %v4135_v28, %v4135_v28  ;;  %6559 = vmatprep.subr.bf16.mxu0 %v7165_v18 }
0x261c   :  { %v4137_v56 = vpop.f32.mrf.mxu0 }
0x261d   :  { %v4271_v21 = vsel %vm574_vm3, %v8063_v33, 0  ;;  %v4138_v14 = vadd.f32 %v4137_v56, %v4087_v19  ;;  %6544 = vmatmul.mubr.msk.bf16.vlgmr.msra.gmra.mxu1 %vm447_vm2, %v4141_v36 }
0x261e   :  { %v6540_v41 = vpop.f32.mrf.mxu0  ;;  %6554 = vmatpush3.bf16.msra.mxu1 %v4271_v21  ;;  %6555 = vmatprep.mubr.msk.bf16.mxu1 %vm7166_vm1, %v7165_v18 }
0x261f   :  { %v8071_v42 = vpack.c.bf16 %v4138_v14, %v4138_v14  ;;  %6565 = vmatprep.subr.bf16.mxu1 %v7165_v18 }
0x2621   :  { %v4317_v49 = vsel %vm574_vm3, %v8071_v42, 0  ;;  %6550 = vmatmul.mubr.msk.bf16.vlgmr.msra.gmra.mxu0 %vm447_vm2, %v4142_v34 }
0x2622   :  { %6560 = vmatpush3.bf16.msra.mxu0 %v4317_v49  ;;  %6561 = vmatprep.mubr.msk.bf16.mxu0 %vm7166_vm1, %v7165_v18 }
0x2623   :  { %6571 = vmatprep.subr.bf16.mxu0 %v7165_v18 }
0x26dd   :  { %v4187_v57 = vpop.f32.mrf.mxu1 }
0x26de   :  { %v4239_v50 = vmul.f32 0.25, %v4187_v57 }
0x26df   :  { %v6545_v52 = vpop.f32.mrf.mxu1 }
0x26e0   :  { %v4241_v54 = vsel %vm7413_vm4, %v4239_v50, -1e+30 }
0x26e1   :  { %v4190_v53 = vpop.f32.mrf.mxu1  ;;  %v4233_v40 = vpop.f32.mrf.mxu0  ;;  %v4243_v11 = vsel %vm546_vm5, %v4241_v54, -inf }
0x26e2   :  { %v4240_v38 = vmul.f32 0.25, %v4233_v40  ;;  %4244 = vmax.xlane.f32.xlu0 %v4243_v11 }
0x26e3   :  { %v6546_v23 = vpop.f32.mrf.mxu1  ;;  %v6551_v39 = vpop.f32.mrf.mxu0 }
0x26e4   :  { %v4242_v58 = vsel %vm7413_vm4, %v4240_v38, -1e+30 }
0x26e5   :  { %v4236_v26 = vpop.f32.mrf.mxu0  ;;  %v4246_v13 = vsel %vm546_vm5, %v4242_v58, -inf }
0x26e6   :  { %4247 = vmax.xlane.f32.xlu1 %v4246_v13 }
0x26e7   :  { %v6552_v47 = vpop.f32.mrf.mxu0 }
0x26f7   :  { %4416 = vrot.lane.b32.xlu1 %v4144_v25, %s7167_s14 }
0x276b   :  { %v4245_v30 = vpop.xlane.xlu0 %4244 }
0x276c   :  { %v4249_v59 = vsub.f32 %v4241_v54, %v4245_v30 }
0x276e   :  { %v4251_v60 = vmul.f32 1.442695, %v4249_v59 }
0x276f   :  { %v4248_v61 = vpop.xlane.xlu1 %4247 }
0x2770   :  { %6891 = vpow2.f32 %v4251_v60  ;;  %v4250_v62 = vsub.f32 %v4242_v58, %v4248_v61 }
0x2772   :  { %v4253_v20 = vmul.f32 1.442695, %v4250_v62 }
0x2773   :  { %v4417_v22 = vpop.permute.xlu1 %4416 }
0x2774   :  { %6893 = vpow2.f32 %v4253_v20  ;;  %v4422_v19 = vsel %vm447_vm2, %v4417_v22, 0 }
0x277d   :  { %v6892_v7 = vpop.eup %6891 }
0x277e   :  { %v4255_v2 = vsel %vm546_vm5, %v6892_v7, 0.0 }
0x277f   :  { %4256 = vadd.xlane.f32.xlu0 %v4255_v2 }
0x2781   :  { %v6894_v55 = vpop.eup %6893 }
0x2782   :  { %v4258_v3 = vsel %vm546_vm5, %v6894_v55, 0.0 }
0x2783   :  { %4259 = vadd.xlane.f32.xlu1 %v4258_v3 }
0x2794   :  { %4361 = vrot.lane.b32.xlu1 %v4141_v36, %s7167_s14 }
0x2795   :  { %4364 = vrot.lane.b32.xlu0 %v8055_v16, %s7167_s14 }
0x2798   :  { %4413 = vrot.lane.b32.xlu1 %v4142_v34, %s7167_s14 }
0x2808   :  { %v4257_v4 = vpop.xlane.xlu0 %4256 }
0x2809   :  { %6895 = vrcp.f32 %v4257_v4 }
0x280c   :  { %v4260_v5 = vpop.xlane.xlu1 %4259  ;;  %v4365_v15 = vpop.permute.xlu0 %4364 }
0x280d   :  { %6897 = vrcp.f32 %v4260_v5  ;;  %v4370_v35 = vsel %vm447_vm2, %v4365_v15, 0  ;;  %v6781_v15 = vld [vmem:[#allocation13 + $0x70] sm:$0xff]  }
0x2810   :  { %v4362_v43 = vpop.permute.xlu1 %4361 }
0x2814   :  { %v4414_v24 = vpop.permute.xlu1 %4413 }
0x2816   :  { %v6896_v8 = vpop.eup %6895 }
0x2817   :  { %v4263_v12 = vmul.f32 %v6896_v8, %v6892_v7 }
0x2819   :  { %v4265_v1 = vpack.c.bf16 %v4263_v12, %v4263_v12 }
0x281a   :  { %v6898_v10 = vpop.eup %6897 }
0x281b   :  { %v4264_v44 = vmul.f32 %v6898_v10, %v6894_v55  ;;  %6556 = vmatmul.mubr.msk.bf16.vlgmr.msra.gmra.mxu1 %vm546_vm5, %v4265_v1  ;;  %v6782_v1 = vld [vmem:[#allocation14 + $0x58] sm:$0xff]   ;;  %v6783_v10 = vld [vmem:[#allocation14 + $0x50] sm:$0xff]  }
0x281c   :  { %6566 = vmatpush3.bf16.xpose.msra.mxu1 %v4370_v35  ;;  %6567 = vmatprep.mubr.msk.bf16.mxu1 %vm7166_vm1, %v7165_v18  ;;  %v6784_v35 = vld [vmem:[#allocation13 + $0x78] sm:$0xff]  }
0x281d   :  { %v4266_v16 = vpack.c.bf16 %v4264_v44, %v4264_v44  ;;  %6577 = vmatprep.subr.bf16.mxu1 %v7165_v18 }
0x281f   :  { %6562 = vmatmul.mubr.msk.bf16.vlgmr.msra.gmra.mxu0 %vm546_vm5, %v4266_v16 }
0x2820   :  { %6572 = vmatpush3.bf16.xpose.msra.mxu0 %v4422_v19  ;;  %6573 = vmatprep.mubr.msk.bf16.mxu0 %vm7166_vm1, %v7165_v18 }
0x2821   :  { %6583 = vmatprep.subr.bf16.mxu0 %v7165_v18 }
0x2823   :  { %6568 = vmatmul.mubr.msk.bf16.vlgmr.msra.gmra.mxu1 %vm447_vm2, %v4362_v43 }
0x2824   :  { %6579 = vmatprep.mubr.msk.bf16.mxu1 %vm7166_vm1, %v7165_v18 }
0x2827   :  { %6574 = vmatmul.mubr.msk.bf16.vlgmr.msra.gmra.mxu0 %vm447_vm2, %v4414_v24 }
0x2828   :  { %6585 = vmatprep.mubr.msk.bf16.mxu0 %vm7166_vm1, %v7165_v18 }
0x28db   :  { %v8109_v48 = vpop.f32.mrf.mxu1 }
0x28dd   :  { %v6557_v25 = vpop.f32.mrf.mxu1 }
0x28df   :  { %v4310_v46 = vpop.f32.mrf.mxu1  ;;  %v8111_v27 = vpop.f32.mrf.mxu0 }
0x28e0   :  { %v4359_v28 = vpack.c.bf16 %v8111_v27, %v8109_v48 }
0x28e1   :  { %v6558_v37 = vpop.f32.mrf.mxu1  ;;  %v6563_v36 = vpop.f32.mrf.mxu0 }
0x28e2   :  { %v8154_v36 = vld [vmem:[#allocation16 + $0x4] sm:$0xf] }
0x28e3   :  { %v4356_v32 = vpop.f32.mrf.mxu0  ;;  %v4406_v56 = vpop.f32.mrf.mxu1 }
0x28e4   :  { %v4464_v21 = vmul.f32 0.25, %v4406_v56  ;;  %v4795_v56 = vrot.slane %v8154_v36, %v7375_v45 }
0x28e5   :  { %v6564_v14 = vpop.f32.mrf.mxu0  ;;  %v6569_v41 = vpop.f32.mrf.mxu1 }
0x28e6   :  { %v4466_v34 = vsel %vm7413_vm4, %v4464_v21, -1e+30 }
0x28e7   :  { %v4409_v49 = vpop.f32.mrf.mxu1  ;;  %v4458_v57 = vpop.f32.mrf.mxu0  ;;  %v4468_v50 = vsel %vm546_vm5, %v4466_v34, -inf }
0x28e8   :  { %v4465_v52 = vmul.f32 0.25, %v4458_v57  ;;  %4469 = vmax.xlane.f32.xlu0 %v4468_v50 }
0x28e9   :  { %v6570_v54 = vpop.f32.mrf.mxu1  ;;  %v6575_v53 = vpop.f32.mrf.mxu0 }
0x28ea   :  { %v4467_v40 = vsel %vm7413_vm4, %v4465_v52, -1e+30  ;;  %v6785_v53 = vld [vmem:[#allocation14 + $0x48] sm:$0xff]  }
0x28eb   :  { %v4461_v11 = vpop.f32.mrf.mxu0  ;;  %v4471_v38 = vsel %vm546_vm5, %v4467_v40, -inf }
0x28ec   :  { %4472 = vmax.xlane.f32.xlu1 %v4471_v38 }
0x28ed   :  { %v6576_v23 = vpop.f32.mrf.mxu0 }
0x28ee   :  { %v4694_v23 = vrot.slane %v8049_v6, %v7483_v9  ;;  %v6788_v6 = vld [vmem:[#allocation14 + $0x60] sm:$0xff]  }
0x28fd   :  { %4542 = vrot.lane.b32.xlu1 %v8071_v42, %s7167_s14 }
0x2971   :  { %v4470_v39 = vpop.xlane.xlu0 %4469 }
0x2972   :  { %v4474_v58 = vsub.f32 %v4466_v34, %v4470_v39 }
0x2974   :  { %v4476_v26 = vmul.f32 1.442695, %v4474_v58 }
0x2975   :  { %v4473_v13 = vpop.xlane.xlu1 %4472 }
0x2976   :  { %6899 = vpow2.f32 %v4476_v26  ;;  %v4475_v47 = vsub.f32 %v4467_v40, %v4473_v13  ;;  %v6786_v40 = vld [vmem:[#allocation14 + $0x40] sm:$0xff]  }
0x2978   :  { %v4478_v30 = vmul.f32 1.442695, %v4475_v47 }
0x2979   :  { %v4543_v59 = vpop.permute.xlu1 %4542 }
0x297a   :  { %6901 = vpow2.f32 %v4478_v30  ;;  %v4548_v60 = vsel %vm574_vm3, %v4543_v59, 0 }
0x297b   :  { %6584 = vmatpush3.bf16.msra.mxu0 %v4548_v60 }
0x297c   :  { %6595 = vmatprep.subr.bf16.mxu0 %v7165_v18 }
0x2983   :  { %v6900_v61 = vpop.eup %6899 }
0x2984   :  { %v4480_v62 = vsel %vm546_vm5, %v6900_v61, 0.0 }
0x2985   :  { %4481 = vadd.xlane.f32.xlu0 %v4480_v62 }
0x2987   :  { %v6902_v20 = vpop.eup %6901 }
0x2988   :  { %v4483_v42 = vsel %vm546_vm5, %v6902_v20, 0.0 }
0x2989   :  { %4484 = vadd.xlane.f32.xlu0 %v4483_v42 }
0x299f   :  { %4493 = vrot.lane.b32.xlu0 %v8063_v33, %s7167_s14 }
0x2a0e   :  { %v4482_v7 = vpop.xlane.xlu0 %4481 }
0x2a0f   :  { %6903 = vrcp.f32 %v4482_v7 }
0x2a12   :  { %v4485_v2 = vpop.xlane.xlu0 %4484 }
0x2a13   :  { %6905 = vrcp.f32 %v4485_v2 }
0x2a16   :  { %v4494_v55 = vpop.permute.xlu0 %4493 }
0x2a17   :  { %v4499_v3 = vsel %vm574_vm3, %v4494_v55, 0 }
0x2a18   :  { %6578 = vmatpush3.bf16.msra.mxu1 %v4499_v3 }
0x2a19   :  { %6589 = vmatprep.subr.bf16.mxu1 %v7165_v18 }
0x2a1c   :  { %v6904_v22 = vpop.eup %6903 }
0x2a1d   :  { %v4488_v4 = vmul.f32 %v6904_v22, %v6900_v61  ;;  %v6787_v61 = vld [vmem:[#allocation14 + $0x68] sm:$0xff]  }
0x2a1f   :  { %v4490_v5 = vpack.c.bf16 %v4488_v4, %v4488_v4 }
0x2a20   :  { %v6906_v8 = vpop.eup %6905 }
0x2a21   :  { %v4489_v12 = vmul.f32 %v6906_v8, %v6902_v20  ;;  %6580 = vmatmul.mubr.msk.bf16.vlgmr.msra.gmra.mxu1 %vm546_vm5, %v4490_v5 }
0x2a22   :  { %6591 = vmatprep.mubr.msk.bf16.mxu1 %vm7166_vm1, %v7165_v18  ;;  %6590 = vmatpush3.bf16.msra.mxu1 %v6784_v35 }
0x2a23   :  { %v4491_v33 = vpack.c.bf16 %v4489_v12, %v4489_v12  ;;  %6601 = vmatprep.subr.bf16.mxu1 %v7165_v18 }
0x2a25   :  { %6586 = vmatmul.mubr.msk.bf16.vlgmr.msra.gmra.mxu0 %vm546_vm5, %v4491_v33 }
0x2a26   :  { %6596 = vmatpush3.bf16.msra.mxu0 %v6781_v15  ;;  %6597 = vmatprep.mubr.msk.bf16.mxu0 %vm7166_vm1, %v7165_v18 }
0x2a27   :  { %6609 = vmatprep.subr.bf16.mxu0 %v7165_v18 }
0x2a2d   :  { %6598 = vmatmul.mubr.msk.bf16.vlgmr.msra.gmra.mxu0 %vm447_vm2, %v4359_v28 }
0x2a2e   :  { %6610 = vmatpush3.bf16.msra.mxu0 %v6782_v1  ;;  %6613 = vmatprep.mubr.msk.bf16.mxu0 %vm7166_vm1, %v7165_v18 }
0x2a2f   :  { %6611 = vmatprep.subr.bf16.mxu0 %v7165_v18 }
0x2a32   :  { %6612 = vmatpush3.bf16.msra.mxu0 %v6783_v10 }
0x2a33   :  { %6625 = vmatprep.subr.bf16.mxu0 %v7165_v18 }
0x2a35   :  { %6614 = vmatmul.mubr.msk.bf16.vlgmr.msra.gmra.mxu0 %vm209_vm0, %v7865_v31 }
0x2a36   :  { %6627 = vmatprep.mubr.msk.bf16.mxu0 %vm7166_vm1, %v7165_v18 }
0x2ae1   :  { %v4535_v44 = vpop.f32.mrf.mxu1 }
0x2ae3   :  { %v6581_v16 = vpop.f32.mrf.mxu1 }
0x2ae5   :  { %v4538_v19 = vpop.f32.mrf.mxu1  ;;  %v4584_v43 = vpop.f32.mrf.mxu0 }
0x2ae6   :  { %v4590_v24 = vpack.c.bf16 %v4584_v43, %v4535_v44 }
0x2ae7   :  { %v6582_v48 = vpop.f32.mrf.mxu1  ;;  %v6587_v25 = vpop.f32.mrf.mxu0 }
0x2ae8   :  { %6592 = vmatmul.mubr.msk.bf16.vlgmr.msra.gmra.mxu1 %vm447_vm2, %v4590_v24 }
0x2ae9   :  { %v4587_v46 = vpop.f32.mrf.mxu0  ;;  %6605 = vmatprep.mubr.msk.bf16.mxu1 %vm7166_vm1, %v7165_v18  ;;  %6602 = vmatpush3.bf16.msra.mxu1 %v6785_v53 }
0x2aea   :  { %6603 = vmatprep.subr.bf16.mxu1 %v7165_v18 }
0x2aeb   :  { %v6588_v27 = vpop.f32.mrf.mxu0 }
0x2aed   :  { %v4684_v28 = vpop.f32.mrf.mxu0  ;;  %6604 = vmatpush3.bf16.msra.mxu1 %v6786_v40 }
0x2aee   :  { %6617 = vmatprep.subr.bf16.mxu1 %v7165_v18 }
0x2aef   :  { %v6599_v37 = vpop.f32.mrf.mxu0 }
0x2af1   :  { %v4687_v32 = vpop.f32.mrf.mxu0 }
0x2af3   :  { %v6600_v21 = vpop.f32.mrf.mxu0 }
0x2af5   :  { %v4845_v14 = vpop.f32.mrf.mxu0 }
0x2af6   :  { %v4846_v41 = vadd.f32 %v4845_v14, %v4795_v56 }
0x2af7   :  { %v6615_v34 = vpop.f32.mrf.mxu0 }
0x2af8   :  { %v8158_v49 = vpack.c.bf16 %v4846_v41, %v4846_v41 }
0x2af9   :  { %v4848_v57 = vpop.f32.mrf.mxu0 }
0x2afa   :  { %v4919_v50 = vsel %vm447_vm2, %v8158_v49, 0  ;;  %v4849_v52 = vadd.f32 %v4848_v57, %v4795_v56 }
0x2afb   :  { %v6616_v54 = vpop.f32.mrf.mxu0  ;;  %6626 = vmatpush3.bf16.xpose.msra.mxu0 %v4919_v50 }
0x2afc   :  { %6637 = vmatprep.subr.bf16.mxu0 %v7165_v18  ;;  %v4912_v20 = vpack.c.bf16 %v4849_v52, %v4849_v52 }
0x2ba8   :  { %v4634_v11 = vpop.f32.mrf.mxu1 }
0x2ba9   :  { %v4685_v38 = vadd.f32 %v4684_v28, %v4634_v11 }
0x2baa   :  { %v6593_v39 = vpop.f32.mrf.mxu1 }
0x2bab   :  { %v4695_v26 = vadd.f32 %v4694_v23, %v4685_v38 }
0x2bac   :  { %v4637_v58 = vpop.f32.mrf.mxu1 }
0x2bad   :  { %v4688_v13 = vadd.f32 %v4687_v32, %v4637_v58  ;;  %v8168_v59 = vadd.f32 %v4695_v26, %v8029_v63  ;;  %v4965_v63 = vsel %vm447_vm2, %v4912_v20, 0 }
0x2bae   :  { %v6594_v47 = vpop.f32.mrf.mxu1 }
0x2baf   :  { %v4696_v30 = vadd.f32 %v4694_v23, %v4688_v13 }
0x2bb1   :  { %v8171_v60 = vadd.f32 %v4696_v30, %v8031_v0  ;;  %v4735_v0 = vrot.slane %v8154_v36, %v7347_v29 }
0x2bb3   :  { %v4730_v62 = vpack.c.bf16 %v8171_v60, %v8168_v59 }
0x2bb5   :  { %6606 = vmatmul.mubr.msk.bf16.vlgmr.msra.gmra.mxu1 %vm209_vm0, %v4730_v62 }
0x2bb6   :  { %6618 = vmatpush3.bf16.msra.mxu1 %v6787_v61  ;;  %6621 = vmatprep.mubr.msk.bf16.mxu1 %vm7166_vm1, %v7165_v18 }
0x2bb7   :  { %6619 = vmatprep.subr.bf16.mxu1 %v7165_v18 }
0x2bba   :  { %6620 = vmatpush3.bf16.msra.mxu1 %v6788_v6 }
0x2bbb   :  { %6631 = vmatprep.subr.bf16.mxu1 %v7165_v18 }
0x2bbd   :  { %6622 = vmatmul.mubr.msk.bf16.vlgmr.msra.gmra.mxu1 %vm209_vm0, %v7865_v31  ;;  %v4855_v31 = vrot.slane %v8154_v36, %v7382_v51 }
0x2bbe   :  { %6632 = vmatpush3.bf16.xpose.msra.mxu1 %v4965_v63  ;;  %6633 = vmatprep.mubr.msk.bf16.mxu1 %vm7166_vm1, %v7165_v18 }
0x2bbf   :  { %6643 = vmatprep.subr.bf16.mxu1 %v7165_v18 }
0x2c75   :  { %v4785_v42 = vpop.f32.mrf.mxu1 }
0x2c76   :  { %v4786_v7 = vadd.f32 %v4785_v42, %v4735_v0 }
0x2c77   :  { %v6607_v2 = vpop.f32.mrf.mxu1 }
0x2c78   :  { %v4909_v55 = vpack.c.bf16 %v4786_v7, %v4786_v7 }
0x2c79   :  { %v4788_v3 = vpop.f32.mrf.mxu1 }
0x2c7a   :  { %v4789_v22 = vadd.f32 %v4788_v3, %v4735_v0  ;;  %6628 = vmatmul.mubr.msk.bf16.vlgmr.msra.gmra.mxu0 %vm447_vm2, %v4909_v55 }
0x2c7b   :  { %v6608_v4 = vpop.f32.mrf.mxu1  ;;  %6639 = vmatprep.mubr.msk.bf16.mxu0 %vm7166_vm1, %v7165_v18 }
0x2c7c   :  { %v4910_v5 = vpack.c.bf16 %v4789_v22, %v4789_v22 }
0x2c7d   :  { %v4902_v8 = vpop.f32.mrf.mxu1 }
0x2c7e   :  { %v4903_v12 = vadd.f32 %v4902_v8, %v4855_v31  ;;  %6634 = vmatmul.mubr.msk.bf16.vlgmr.msra.gmra.mxu1 %vm447_vm2, %v4910_v5 }
0x2c7f   :  { %v6623_v15 = vpop.f32.mrf.mxu1  ;;  %6645 = vmatprep.mubr.msk.bf16.mxu1 %vm7166_vm1, %v7165_v18 }
0x2c80   :  { %v8196_v33 = vpack.c.bf16 %v4903_v12, %v4903_v12 }
0x2c81   :  { %v4905_v1 = vpop.f32.mrf.mxu1 }
0x2c82   :  { %v5039_v10 = vsel %vm574_vm3, %v8196_v33, 0  ;;  %v4906_v35 = vadd.f32 %v4905_v1, %v4855_v31 }
0x2c83   :  { %v6624_v44 = vpop.f32.mrf.mxu1  ;;  %6638 = vmatpush3.bf16.msra.mxu0 %v5039_v10 }
0x2c84   :  { %v8200_v16 = vpack.c.bf16 %v4906_v35, %v4906_v35  ;;  %6649 = vmatprep.subr.bf16.mxu0 %v7165_v18 }
0x2c86   :  { %v5085_v19 = vsel %vm574_vm3, %v8200_v16, 0 }
0x2c87   :  { %6644 = vmatpush3.bf16.msra.mxu1 %v5085_v19 }
0x2c88   :  { %6655 = vmatprep.subr.bf16.mxu1 %v7165_v18 }
0x2d3a   :  { %v4955_v43 = vpop.f32.mrf.mxu0 }
0x2d3b   :  { %v5007_v24 = vmul.f32 0.25, %v4955_v43 }
0x2d3c   :  { %v6629_v48 = vpop.f32.mrf.mxu0 }
0x2d3d   :  { %v5009_v25 = vsel %vm7413_vm4, %v5007_v24, -1e+30 }
0x2d3e   :  { %v4958_v46 = vpop.f32.mrf.mxu0  ;;  %v5001_v27 = vpop.f32.mrf.mxu1  ;;  %v5011_v28 = vsel %vm546_vm5, %v5009_v25, -inf }
0x2d3f   :  { %v5008_v37 = vmul.f32 0.25, %v5001_v27  ;;  %5012 = vmax.xlane.f32.xlu1 %v5011_v28 }
0x2d40   :  { %v6630_v32 = vpop.f32.mrf.mxu0  ;;  %v6635_v56 = vpop.f32.mrf.mxu1 }
0x2d41   :  { %v5010_v21 = vsel %vm7413_vm4, %v5008_v37, -1e+30 }
0x2d42   :  { %v5004_v14 = vpop.f32.mrf.mxu1  ;;  %v5014_v41 = vsel %vm546_vm5, %v5010_v21, -inf }
0x2d43   :  { %5015 = vmax.xlane.f32.xlu0 %v5014_v41 }
0x2d44   :  { %v6636_v34 = vpop.f32.mrf.mxu1 }
0x2d50   :  { %5184 = vrot.lane.b32.xlu1 %v4912_v20, %s7167_s14 }
0x2dc8   :  { %v5013_v57 = vpop.xlane.xlu1 %5012 }
0x2dc9   :  { %v5017_v50 = vsub.f32 %v5009_v25, %v5013_v57 }
0x2dcb   :  { %v5019_v52 = vmul.f32 1.442695, %v5017_v50 }
0x2dcc   :  { %v5016_v54 = vpop.xlane.xlu0 %5015  ;;  %v5185_v58 = vpop.permute.xlu1 %5184 }
0x2dcd   :  { %6907 = vpow2.f32 %v5019_v52  ;;  %v5018_v53 = vsub.f32 %v5010_v21, %v5016_v54  ;;  %v5190_v0 = vsel %vm447_vm2, %v5185_v58, 0 }
0x2dcf   :  { %v5021_v40 = vmul.f32 1.442695, %v5018_v53 }
0x2dd1   :  { %6909 = vpow2.f32 %v5021_v40 }
0x2dda   :  { %v6908_v11 = vpop.eup %6907 }
0x2ddb   :  { %v5023_v38 = vsel %vm546_vm5, %v6908_v11, 0.0 }
0x2ddc   :  { %5024 = vadd.xlane.f32.xlu0 %v5023_v38 }
0x2dde   :  { %v6910_v23 = vpop.eup %6909 }
0x2ddf   :  { %v5026_v39 = vsel %vm546_vm5, %v6910_v23, 0.0 }
0x2de0   :  { %5027 = vadd.xlane.f32.xlu1 %v5026_v39 }
0x2df1   :  { %5129 = vrot.lane.b32.xlu1 %v4909_v55, %s7167_s14 }
0x2df2   :  { %5132 = vrot.lane.b32.xlu0 %v8158_v49, %s7167_s14 }
0x2df5   :  { %5181 = vrot.lane.b32.xlu1 %v4910_v5, %s7167_s14 }
0x2e65   :  { %v5025_v26 = vpop.xlane.xlu0 %5024 }
0x2e66   :  { %6911 = vrcp.f32 %v5025_v26 }
0x2e69   :  { %v5028_v13 = vpop.xlane.xlu1 %5027  ;;  %v5133_v61 = vpop.permute.xlu0 %5132 }
0x2e6a   :  { %6913 = vrcp.f32 %v5028_v13  ;;  %v5138_v20 = vsel %vm447_vm2, %v5133_v61, 0 }
0x2e6d   :  { %v5130_v42 = vpop.permute.xlu1 %5129 }
0x2e71   :  { %v5182_v7 = vpop.permute.xlu1 %5181 }
0x2e73   :  { %v6912_v47 = vpop.eup %6911 }
0x2e74   :  { %v5031_v30 = vmul.f32 %v6912_v47, %v6908_v11  ;;  %v6789_v47 = vld [vmem:[#allocation14 + $0x70] sm:$0xff]  }
0x2e76   :  { %v5033_v62 = vpack.c.bf16 %v5031_v30, %v5031_v30  ;;  %v6790_v30 = vld [vmem:[#allocation14 + $0x78] sm:$0xff]  }
0x2e77   :  { %v6914_v6 = vpop.eup %6913 }
0x2e78   :  { %v5032_v63 = vmul.f32 %v6914_v6, %v6910_v23  ;;  %6640 = vmatmul.mubr.msk.bf16.vlgmr.msra.gmra.mxu0 %vm546_vm5, %v5033_v62 }
0x2e79   :  { %6650 = vmatpush3.bf16.xpose.msra.mxu0 %v5138_v20  ;;  %6651 = vmatprep.mubr.msk.bf16.mxu0 %vm7166_vm1, %v7165_v18 }
0x2e7a   :  { %v5034_v49 = vpack.c.bf16 %v5032_v63, %v5032_v63  ;;  %6661 = vmatprep.subr.bf16.mxu0 %v7165_v18 }
0x2e7c   :  { %6646 = vmatmul.mubr.msk.bf16.vlgmr.msra.gmra.mxu1 %vm546_vm5, %v5034_v49 }
0x2e7d   :  { %6656 = vmatpush3.bf16.xpose.msra.mxu1 %v5190_v0  ;;  %6657 = vmatprep.mubr.msk.bf16.mxu1 %vm7166_vm1, %v7165_v18 }
0x2e7e   :  { %6667 = vmatprep.subr.bf16.mxu1 %v7165_v18 }
0x2e80   :  { %6652 = vmatmul.mubr.msk.bf16.vlgmr.msra.gmra.mxu0 %vm447_vm2, %v5130_v42 }
0x2e81   :  { %6663 = vmatprep.mubr.msk.bf16.mxu0 %vm7166_vm1, %v7165_v18 }
0x2e84   :  { %6658 = vmatmul.mubr.msk.bf16.vlgmr.msra.gmra.mxu1 %vm447_vm2, %v5182_v7 }
0x2e85   :  { %6669 = vmatprep.mubr.msk.bf16.mxu1 %vm7166_vm1, %v7165_v18 }
0x2f38   :  { %v8235_v2 = vpop.f32.mrf.mxu0 }
0x2f3a   :  { %v6641_v55 = vpop.f32.mrf.mxu0 }
0x2f3c   :  { %v5078_v3 = vpop.f32.mrf.mxu0  ;;  %v8237_v22 = vpop.f32.mrf.mxu1 }
0x2f3d   :  { %v5127_v31 = vpack.c.bf16 %v8237_v22, %v8235_v2 }
0x2f3e   :  { %v6642_v4 = vpop.f32.mrf.mxu0  ;;  %v6647_v5 = vpop.f32.mrf.mxu1 }
0x2f40   :  { %v5124_v8 = vpop.f32.mrf.mxu1  ;;  %v5174_v12 = vpop.f32.mrf.mxu0 }
0x2f41   :  { %v5232_v15 = vmul.f32 0.25, %v5174_v12 }
0x2f42   :  { %v6648_v1 = vpop.f32.mrf.mxu1  ;;  %v6653_v10 = vpop.f32.mrf.mxu0 }
0x2f43   :  { %v5234_v35 = vsel %vm7413_vm4, %v5232_v15, -1e+30 }
0x2f44   :  { %v5177_v44 = vpop.f32.mrf.mxu0  ;;  %v5226_v19 = vpop.f32.mrf.mxu1  ;;  %v5236_v43 = vsel %vm546_vm5, %v5234_v35, -inf }
0x2f45   :  { %v5233_v24 = vmul.f32 0.25, %v5226_v19  ;;  %5237 = vmax.xlane.f32.xlu0 %v5236_v43 }
0x2f46   :  { %v6654_v48 = vpop.f32.mrf.mxu0  ;;  %v6659_v25 = vpop.f32.mrf.mxu1 }
0x2f47   :  { %v5235_v46 = vsel %vm7413_vm4, %v5233_v24, -1e+30 }
0x2f48   :  { %v5229_v27 = vpop.f32.mrf.mxu1  ;;  %v5239_v28 = vsel %vm546_vm5, %v5235_v46, -inf }
0x2f49   :  { %5240 = vmax.xlane.f32.xlu1 %v5239_v28 }
0x2f4a   :  { %v6660_v37 = vpop.f32.mrf.mxu1 }
0x2f5a   :  { %5310 = vrot.lane.b32.xlu1 %v8200_v16, %s7167_s14 }
0x2fce   :  { %v5238_v32 = vpop.xlane.xlu0 %5237 }
0x2fcf   :  { %v5242_v56 = vsub.f32 %v5234_v35, %v5238_v32 }
0x2fd1   :  { %v5244_v21 = vmul.f32 1.442695, %v5242_v56  ;;  %v6791_v56 = vld [vmem:[#allocation17 + $0x28] sm:$0xff]  }
0x2fd2   :  { %v5241_v14 = vpop.xlane.xlu1 %5240 }
0x2fd3   :  { %6915 = vpow2.f32 %v5244_v21  ;;  %v5243_v41 = vsub.f32 %v5235_v46, %v5241_v14 }
0x2fd5   :  { %v5246_v34 = vmul.f32 1.442695, %v5243_v41 }
0x2fd6   :  { %v5311_v57 = vpop.permute.xlu1 %5310 }
0x2fd7   :  { %6917 = vpow2.f32 %v5246_v34  ;;  %v5316_v17 = vsel %vm574_vm3, %v5311_v57, 0 }
0x2fd8   :  { %6668 = vmatpush3.bf16.msra.mxu1 %v5316_v17 }
0x2fd9   :  { %6679 = vmatprep.subr.bf16.mxu1 %v7165_v18 }
0x2fe0   :  { %v6916_v50 = vpop.eup %6915 }
0x2fe1   :  { %v5248_v52 = vsel %vm546_vm5, %v6916_v50, 0.0 }
0x2fe2   :  { %5249 = vadd.xlane.f32.xlu0 %v5248_v52  ;;  %v6937_v52 = vld [vmem:[%s8324_s8 + $0x4] sm:$0x7] }
0x2fe4   :  { %v6918_v54 = vpop.eup %6917 }
0x2fe5   :  { %v5251_v16 = vsel %vm546_vm5, %v6918_v54, 0.0 }
0x2fe6   :  { %5252 = vadd.xlane.f32.xlu0 %v5251_v16 }
0x2ffc   :  { %5261 = vrot.lane.b32.xlu0 %v8196_v33, %s7167_s14 }
0x306b   :  { %v5250_v53 = vpop.xlane.xlu0 %5249 }
0x306c   :  { %6919 = vrcp.f32 %v5250_v53 }
0x306f   :  { %v5253_v40 = vpop.xlane.xlu0 %5252 }
0x3070   :  { %6921 = vrcp.f32 %v5253_v40  ;;  %v6938_v40 = vld [vmem:[%s8325_s9 + $0x4] sm:$0x7] }
0x3073   :  { %v5262_v11 = vpop.permute.xlu0 %5261 }
0x3074   :  { %v5267_v38 = vsel %vm574_vm3, %v5262_v11, 0  ;;  %v5502_v11 = vrot.slane %v6938_v40, %v7382_v51 }
0x3075   :  { %6662 = vmatpush3.bf16.msra.mxu0 %v5267_v38 }
0x3076   :  { %6673 = vmatprep.subr.bf16.mxu0 %v7165_v18 }
0x3079   :  { %v6920_v23 = vpop.eup %6919 }
0x307a   :  { %v5256_v39 = vmul.f32 %v6920_v23, %v6916_v50 }
0x307c   :  { %v5258_v58 = vpack.c.bf16 %v5256_v39, %v5256_v39 }
0x307d   :  { %v6922_v26 = vpop.eup %6921 }
0x307e   :  { %v5257_v13 = vmul.f32 %v6922_v26, %v6918_v54  ;;  %6664 = vmatmul.mubr.msk.bf16.vlgmr.msra.gmra.mxu0 %vm546_vm5, %v5258_v58  ;;  %v5496_v54 = vrot.slane %v6937_v52, %v7382_v51 }
0x307f   :  { %6675 = vmatprep.mubr.msk.bf16.mxu0 %vm7166_vm1, %v7165_v18  ;;  %6674 = vmatpush3.bf16.msra.mxu0 %v6790_v30  ;;  %v5910_v30 = vld [vmem:[%s8331_s15 + $0x2] sm:$0x3] }
0x3080   :  { %v5259_v33 = vpack.c.bf16 %v5257_v13, %v5257_v13  ;;  %6685 = vmatprep.subr.bf16.mxu0 %v7165_v18  ;;  %v5520_v51 = vrot.slane %v5910_v30, %v7347_v29  ;;  %v5644_v29 = vld [vmem:[%s8332_s16 + $0x10] sm:$0xff] }
0x3082   :  { %6670 = vmatmul.mubr.msk.bf16.vlgmr.msra.gmra.mxu1 %vm546_vm5, %v5259_v33  ;;  %v6794_v33 = vld [vmem:[#allocation17 + $0x30] sm:$0xff]  }
0x3083   :  { %6680 = vmatpush3.bf16.msra.mxu1 %v6789_v47  ;;  %6681 = vmatprep.mubr.msk.bf16.mxu1 %vm7166_vm1, %v7165_v18  ;;  %v6793_v47 = vld [vmem:[#allocation17 + $0x38] sm:$0xff]  }
0x3084   :  { %6693 = vmatprep.subr.bf16.mxu1 %v7165_v18 }
0x308a   :  { %6682 = vmatmul.mubr.msk.bf16.vlgmr.msra.gmra.mxu1 %vm447_vm2, %v5127_v31  ;;  %v5462_v31 = vrot.slane %v8154_v36, %v7483_v9 }
0x308b   :  { %6697 = vmatprep.mubr.msk.bf16.mxu1 %vm7166_vm1, %v7165_v18  ;;  %6694 = vmatpush3.bf16.msra.mxu1 %v6793_v47 }
0x308c   :  { %6695 = vmatprep.subr.bf16.mxu1 %v7165_v18 }
0x308f   :  { %6696 = vmatpush3.bf16.msra.mxu1 %v6794_v33 }
0x313e   :  { %v5303_v61 = vpop.f32.mrf.mxu0 }
0x3140   :  { %v6665_v62 = vpop.f32.mrf.mxu0 }
0x3142   :  { %v5306_v6 = vpop.f32.mrf.mxu0  ;;  %v5352_v20 = vpop.f32.mrf.mxu1 }
0x3143   :  { %v5358_v63 = vpack.c.bf16 %v5352_v20, %v5303_v61 }
0x3144   :  { %v6666_v49 = vpop.f32.mrf.mxu0  ;;  %v6671_v0 = vpop.f32.mrf.mxu1 }
0x3145   :  { %6676 = vmatmul.mubr.msk.bf16.vlgmr.msra.gmra.mxu0 %vm447_vm2, %v5358_v63 }
0x3146   :  { %v5355_v42 = vpop.f32.mrf.mxu1  ;;  %6689 = vmatprep.mubr.msk.bf16.mxu0 %vm7166_vm1, %v7165_v18  ;;  %6686 = vmatpush3.bf16.msra.mxu0 %v6791_v56 }
0x3147   :  { %6687 = vmatprep.subr.bf16.mxu0 %v7165_v18  ;;  %v5645_v18 = vld [vmem:[%s8332_s16 + $0x18] sm:$0xff] }
0x3148   :  { %v6672_v7 = vpop.f32.mrf.mxu1 }
0x314a   :  { %v5452_v2 = vpop.f32.mrf.mxu1 }
0x314c   :  { %v6683_v55 = vpop.f32.mrf.mxu1 }
0x314d   :  { %v5642_v55 = vld [vmem:[%s8332_s16] sm:$0xff] }
0x314e   :  { %v5455_v3 = vpop.f32.mrf.mxu1 }
0x3150   :  { %v6684_v22 = vpop.f32.mrf.mxu1 }
0x3151   :  { %v5583_v22 = vrot.slane %v5910_v30, %v7375_v45 }
0x3205   :  { %v5402_v4 = vpop.f32.mrf.mxu0 }
0x3206   :  { %v5453_v5 = vadd.f32 %v5452_v2, %v5402_v4  ;;  %v5643_v2 = vld [vmem:[%s8332_s16 + $0x8] sm:$0xff] }
0x3207   :  { %v6677_v8 = vpop.f32.mrf.mxu0 }
0x3208   :  { %v5463_v12 = vadd.f32 %v5462_v31, %v5453_v5 }
0x3209   :  { %v5405_v15 = vpop.f32.mrf.mxu0 }
0x320a   :  { %v5456_v1 = vadd.f32 %v5455_v3, %v5405_v15  ;;  %v5465_v10 = vadd.f32 %v5463_v12, %v8168_v59  ;;  %v5646_v3 = vld [vmem:[#allocation2] sm:$0x1] }
0x320b   :  { %v6678_v35 = vpop.f32.mrf.mxu0  ;;  %6712 = vpush %v5646_v3 }
0x320c   :  { %v5464_v44 = vadd.f32 %v5462_v31, %v5456_v1  ;;  %v5467_v19 = vsel %vm209_vm0, %v5465_v10, 0.0 }
0x320d   :  { %5468 = vadd.xlane.f32.xlu1 %v5467_v19 }
0x320e   :  { %v5466_v43 = vadd.f32 %v5464_v44, %v8171_v60  ;;  %v6792_v60 = vld [vmem:[#allocation17 + $0x20] sm:$0xff]  }
0x320f   :  { %6688 = vmatpush3.bf16.msra.mxu0 %v6792_v60 }
0x3210   :  { %v5470_v24 = vsel %vm209_vm0, %v5466_v43, 0.0  ;;  %6701 = vmatprep.subr.mxu0 %v5645_v18 }
0x3211   :  { %5471 = vadd.xlane.f32.xlu0 %v5470_v24 }
0x323c   :  { %s6713_s10 = spop %6712 }
0x323d   :  { %v5648_v35 = vstv %s6713_s10 }
0x3296   :  { %v5469_v48 = vpop.xlane.xlu1 %5468 }
0x3297   :  { %v5473_v9 = vmul.f32 0.03125, %v5469_v48 }
0x3299   :  { %v5475_v36 = vsub.f32 %v5465_v10, %v5473_v9 }
0x329a   :  { %v5472_v25 = vpop.xlane.xlu0 %5471 }
0x329b   :  { %v5474_v46 = vmul.f32 0.03125, %v5472_v25  ;;  %v5477_v27 = vmul.f32 %v5475_v36, %v5475_v36 }
0x329d   :  { %v5476_v28 = vsub.f32 %v5466_v43, %v5474_v46  ;;  %v5479_v37 = vsel %vm209_vm0, %v5477_v27, 0.0 }
0x329e   :  { %5480 = vadd.xlane.f32.xlu0 %v5479_v37 }
0x329f   :  { %v5478_v59 = vmul.f32 %v5476_v28, %v5476_v28 }
0x32a1   :  { %v5482_v32 = vsel %vm209_vm0, %v5478_v59, 0.0 }
0x32a2   :  { %5483 = vadd.xlane.f32.xlu1 %v5482_v32 }
0x3327   :  { %v5481_v21 = vpop.xlane.xlu0 %5480 }
0x3328   :  { %v5485_v14 = vmul.f32 0.03125, %v5481_v21 }
0x332a   :  { %v5487_v41 = vadd.f32 1e-05, %v5485_v14 }
0x332b   :  { %v5484_v34 = vpop.xlane.xlu1 %5483 }
0x332c   :  { %6923 = vrsqrt.f32 %v5487_v41  ;;  %v5486_v57 = vmul.f32 0.03125, %v5484_v34 }
0x332e   :  { %v5488_v17 = vadd.f32 1e-05, %v5486_v57 }
0x3330   :  { %6925 = vrsqrt.f32 %v5488_v17 }
0x3339   :  { %v6924_v50 = vpop.eup %6923 }
0x333a   :  { %v5491_v16 = vmul.f32 %v6924_v50, %v5475_v36 }
0x333c   :  { %v5497_v38 = vmul.f32 %v5496_v54, %v5491_v16 }
0x333d   :  { %v6926_v53 = vpop.eup %6925 }
0x333e   :  { %v5492_v23 = vmul.f32 %v6926_v53, %v5476_v28  ;;  %v5503_v58 = vadd.f32 %v5502_v11, %v5497_v38 }
0x3340   :  { %v5498_v39 = vmul.f32 %v5496_v54, %v5492_v23 }
0x3342   :  { %v5504_v26 = vadd.f32 %v5502_v11, %v5498_v39 }
0x3344   :  { %v5516_v13 = vpack.c.bf16 %v5504_v26, %v5503_v58 }
0x3346   :  { %6690 = vmatmul.mubr.msk.bf16.vlgmr.msra.gmra.mxu0 %vm209_vm0, %v5516_v13 }
0x3347   :  { %6702 = vmatpush3.msra.mxu0 %v5645_v18 }
0x3348   :  { %6703 = vmatprep.subr.mxu0 %v5644_v29 }
0x3349   :  { %6704 = vmatpush3.msra.mxu0 %v5644_v29 }
0x334a   :  { %6705 = vmatprep.subr.mxu0 %v5643_v2 }
0x334b   :  { %6706 = vmatpush3.msra.mxu0 %v5643_v2 }
0x334c   :  { %6707 = vmatprep.subr.mxu0 %v5642_v55 }
0x334d   :  { %6708 = vmatpush3.msra.mxu0 %v5642_v55 }
0x3406   :  { %v5570_v61 = vpop.f32.mrf.mxu0 }
0x3407   :  { %v5571_v6 = vadd.f32 %v5570_v61, %v5520_v51 }
0x3408   :  { %v6691_v62 = vpop.f32.mrf.mxu0 }
0x3409   :  { %v5577_v0 = vmax.f32 %v5571_v6, 0.0 }
0x340a   :  { %v5573_v20 = vpop.f32.mrf.mxu0 }
0x340b   :  { %v5574_v63 = vadd.f32 %v5573_v20, %v5520_v51 }
0x340c   :  { %v6692_v49 = vpop.f32.mrf.mxu0 }
0x340d   :  { %v5578_v42 = vmax.f32 %v5574_v63, 0.0 }
0x340f   :  { %v5579_v7 = vpack.c.bf16 %v5578_v42, %v5577_v0 }
0x3411   :  { %6698 = vmatmul.mubr.msk.bf16.vlgmr.msra.gmra.mxu1 %vm209_vm0, %v5579_v7 }
0x34d1   :  { %v5633_v31 = vpop.f32.mrf.mxu1 }
0x34d2   :  { %v5634_v4 = vadd.f32 %v5633_v31, %v5583_v22 }
0x34d3   :  { %v6699_v5 = vpop.f32.mrf.mxu1 }
0x34d4   :  { %v5640_v8 = vadd.f32 %v5634_v4, %v5503_v58 }
0x34d5   :  { %v5636_v12 = vpop.f32.mrf.mxu1 }
0x34d6   :  { %v5637_v15 = vadd.f32 %v5636_v12, %v5583_v22  ;;  %6709 = vmatprep.mubr.msk.f32.mxu0 %vm209_vm0, %v5640_v8 }
0x34d7   :  { %v6700_v1 = vpop.f32.mrf.mxu1 }
0x34d8   :  { %v5641_v10 = vadd.f32 %v5637_v15, %v5504_v26 }
0x34da   :  { %6710 = vmatmul.mubr.msk.f32.vlgmr.msra.gmra.mxu0 %vm209_vm0, %v5641_v10 }
0x359a   :  { %v6711_v44 = vpop.f32.mrf.mxu0 }
0x359b   :  { %v5727_v19 = vadd.f32 %v6711_v44, %v5648_v35 }
0x359c   :  { %v5721_v43 = vpop.f32.mrf.mxu0 }
0x359d   :  { %v5920_v24 = vmul.f32 -1.442695, %v5727_v19  ;;  %v5722_v48 = vadd.f32 %v5721_v43, %v5648_v35 }
0x359f   :  { %6927 = vpow2.f32 %v5920_v24  ;;  %v5919_v45 = vmul.f32 -1.442695, %v5722_v48 }
0x35a1   :  { %6929 = vpow2.f32 %v5919_v45 }
0x35ac   :  { %v6928_v9 = vpop.eup %6927 }
0x35ad   :  { %v5737_v36 = vadd.f32 1.0, %v6928_v9 }
0x35ae   :  { %v6930_v25 = vpop.eup %6929 }
0x35af   :  { %6931 = vrcp.f32 %v5737_v36  ;;  %v5736_v46 = vadd.f32 1.0, %v6930_v25 }
0x35b1   :  { %6933 = vrcp.f32 %v5736_v46 }
0x35bc   :  { %v6932_v27 = vpop.eup %6931 }
0x35bd   :  { %5744 = vst.msk [vmem:[%s8334_s18 + $0x8] sm:$0xff] %vm5742_vm6, %v6932_v27 }
0x35be   :  { %v6934_v28 = vpop.eup %6933 }
0x35bf   :  { %5743 = vst.msk [vmem:[%s8334_s18] sm:$0xff] %vm5742_vm6, %v6934_v28 }
0x35c0   :  { %5749 = vsyncpa [#allocation4], 1 }
0x35c1   :  { %5750 = vsyncpa [#allocation6], 1 }
0x35c2   :  { %5751 = vsyncpa [#allocation9], 1 }
0x35c3   :  { %5752 = vsyncpa [#allocation12], 1 }
0x35c4   :  { %5753 = vsyncpa [#allocation15], 1 }
0x35c5   :  { %5754 = vsyncpa [#allocation18], 1 }

</bundles_post_ra>
